<compile_context>
chip_gen: v7x
topology: tpu7x:2x2x1
jax: 0.10.0
libtpu: 0.0.40
codegen_flags: <defaults>
</compile_context>

<pallas_src>
import functools

import jax
import jax.numpy as jnp
from jax import lax
from jax.experimental import pallas as pl
from jax.experimental.pallas import tpu as pltpu


_STATIC_UNROLL_T = 64       # fully unroll the time loop up to this many steps
_PROJ_CHUNK_ROWS = 256      # row-chunk size for the hoisted input projection


def _mult_hint(v, m):
    # pl.multiple_of hint only for traced values; keep Python ints static.
    return v if isinstance(v, int) else pl.multiple_of(v, m)


# -----------------------------------------------------------------------------
# Fused Pallas kernel: full PhysiRCNN forward for one batch block.
# -----------------------------------------------------------------------------
def _fused_kernel(hidden_size, n_layers, seq_len, x_ref, *rest):
    # x_ref   : (T*B, I)   time-major flattened input (row = t*B + b), f32
    # per layer (3 refs):
    #   wih   : (D_l, 8H)  bf16  [W_ih_fwd^T | W_ih_bwd^T]
    #   whh   : (2H, 8H)   f32   block-diag([W_hh_fwd^T, W_hh_bwd^T])
    #   bias  : (1, 8H)    f32   [b_ih+b_hh fwd | b_ih+b_hh bwd]
    # fc_w    : (2H + I, C) f32
    # fc_b    : (1, C)      f32
    # out_ref : (B, C)      f32
    # scratch : proj_sc (T*B, 8H) f32, seq_sc (T*B, 2H) f32
    H = hidden_size
    H2, H3, H4 = 2 * H, 3 * H, 4 * H
    T = seq_len
    nw = 3 * n_layers
    lstm_refs = rest[:nw]
    fc_w_ref, fc_b_ref, out_ref, proj_sc, seq_sc = rest[nw:]
    TB, I = x_ref.shape
    B = TB // T

    # Hoisted lane masks: sigmoid(x) == 0.5*tanh(0.5*x) + 0.5 on the i/f/o gate
    # lanes, plain tanh on the g lanes -> ONE full-width tanh per direction per
    # step instead of sigmoid + tanh (6 -> 4 EUP pushes per step).
    lane = lax.broadcasted_iota(jnp.int32, (B, H4), 1)
    is_g = jnp.logical_and(lane >= H2, lane < H3)
    pre = jnp.where(is_g, jnp.float32(1.0), jnp.float32(0.5))        # tanh pre-scale
    post_add = jnp.where(is_g, jnp.float32(0.0), jnp.float32(0.5))   # sigmoid shift

    # Unroll group for the recurrence (coalesced inter-layer stores).
    group = 1
    for g_ in (8, 4, 2):
        if T % g_ == 0:
            group = g_
            break

    mx_f = mx_b = mx_x = None
    for layer in range(n_layers):
        wih_ref = lstm_refs[3 * layer + 0]
        whh_ref = lstm_refs[3 * layer + 1]
        b_ref = lstm_refs[3 * layer + 2]
        is_last = layer == n_layers - 1
        xin_ref = x_ref if layer == 0 else seq_sc

        # ---- hoisted input projection for the whole sequence, both directions:
        # (T*B, D) x (D, 8H) in bf16 with f32 accumulation, written once into a
        # single (T*B, 8H) scratch (lane-sliced at read time), row-chunked to
        # bound vreg pressure.
        wih = wih_ref[...]                      # bf16
        bias = b_ref[...]                       # f32 (1, 8H)
        if TB <= _PROJ_CHUNK_ROWS:
            proj_sc[...] = (
                jnp.dot(xin_ref[...].astype(jnp.bfloat16), wih,
                        preferred_element_type=jnp.float32) + bias)
        else:
            n_full = TB // _PROJ_CHUNK_ROWS

            def proj_body(ci, _):
                r = pl.multiple_of(ci * _PROJ_CHUNK_ROWS, _PROJ_CHUNK_ROWS)
                xc = xin_ref[pl.ds(r, _PROJ_CHUNK_ROWS), :].astype(jnp.bfloat16)
                proj_sc[pl.ds(r, _PROJ_CHUNK_ROWS), :] = (
                    jnp.dot(xc, wih, preferred_element_type=jnp.float32) + bias)
                return 0

            lax.fori_loop(0, n_full, proj_body, 0)
            rem = TB - n_full * _PROJ_CHUNK_ROWS
            if rem:
                r0 = n_full * _PROJ_CHUNK_ROWS
                xc = xin_ref[pl.ds(r0, rem), :].astype(jnp.bfloat16)
                proj_sc[pl.ds(r0, rem), :] = (
                    jnp.dot(xc, wih, preferred_element_type=jnp.float32) + bias)

        # ---- fused fwd+bwd recurrence (joint (B, 2H) hidden state, block-diagonal
        # W_hh makes both directions one N=8H MXU matmul per step).
        # TODO(synk): hold whh resident in the MXU across the time loop via
        #             pltpu.matmul_push_rhs/matmul_acc_lhs/matmul_pop to avoid
        #             re-loading the stationary (2H, 8H) operand every step.
        whh = whh_ref[...]                      # (2H, 8H) f32

        def step(t, h2, c_f, c_b):
            gh = jnp.dot(h2, whh, preferred_element_type=jnp.float32)   # (B, 8H)
            gf = proj_sc[pl.ds(t * B, B), :H4] + gh[:, :H4]
            gb = proj_sc[pl.ds((T - 1 - t) * B, B), H4:] + gh[:, H4:]
            af = jnp.tanh(gf * pre) * pre + post_add   # sig on i/f/o, tanh on g
            ab = jnp.tanh(gb * pre) * pre + post_add
            c_f_n = af[:, H:H2] * c_f + af[:, :H] * af[:, H2:H3]
            c_b_n = ab[:, H:H2] * c_b + ab[:, :H] * ab[:, H2:H3]
            h_f = af[:, H3:] * jnp.tanh(c_f_n)
            h_b = ab[:, H3:] * jnp.tanh(c_b_n)
            h2_n = jnp.concatenate([h_f, h_b], axis=-1)
            return h2_n, c_f_n, c_b_n, h_f, h_b

        def run_group(t0, carry):
            h2, c_f, c_b, mxs = carry
            hf_list, hb_list = [], []
            for g in range(group):
                t = t0 + g
                h2, c_f, c_b, h_f, h_b = step(t, h2, c_f, c_b)
                if is_last:
                    m_f, m_b, m_x = mxs
                    m_f = jnp.maximum(m_f, h_f)            # max_t relu(h) via zero init
                    m_b = jnp.maximum(m_b, h_b)
                    m_x = jnp.maximum(m_x, x_ref[pl.ds(t * B, B), :])
                    mxs = (m_f, m_b, m_x)
                else:
                    hf_list.append(h_f)
                    hb_list.append(h_b)
            if not is_last:
                # Coalesced, sublane-dense stores: one (group*B, H) store per
                # direction per group instead of two masked stores per step.
                r_f = _mult_hint(t0 * B, group * B)
                r_b = _mult_hint((T - group) * B - t0 * B, group * B)
                hf = hf_list[0] if group == 1 else jnp.concatenate(hf_list, axis=0)
                hb = hb_list[0] if group == 1 else jnp.concatenate(hb_list[::-1], axis=0)
                seq_sc[pl.ds(r_f, group * B), :H] = hf
                seq_sc[pl.ds(r_b, group * B), H:] = hb
            return (h2, c_f, c_b, mxs)

        h2 = jnp.zeros((B, H2), jnp.float32)
        c_f = jnp.zeros((B, H), jnp.float32)
        c_b = jnp.zeros((B, H), jnp.float32)
        if is_last:
            mxs0 = (jnp.zeros((B, H), jnp.float32),
                    jnp.zeros((B, H), jnp.float32),
                    jnp.zeros((B, I), jnp.float32))
        else:
            mxs0 = ()
        carry = (h2, c_f, c_b, mxs0)

        n_groups = T // group
        if T <= _STATIC_UNROLL_T:
            for gi in range(n_groups):                       # static unroll
                carry = run_group(gi * group, carry)
        else:                                                # long sequences
            carry = lax.fori_loop(
                0, n_groups, lambda gi, c: run_group(gi * group, c), carry)

        if is_last:
            mx_f, mx_b, mx_x = carry[3]

    # ---- head: relu -> global max-pool over time -> fc (features [fwd | bwd | x])
    pooled = jnp.concatenate([mx_f, mx_b, mx_x], axis=-1)            # (B, 2H + I)
    out_ref[...] = (
        jnp.dot(pooled, fc_w_ref[...], preferred_element_type=jnp.float32)
        + fc_b_ref[...])


# -----------------------------------------------------------------------------
# Wrapper: single pallas_call for the whole forward pass.
# -----------------------------------------------------------------------------
def _is_multi_tensorcore():
    # Only v7x has 2 TensorCores per chip; on v5e/v6e the grid is a serial loop
    # and splitting the batch just serializes the latency-bound recurrence.
    try:
        kind = jax.devices()[0].device_kind.lower()
    except Exception:
        return False
    return "v7" in kind


@functools.partial(jax.jit, static_argnames=("n_layers", "hidden_size", "b_block"))
def _physi_rcnn_forward_jit(x, kparams, *, n_layers, hidden_size, b_block):
    B, T, I = x.shape
    H = hidden_size
    C = kparams["fc_b"].shape[-1]
    assert len(kparams["lstm"]) == n_layers
    assert B % b_block == 0
    nb = B // b_block

    # Layer-0 input pre-flattened to time-major (T*b, I) rows in the wrapper
    # (free contiguous reshape after the transpose) -> no in-kernel flatten pass.
    if nb == 1:
        x_arg = jnp.transpose(x, (1, 0, 2)).reshape(T * B, I)
        x_spec = pl.BlockSpec((T * B, I), lambda g: (0, 0))
    else:
        x_arg = jnp.transpose(x.reshape(nb, b_block, T, I),
                              (0, 2, 1, 3)).reshape(nb, T * b_block, I)
        x_spec = pl.BlockSpec((None, T * b_block, I), lambda g: (g, 0, 0))

    weight_args, weight_specs = [], []
    for (wih, whh, bias) in kparams["lstm"]:
        weight_args += [wih, whh, bias]
        weight_specs += [pl.BlockSpec(wih.shape, lambda g: (0, 0)),
                         pl.BlockSpec(whh.shape, lambda g: (0, 0)),
                         pl.BlockSpec(bias.shape, lambda g: (0, 0))]
    weight_args += [kparams["fc_w"], kparams["fc_b"]]
    weight_specs += [pl.BlockSpec(kparams["fc_w"].shape, lambda g: (0, 0)),
                     pl.BlockSpec(kparams["fc_b"].shape, lambda g: (0, 0))]

    kernel = functools.partial(_fused_kernel, H, n_layers, T)

    # Explicit VMEM budget (matters on v7x: 64 MiB physical / 32 MiB scoped default).
    tb = T * b_block
    scratch_bytes = tb * 8 * H * 4 + tb * 2 * H * 4
    weight_bytes = 2 * sum(int(w.size) * w.dtype.itemsize for w in weight_args)
    io_bytes = 2 * (tb * I * 4 + b_block * C * 4)
    needed = scratch_bytes + weight_bytes + io_bytes
    vmem_limit = int(max(32 * 2 ** 20, min(int(needed * 1.5) + (2 << 20), 112 * 2 ** 20)))

    return pl.pallas_call(
        kernel,
        out_shape=jax.ShapeDtypeStruct((B, C), jnp.float32),
        grid=(nb,),
        in_specs=[x_spec] + weight_specs,
        out_specs=pl.BlockSpec((b_block, C), lambda g: (g, 0)),
        scratch_shapes=[
            pltpu.VMEM((tb, 8 * H), jnp.float32),   # per-layer gate projections [fwd|bwd]
            pltpu.VMEM((tb, 2 * H), jnp.float32),   # inter-layer sequence buffer
        ],
        compiler_params=pltpu.CompilerParams(
            dimension_semantics=("parallel",),
            vmem_limit_bytes=vmem_limit),
    )(x_arg, *weight_args)


def physi_rcnn_forward(x, kparams, *, n_layers, hidden_size, b_block=None):
    B = x.shape[0]
    if b_block is None:
        # Split the batch across TensorCores only on multi-TC chips (v7x) and only
        # when each sub-block stays a multiple of 8 (sublane occupancy).
        b_block = B // 2 if (_is_multi_tensorcore() and B % 16 == 0) else B
    return _physi_rcnn_forward_jit(x, kparams, n_layers=n_layers,
                                   hidden_size=hidden_size, b_block=b_block)


# -----------------------------------------------------------------------------
# Parameter init (torch-layout) + packing into the fused kernel layout.
# -----------------------------------------------------------------------------
def init_params(key, input_size, hidden_size, n_layers, n_classes):
    H = hidden_size
    k = 1.0 / jnp.sqrt(jnp.float32(H))
    lstm = []
    for layer in range(n_layers):
        d_in = input_size if layer == 0 else 2 * H
        dirs = []
        for _ in range(2):
            key, k1, k2, k3, k4 = jax.random.split(key, 5)
            w_ih = jax.random.uniform(k1, (4 * H, d_in), jnp.float32, -k, k)
            w_hh = jax.random.uniform(k2, (4 * H, H), jnp.float32, -k, k)
            b_ih = jax.random.uniform(k3, (4 * H,), jnp.float32, -k, k)
            b_hh = jax.random.uniform(k4, (4 * H,), jnp.float32, -k, k)
            dirs.append((w_ih, w_hh, b_ih, b_hh))
        lstm.append(tuple(dirs))
    fc_in = 2 * H + input_size
    kf = 1.0 / jnp.sqrt(jnp.float32(fc_in))
    key, k1, k2 = jax.random.split(key, 3)
    fc_w = jax.random.uniform(k1, (n_classes, fc_in), jnp.float32, -kf, kf)
    fc_b = jax.random.uniform(k2, (n_classes,), jnp.float32, -kf, kf)
    return {"lstm": lstm, "fc_w": fc_w, "fc_b": fc_b}


def prepare_kernel_params(raw, hidden_size):
    """Pack raw per-direction torch-shaped weights into the fused kernel layout."""
    H = hidden_size
    H4 = 4 * H
    lstm = []
    for (fwd, bwd) in raw["lstm"]:
        w_ih_f, w_hh_f, b_ih_f, b_hh_f = fwd
        w_ih_b, w_hh_b, b_ih_b, b_hh_b = bwd
        wih = jnp.concatenate([w_ih_f.T, w_ih_b.T], axis=1).astype(jnp.bfloat16)
        whh = jnp.zeros((2 * H, 2 * H4), jnp.float32)                # block diagonal
        whh = whh.at[:H, :H4].set(w_hh_f.T)
        whh = whh.at[H:, H4:].set(w_hh_b.T)
        bias = jnp.concatenate([b_ih_f + b_hh_f,
                                b_ih_b + b_hh_b]).reshape(1, 2 * H4)
        lstm.append((wih, whh, bias))
    return {"lstm": lstm,
            "fc_w": raw["fc_w"].T,                                   # (2H + I, C)
            "fc_b": raw["fc_b"].reshape(1, -1)}


# -----------------------------------------------------------------------------
# Pure-JAX reference (correctness check only).
# -----------------------------------------------------------------------------
def _ref_lstm_dir(x_tbd, w_ih, w_hh, b_ih, b_hh, H):
    B = x_tbd.shape[1]

    def step(carry, x_t):
        h, c = carry
        gates = x_t @ w_ih.T + h @ w_hh.T + b_ih + b_hh
        i = jax.nn.sigmoid(gates[:, :H])
        f = jax.nn.sigmoid(gates[:, H:2 * H])
        g = jnp.tanh(gates[:, 2 * H:3 * H])
        o = jax.nn.sigmoid(gates[:, 3 * H:])
        c = f * c + i * g
        h = o * jnp.tanh(c)
        return (h, c), h

    init = (jnp.zeros((B, H), jnp.float32), jnp.zeros((B, H), jnp.float32))
    _, hs = lax.scan(step, init, x_tbd)
    return hs


def _ref_forward(x, raw, n_layers, H):
    seq = jnp.transpose(x, (1, 0, 2))
    for layer in range(n_layers):
        outs = []
        for d in range(2):
            w_ih, w_hh, b_ih, b_hh = raw["lstm"][layer][d]
            xin = seq if d == 0 else jnp.flip(seq, axis=0)
            h = _ref_lstm_dir(xin, w_ih, w_hh, b_ih, b_hh, H)
            if d == 1:
                h = jnp.flip(h, axis=0)
            outs.append(h)
        seq = jnp.concatenate(outs, axis=-1)
    out_btf = jnp.transpose(seq, (1, 0, 2))
    feat = jnp.concatenate([out_btf, x], axis=-1)
    pooled = jnp.max(jnp.maximum(feat, 0.0), axis=1)
    return pooled @ raw["fc_w"].T + raw["fc_b"]


if __name__ == "__main__":
    config = dict(input_size=16, hidden_size=32, n_blocks=2, drop_out=0.0, n_classes=4)
    B, T = 2, 8

    key = jax.random.PRNGKey(0)
    key, kx, kp = jax.random.split(key, 3)
    x = jax.random.normal(kx, (B, T, config["input_size"]), jnp.float32)
    raw = init_params(kp, config["input_size"], config["hidden_size"],
                      config["n_blocks"], config["n_classes"])
    kparams = prepare_kernel_params(raw, config["hidden_size"])

    logits = physi_rcnn_forward(
        x, kparams, n_layers=config["n_blocks"], hidden_size=config["hidden_size"])
    logits = jax.block_until_ready(logits)

    ref = jax.block_until_ready(
        _ref_forward(x, raw, config["n_blocks"], config["hidden_size"]))

    assert logits.shape == (B, config["n_classes"])
    # bf16 input projection (f32 accumulation) -> loosened tolerance vs f32 reference.
    assert jnp.allclose(logits, ref, atol=5e-2, rtol=5e-2), (logits, ref)
    print("KERNEL_OK")
</pallas_src>

<mosaic_0001>
module attributes {stable_mosaic.version = 11 : i64} {
  func.func @_fused_kernel(%arg0: i32, %arg1: memref<16x16xf32, #tpu.memory_space<vmem>>, %arg2: memref<16x256xbf16, #tpu.memory_space<vmem>>, %arg3: memref<64x256xf32, #tpu.memory_space<vmem>>, %arg4: memref<1x256xf32, #tpu.memory_space<vmem>>, %arg5: memref<64x256xbf16, #tpu.memory_space<vmem>>, %arg6: memref<64x256xf32, #tpu.memory_space<vmem>>, %arg7: memref<1x256xf32, #tpu.memory_space<vmem>>, %arg8: memref<80x4xf32, #tpu.memory_space<vmem>>, %arg9: memref<1x4xf32, #tpu.memory_space<vmem>>, %arg10: memref<2x4xf32, #tpu.memory_space<vmem>>, %arg11: memref<16x256xf32, #tpu.memory_space<vmem>>, %arg12: memref<16x64xf32, #tpu.memory_space<vmem>>) attributes {dimension_semantics = [#tpu.dimension_semantics<parallel>], iteration_bounds = array<i64: 1>, scalar_prefetch = 0 : i64, scratch_operands = 2 : i64, tpu.core_type = #tpu.core_type<tc>, window_params = [{pipeline_mode = #tpu.pipeline_mode<synchronous>, transform_indices = @transform_0, window_bounds = array<i64: 16, 16>}, {pipeline_mode = #tpu.pipeline_mode<synchronous>, transform_indices = @transform_1, window_bounds = array<i64: 16, 256>}, {pipeline_mode = #tpu.pipeline_mode<synchronous>, transform_indices = @transform_2, window_bounds = array<i64: 64, 256>}, {pipeline_mode = #tpu.pipeline_mode<synchronous>, transform_indices = @transform_3, window_bounds = array<i64: 1, 256>}, {pipeline_mode = #tpu.pipeline_mode<synchronous>, transform_indices = @transform_4, window_bounds = array<i64: 64, 256>}, {pipeline_mode = #tpu.pipeline_mode<synchronous>, transform_indices = @transform_5, window_bounds = array<i64: 64, 256>}, {pipeline_mode = #tpu.pipeline_mode<synchronous>, transform_indices = @transform_6, window_bounds = array<i64: 1, 256>}, {pipeline_mode = #tpu.pipeline_mode<synchronous>, transform_indices = @transform_7, window_bounds = array<i64: 80, 4>}, {pipeline_mode = #tpu.pipeline_mode<synchronous>, transform_indices = @transform_8, window_bounds = array<i64: 1, 4>}, {transform_indices = @transform_9, window_bounds = array<i64: 2, 4>}]} {
    %0 = tpu.iota {dimensions = array<i32: 1>} : vector<2x128xi32>
    %c64_i32 = arith.constant 64 : i32
    %1 = vector.broadcast %c64_i32 : i32 to vector<2x128xi32>
    %2 = arith.cmpi sge, %0, %1 : vector<2x128xi32>
    %c96_i32 = arith.constant 96 : i32
    %3 = vector.broadcast %c96_i32 : i32 to vector<2x128xi32>
    %4 = arith.cmpi slt, %0, %3 : vector<2x128xi32>
    %5 = arith.andi %2, %4 : vector<2x128xi1>
    %cst = arith.constant 1.000000e+00 : f32
    %cst_0 = arith.constant 5.000000e-01 : f32
    %6 = vector.broadcast %cst : f32 to vector<2x128xf32>
    %7 = vector.broadcast %cst_0 : f32 to vector<2x128xf32>
    %8 = arith.select %5, %6, %7 : vector<2x128xi1>, vector<2x128xf32>
    %cst_1 = arith.constant 0.000000e+00 : f32
    %cst_2 = arith.constant 5.000000e-01 : f32
    %9 = vector.broadcast %cst_1 : f32 to vector<2x128xf32>
    %10 = vector.broadcast %cst_2 : f32 to vector<2x128xf32>
    %11 = arith.select %5, %9, %10 : vector<2x128xi1>, vector<2x128xf32>
    %c0 = arith.constant 0 : index
    %c0_3 = arith.constant 0 : index
    %12 = vector.load %arg2[%c0, %c0_3] : memref<16x256xbf16, #tpu.memory_space<vmem>>, vector<16x256xbf16>
    %c0_4 = arith.constant 0 : index
    %c0_5 = arith.constant 0 : index
    %13 = vector.load %arg4[%c0_4, %c0_5] : memref<1x256xf32, #tpu.memory_space<vmem>>, vector<1x256xf32>
    %c0_6 = arith.constant 0 : index
    %c0_7 = arith.constant 0 : index
    %14 = vector.load %arg1[%c0_6, %c0_7] : memref<16x16xf32, #tpu.memory_space<vmem>>, vector<16x16xf32>
    %15 = arith.truncf %14 : vector<16x16xf32> to vector<16x16xbf16>
    %cst_8 = arith.constant dense<0.000000e+00> : vector<16x256xf32>
    %16 = tpu.matmul %15, %12, %cst_8 {dimension_numbers = #tpu.dot_dimension_numbers<[1], [0], [0], [1], [0, 0, 1, 1], [], []>} : vector<16x16xbf16>, vector<16x256xbf16>, vector<16x256xf32> -> vector<16x256xf32>
    %17 = vector.broadcast %13 : vector<1x256xf32> to vector<16x256xf32>
    %18 = arith.addf %16, %17 : vector<16x256xf32>
    %c0_9 = arith.constant 0 : index
    %c0_10 = arith.constant 0 : index
    %19 = vector.load %arg11[%c0_9, %c0_10] : memref<16x256xf32, #tpu.memory_space<vmem>>, vector<16x256xf32>
    tpu.vector_store %arg11[%c0_9, %c0_10], %18 {strides = array<i32>} : memref<16x256xf32, #tpu.memory_space<vmem>>, vector<16x256xf32>,
    %c0_11 = arith.constant 0 : index
    %c0_12 = arith.constant 0 : index
    %20 = vector.load %arg3[%c0_11, %c0_12] : memref<64x256xf32, #tpu.memory_space<vmem>>, vector<64x256xf32>
    %cst_13 = arith.constant 0.000000e+00 : f32
    %21 = vector.broadcast %cst_13 : f32 to vector<2x64xf32>
    %cst_14 = arith.constant 0.000000e+00 : f32
    %22 = vector.broadcast %cst_14 : f32 to vector<2x32xf32>
    %cst_15 = arith.constant 0.000000e+00 : f32
    %23 = vector.broadcast %cst_15 : f32 to vector<2x32xf32>
    %cst_16 = arith.constant dense<0.000000e+00> : vector<2x256xf32>
    %24 = tpu.matmul %21, %20, %cst_16 {dimension_numbers = #tpu.dot_dimension_numbers<[1], [0], [0], [1], [0, 0, 1, 1], [], []>} : vector<2x64xf32>, vector<64x256xf32>, vector<2x256xf32> -> vector<2x256xf32>
    %c0_17 = arith.constant 0 : index
    %c0_18 = arith.constant 0 : index
    %25 = vector.load %arg11[%c0_17, %c0_18] : memref<16x256xf32, #tpu.memory_space<vmem>>, vector<2x128xf32>
    %26 = vector.extract_strided_slice %24 {offsets = [0, 0], sizes = [2, 128], strides = [1, 1]} : vector<2x256xf32> to vector<2x128xf32>
    %27 = arith.addf %25, %26 : vector<2x128xf32>
    %c14 = arith.constant 14 : index
    %c128 = arith.constant 128 : index
    %28 = vector.load %arg11[%c14, %c128] : memref<16x256xf32, #tpu.memory_space<vmem>>, vector<2x128xf32>
    %29 = vector.extract_strided_slice %24 {offsets = [0, 128], sizes = [2, 128], strides = [1, 1]} : vector<2x256xf32> to vector<2x128xf32>
    %30 = arith.addf %28, %29 : vector<2x128xf32>
    %31 = arith.mulf %27, %8 : vector<2x128xf32>
    %32 = math.tanh %31 : vector<2x128xf32>
    %33 = arith.mulf %32, %8 : vector<2x128xf32>
    %34 = arith.addf %33, %11 : vector<2x128xf32>
    %35 = arith.mulf %30, %8 : vector<2x128xf32>
    %36 = math.tanh %35 : vector<2x128xf32>
    %37 = arith.mulf %36, %8 : vector<2x128xf32>
    %38 = arith.addf %37, %11 : vector<2x128xf32>
    %39 = vector.extract_strided_slice %34 {offsets = [0, 32], sizes = [2, 32], strides = [1, 1]} : vector<2x128xf32> to vector<2x32xf32>
    %40 = arith.mulf %39, %22 : vector<2x32xf32>
    %41 = vector.extract_strided_slice %34 {offsets = [0, 0], sizes = [2, 32], strides = [1, 1]} : vector<2x128xf32> to vector<2x32xf32>
    %42 = vector.extract_strided_slice %34 {offsets = [0, 64], sizes = [2, 32], strides = [1, 1]} : vector<2x128xf32> to vector<2x32xf32>
    %43 = arith.mulf %41, %42 : vector<2x32xf32>
    %44 = arith.addf %40, %43 : vector<2x32xf32>
    %45 = vector.extract_strided_slice %38 {offsets = [0, 32], sizes = [2, 32], strides = [1, 1]} : vector<2x128xf32> to vector<2x32xf32>
    %46 = arith.mulf %45, %23 : vector<2x32xf32>
    %47 = vector.extract_strided_slice %38 {offsets = [0, 0], sizes = [2, 32], strides = [1, 1]} : vector<2x128xf32> to vector<2x32xf32>
    %48 = vector.extract_strided_slice %38 {offsets = [0, 64], sizes = [2, 32], strides = [1, 1]} : vector<2x128xf32> to vector<2x32xf32>
    %49 = arith.mulf %47, %48 : vector<2x32xf32>
    %50 = arith.addf %46, %49 : vector<2x32xf32>
    %51 = vector.extract_strided_slice %34 {offsets = [0, 96], sizes = [2, 32], strides = [1, 1]} : vector<2x128xf32> to vector<2x32xf32>
    %52 = math.tanh %44 : vector<2x32xf32>
    %53 = arith.mulf %51, %52 : vector<2x32xf32>
    %54 = vector.extract_strided_slice %38 {offsets = [0, 96], sizes = [2, 32], strides = [1, 1]} : vector<2x128xf32> to vector<2x32xf32>
    %55 = math.tanh %50 : vector<2x32xf32>
    %56 = arith.mulf %54, %55 : vector<2x32xf32>
    %57 = tpu.concatenate %53, %56 in 1 : vector<2x32xf32>, vector<2x32xf32> -> vector<2x64xf32>
    %cst_19 = arith.constant dense<0.000000e+00> : vector<2x256xf32>
    %58 = tpu.matmul %57, %20, %cst_19 {dimension_numbers = #tpu.dot_dimension_numbers<[1], [0], [0], [1], [0, 0, 1, 1], [], []>} : vector<2x64xf32>, vector<64x256xf32>, vector<2x256xf32> -> vector<2x256xf32>
    %c2 = arith.constant 2 : index
    %c0_20 = arith.constant 0 : index
    %59 = vector.load %arg11[%c2, %c0_20] : memref<16x256xf32, #tpu.memory_space<vmem>>, vector<2x128xf32>
    %60 = vector.extract_strided_slice %58 {offsets = [0, 0], sizes = [2, 128], strides = [1, 1]} : vector<2x256xf32> to vector<2x128xf32>
    %61 = arith.addf %59, %60 : vector<2x128xf32>
    %c12 = arith.constant 12 : index
    %c128_21 = arith.constant 128 : index
    %62 = vector.load %arg11[%c12, %c128_21] : memref<16x256xf32, #tpu.memory_space<vmem>>, vector<2x128xf32>
    %63 = vector.extract_strided_slice %58 {offsets = [0, 128], sizes = [2, 128], strides = [1, 1]} : vector<2x256xf32> to vector<2x128xf32>
    %64 = arith.addf %62, %63 : vector<2x128xf32>
    %65 = arith.mulf %61, %8 : vector<2x128xf32>
    %66 = math.tanh %65 : vector<2x128xf32>
    %67 = arith.mulf %66, %8 : vector<2x128xf32>
    %68 = arith.addf %67, %11 : vector<2x128xf32>
    %69 = arith.mulf %64, %8 : vector<2x128xf32>
    %70 = math.tanh %69 : vector<2x128xf32>
    %71 = arith.mulf %70, %8 : vector<2x128xf32>
    %72 = arith.addf %71, %11 : vector<2x128xf32>
    %73 = vector.extract_strided_slice %68 {offsets = [0, 32], sizes = [2, 32], strides = [1, 1]} : vector<2x128xf32> to vector<2x32xf32>
    %74 = arith.mulf %73, %44 : vector<2x32xf32>
    %75 = vector.extract_strided_slice %68 {offsets = [0, 0], sizes = [2, 32], strides = [1, 1]} : vector<2x128xf32> to vector<2x32xf32>
    %76 = vector.extract_strided_slice %68 {offsets = [0, 64], sizes = [2, 32], strides = [1, 1]} : vector<2x128xf32> to vector<2x32xf32>
    %77 = arith.mulf %75, %76 : vector<2x32xf32>
    %78 = arith.addf %74, %77 : vector<2x32xf32>
    %79 = vector.extract_strided_slice %72 {offsets = [0, 32], sizes = [2, 32], strides = [1, 1]} : vector<2x128xf32> to vector<2x32xf32>
    %80 = arith.mulf %79, %50 : vector<2x32xf32>
    %81 = vector.extract_strided_slice %72 {offsets = [0, 0], sizes = [2, 32], strides = [1, 1]} : vector<2x128xf32> to vector<2x32xf32>
    %82 = vector.extract_strided_slice %72 {offsets = [0, 64], sizes = [2, 32], strides = [1, 1]} : vector<2x128xf32> to vector<2x32xf32>
    %83 = arith.mulf %81, %82 : vector<2x32xf32>
    %84 = arith.addf %80, %83 : vector<2x32xf32>
    %85 = vector.extract_strided_slice %68 {offsets = [0, 96], sizes = [2, 32], strides = [1, 1]} : vector<2x128xf32> to vector<2x32xf32>
    %86 = math.tanh %78 : vector<2x32xf32>
    %87 = arith.mulf %85, %86 : vector<2x32xf32>
    %88 = vector.extract_strided_slice %72 {offsets = [0, 96], sizes = [2, 32], strides = [1, 1]} : vector<2x128xf32> to vector<2x32xf32>
    %89 = math.tanh %84 : vector<2x32xf32>
    %90 = arith.mulf %88, %89 : vector<2x32xf32>
    %91 = tpu.concatenate %87, %90 in 1 : vector<2x32xf32>, vector<2x32xf32> -> vector<2x64xf32>
    %cst_22 = arith.constant dense<0.000000e+00> : vector<2x256xf32>
    %92 = tpu.matmul %91, %20, %cst_22 {dimension_numbers = #tpu.dot_dimension_numbers<[1], [0], [0], [1], [0, 0, 1, 1], [], []>} : vector<2x64xf32>, vector<64x256xf32>, vector<2x256xf32> -> vector<2x256xf32>
    %c4 = arith.constant 4 : index
    %c0_23 = arith.constant 0 : index
    %93 = vector.load %arg11[%c4, %c0_23] : memref<16x256xf32, #tpu.memory_space<vmem>>, vector<2x128xf32>
    %94 = vector.extract_strided_slice %92 {offsets = [0, 0], sizes = [2, 128], strides = [1, 1]} : vector<2x256xf32> to vector<2x128xf32>
    %95 = arith.addf %93, %94 : vector<2x128xf32>
    %c10 = arith.constant 10 : index
    %c128_24 = arith.constant 128 : index
    %96 = vector.load %arg11[%c10, %c128_24] : memref<16x256xf32, #tpu.memory_space<vmem>>, vector<2x128xf32>
    %97 = vector.extract_strided_slice %92 {offsets = [0, 128], sizes = [2, 128], strides = [1, 1]} : vector<2x256xf32> to vector<2x128xf32>
    %98 = arith.addf %96, %97 : vector<2x128xf32>
    %99 = arith.mulf %95, %8 : vector<2x128xf32>
    %100 = math.tanh %99 : vector<2x128xf32>
    %101 = arith.mulf %100, %8 : vector<2x128xf32>
    %102 = arith.addf %101, %11 : vector<2x128xf32>
    %103 = arith.mulf %98, %8 : vector<2x128xf32>
    %104 = math.tanh %103 : vector<2x128xf32>
    %105 = arith.mulf %104, %8 : vector<2x128xf32>
    %106 = arith.addf %105, %11 : vector<2x128xf32>
    %107 = vector.extract_strided_slice %102 {offsets = [0, 32], sizes = [2, 32], strides = [1, 1]} : vector<2x128xf32> to vector<2x32xf32>
    %108 = arith.mulf %107, %78 : vector<2x32xf32>
    %109 = vector.extract_strided_slice %102 {offsets = [0, 0], sizes = [2, 32], strides = [1, 1]} : vector<2x128xf32> to vector<2x32xf32>
    %110 = vector.extract_strided_slice %102 {offsets = [0, 64], sizes = [2, 32], strides = [1, 1]} : vector<2x128xf32> to vector<2x32xf32>
    %111 = arith.mulf %109, %110 : vector<2x32xf32>
    %112 = arith.addf %108, %111 : vector<2x32xf32>
    %113 = vector.extract_strided_slice %106 {offsets = [0, 32], sizes = [2, 32], strides = [1, 1]} : vector<2x128xf32> to vector<2x32xf32>
    %114 = arith.mulf %113, %84 : vector<2x32xf32>
    %115 = vector.extract_strided_slice %106 {offsets = [0, 0], sizes = [2, 32], strides = [1, 1]} : vector<2x128xf32> to vector<2x32xf32>
    %116 = vector.extract_strided_slice %106 {offsets = [0, 64], sizes = [2, 32], strides = [1, 1]} : vector<2x128xf32> to vector<2x32xf32>
    %117 = arith.mulf %115, %116 : vector<2x32xf32>
    %118 = arith.addf %114, %117 : vector<2x32xf32>
    %119 = vector.extract_strided_slice %102 {offsets = [0, 96], sizes = [2, 32], strides = [1, 1]} : vector<2x128xf32> to vector<2x32xf32>
    %120 = math.tanh %112 : vector<2x32xf32>
    %121 = arith.mulf %119, %120 : vector<2x32xf32>
    %122 = vector.extract_strided_slice %106 {offsets = [0, 96], sizes = [2, 32], strides = [1, 1]} : vector<2x128xf32> to vector<2x32xf32>
    %123 = math.tanh %118 : vector<2x32xf32>
    %124 = arith.mulf %122, %123 : vector<2x32xf32>
    %125 = tpu.concatenate %121, %124 in 1 : vector<2x32xf32>, vector<2x32xf32> -> vector<2x64xf32>
    %cst_25 = arith.constant dense<0.000000e+00> : vector<2x256xf32>
    %126 = tpu.matmul %125, %20, %cst_25 {dimension_numbers = #tpu.dot_dimension_numbers<[1], [0], [0], [1], [0, 0, 1, 1], [], []>} : vector<2x64xf32>, vector<64x256xf32>, vector<2x256xf32> -> vector<2x256xf32>
    %c6 = arith.constant 6 : index
    %c0_26 = arith.constant 0 : index
    %127 = vector.load %arg11[%c6, %c0_26] : memref<16x256xf32, #tpu.memory_space<vmem>>, vector<2x128xf32>
    %128 = vector.extract_strided_slice %126 {offsets = [0, 0], sizes = [2, 128], strides = [1, 1]} : vector<2x256xf32> to vector<2x128xf32>
    %129 = arith.addf %127, %128 : vector<2x128xf32>
    %c8 = arith.constant 8 : index
    %c128_27 = arith.constant 128 : index
    %130 = vector.load %arg11[%c8, %c128_27] : memref<16x256xf32, #tpu.memory_space<vmem>>, vector<2x128xf32>
    %131 = vector.extract_strided_slice %126 {offsets = [0, 128], sizes = [2, 128], strides = [1, 1]} : vector<2x256xf32> to vector<2x128xf32>
    %132 = arith.addf %130, %131 : vector<2x128xf32>
    %133 = arith.mulf %129, %8 : vector<2x128xf32>
    %134 = math.tanh %133 : vector<2x128xf32>
    %135 = arith.mulf %134, %8 : vector<2x128xf32>
    %136 = arith.addf %135, %11 : vector<2x128xf32>
    %137 = arith.mulf %132, %8 : vector<2x128xf32>
    %138 = math.tanh %137 : vector<2x128xf32>
    %139 = arith.mulf %138, %8 : vector<2x128xf32>
    %140 = arith.addf %139, %11 : vector<2x128xf32>
    %141 = vector.extract_strided_slice %136 {offsets = [0, 32], sizes = [2, 32], strides = [1, 1]} : vector<2x128xf32> to vector<2x32xf32>
    %142 = arith.mulf %141, %112 : vector<2x32xf32>
    %143 = vector.extract_strided_slice %136 {offsets = [0, 0], sizes = [2, 32], strides = [1, 1]} : vector<2x128xf32> to vector<2x32xf32>
    %144 = vector.extract_strided_slice %136 {offsets = [0, 64], sizes = [2, 32], strides = [1, 1]} : vector<2x128xf32> to vector<2x32xf32>
    %145 = arith.mulf %143, %144 : vector<2x32xf32>
    %146 = arith.addf %142, %145 : vector<2x32xf32>
    %147 = vector.extract_strided_slice %140 {offsets = [0, 32], sizes = [2, 32], strides = [1, 1]} : vector<2x128xf32> to vector<2x32xf32>
    %148 = arith.mulf %147, %118 : vector<2x32xf32>
    %149 = vector.extract_strided_slice %140 {offsets = [0, 0], sizes = [2, 32], strides = [1, 1]} : vector<2x128xf32> to vector<2x32xf32>
    %150 = vector.extract_strided_slice %140 {offsets = [0, 64], sizes = [2, 32], strides = [1, 1]} : vector<2x128xf32> to vector<2x32xf32>
    %151 = arith.mulf %149, %150 : vector<2x32xf32>
    %152 = arith.addf %148, %151 : vector<2x32xf32>
    %153 = vector.extract_strided_slice %136 {offsets = [0, 96], sizes = [2, 32], strides = [1, 1]} : vector<2x128xf32> to vector<2x32xf32>
    %154 = math.tanh %146 : vector<2x32xf32>
    %155 = arith.mulf %153, %154 : vector<2x32xf32>
    %156 = vector.extract_strided_slice %140 {offsets = [0, 96], sizes = [2, 32], strides = [1, 1]} : vector<2x128xf32> to vector<2x32xf32>
    %157 = math.tanh %152 : vector<2x32xf32>
    %158 = arith.mulf %156, %157 : vector<2x32xf32>
    %159 = tpu.concatenate %155, %158 in 1 : vector<2x32xf32>, vector<2x32xf32> -> vector<2x64xf32>
    %cst_28 = arith.constant dense<0.000000e+00> : vector<2x256xf32>
    %160 = tpu.matmul %159, %20, %cst_28 {dimension_numbers = #tpu.dot_dimension_numbers<[1], [0], [0], [1], [0, 0, 1, 1], [], []>} : vector<2x64xf32>, vector<64x256xf32>, vector<2x256xf32> -> vector<2x256xf32>
    %c8_29 = arith.constant 8 : index
    %c0_30 = arith.constant 0 : index
    %161 = vector.load %arg11[%c8_29, %c0_30] : memref<16x256xf32, #tpu.memory_space<vmem>>, vector<2x128xf32>
    %162 = vector.extract_strided_slice %160 {offsets = [0, 0], sizes = [2, 128], strides = [1, 1]} : vector<2x256xf32> to vector<2x128xf32>
    %163 = arith.addf %161, %162 : vector<2x128xf32>
    %c6_31 = arith.constant 6 : index
    %c128_32 = arith.constant 128 : index
    %164 = vector.load %arg11[%c6_31, %c128_32] : memref<16x256xf32, #tpu.memory_space<vmem>>, vector<2x128xf32>
    %165 = vector.extract_strided_slice %160 {offsets = [0, 128], sizes = [2, 128], strides = [1, 1]} : vector<2x256xf32> to vector<2x128xf32>
    %166 = arith.addf %164, %165 : vector<2x128xf32>
    %167 = arith.mulf %163, %8 : vector<2x128xf32>
    %168 = math.tanh %167 : vector<2x128xf32>
    %169 = arith.mulf %168, %8 : vector<2x128xf32>
    %170 = arith.addf %169, %11 : vector<2x128xf32>
    %171 = arith.mulf %166, %8 : vector<2x128xf32>
    %172 = math.tanh %171 : vector<2x128xf32>
    %173 = arith.mulf %172, %8 : vector<2x128xf32>
    %174 = arith.addf %173, %11 : vector<2x128xf32>
    %175 = vector.extract_strided_slice %170 {offsets = [0, 32], sizes = [2, 32], strides = [1, 1]} : vector<2x128xf32> to vector<2x32xf32>
    %176 = arith.mulf %175, %146 : vector<2x32xf32>
    %177 = vector.extract_strided_slice %170 {offsets = [0, 0], sizes = [2, 32], strides = [1, 1]} : vector<2x128xf32> to vector<2x32xf32>
    %178 = vector.extract_strided_slice %170 {offsets = [0, 64], sizes = [2, 32], strides = [1, 1]} : vector<2x128xf32> to vector<2x32xf32>
    %179 = arith.mulf %177, %178 : vector<2x32xf32>
    %180 = arith.addf %176, %179 : vector<2x32xf32>
    %181 = vector.extract_strided_slice %174 {offsets = [0, 32], sizes = [2, 32], strides = [1, 1]} : vector<2x128xf32> to vector<2x32xf32>
    %182 = arith.mulf %181, %152 : vector<2x32xf32>
    %183 = vector.extract_strided_slice %174 {offsets = [0, 0], sizes = [2, 32], strides = [1, 1]} : vector<2x128xf32> to vector<2x32xf32>
    %184 = vector.extract_strided_slice %174 {offsets = [0, 64], sizes = [2, 32], strides = [1, 1]} : vector<2x128xf32> to vector<2x32xf32>
    %185 = arith.mulf %183, %184 : vector<2x32xf32>
    %186 = arith.addf %182, %185 : vector<2x32xf32>
    %187 = vector.extract_strided_slice %170 {offsets = [0, 96], sizes = [2, 32], strides = [1, 1]} : vector<2x128xf32> to vector<2x32xf32>
    %188 = math.tanh %180 : vector<2x32xf32>
    %189 = arith.mulf %187, %188 : vector<2x32xf32>
    %190 = vector.extract_strided_slice %174 {offsets = [0, 96], sizes = [2, 32], strides = [1, 1]} : vector<2x128xf32> to vector<2x32xf32>
    %191 = math.tanh %186 : vector<2x32xf32>
    %192 = arith.mulf %190, %191 : vector<2x32xf32>
    %193 = tpu.concatenate %189, %192 in 1 : vector<2x32xf32>, vector<2x32xf32> -> vector<2x64xf32>
    %cst_33 = arith.constant dense<0.000000e+00> : vector<2x256xf32>
    %194 = tpu.matmul %193, %20, %cst_33 {dimension_numbers = #tpu.dot_dimension_numbers<[1], [0], [0], [1], [0, 0, 1, 1], [], []>} : vector<2x64xf32>, vector<64x256xf32>, vector<2x256xf32> -> vector<2x256xf32>
    %c10_34 = arith.constant 10 : index
    %c0_35 = arith.constant 0 : index
    %195 = vector.load %arg11[%c10_34, %c0_35] : memref<16x256xf32, #tpu.memory_space<vmem>>, vector<2x128xf32>
    %196 = vector.extract_strided_slice %194 {offsets = [0, 0], sizes = [2, 128], strides = [1, 1]} : vector<2x256xf32> to vector<2x128xf32>
    %197 = arith.addf %195, %196 : vector<2x128xf32>
    %c4_36 = arith.constant 4 : index
    %c128_37 = arith.constant 128 : index
    %198 = vector.load %arg11[%c4_36, %c128_37] : memref<16x256xf32, #tpu.memory_space<vmem>>, vector<2x128xf32>
    %199 = vector.extract_strided_slice %194 {offsets = [0, 128], sizes = [2, 128], strides = [1, 1]} : vector<2x256xf32> to vector<2x128xf32>
    %200 = arith.addf %198, %199 : vector<2x128xf32>
    %201 = arith.mulf %197, %8 : vector<2x128xf32>
    %202 = math.tanh %201 : vector<2x128xf32>
    %203 = arith.mulf %202, %8 : vector<2x128xf32>
    %204 = arith.addf %203, %11 : vector<2x128xf32>
    %205 = arith.mulf %200, %8 : vector<2x128xf32>
    %206 = math.tanh %205 : vector<2x128xf32>
    %207 = arith.mulf %206, %8 : vector<2x128xf32>
    %208 = arith.addf %207, %11 : vector<2x128xf32>
    %209 = vector.extract_strided_slice %204 {offsets = [0, 32], sizes = [2, 32], strides = [1, 1]} : vector<2x128xf32> to vector<2x32xf32>
    %210 = arith.mulf %209, %180 : vector<2x32xf32>
    %211 = vector.extract_strided_slice %204 {offsets = [0, 0], sizes = [2, 32], strides = [1, 1]} : vector<2x128xf32> to vector<2x32xf32>
    %212 = vector.extract_strided_slice %204 {offsets = [0, 64], sizes = [2, 32], strides = [1, 1]} : vector<2x128xf32> to vector<2x32xf32>
    %213 = arith.mulf %211, %212 : vector<2x32xf32>
    %214 = arith.addf %210, %213 : vector<2x32xf32>
    %215 = vector.extract_strided_slice %208 {offsets = [0, 32], sizes = [2, 32], strides = [1, 1]} : vector<2x128xf32> to vector<2x32xf32>
    %216 = arith.mulf %215, %186 : vector<2x32xf32>
    %217 = vector.extract_strided_slice %208 {offsets = [0, 0], sizes = [2, 32], strides = [1, 1]} : vector<2x128xf32> to vector<2x32xf32>
    %218 = vector.extract_strided_slice %208 {offsets = [0, 64], sizes = [2, 32], strides = [1, 1]} : vector<2x128xf32> to vector<2x32xf32>
    %219 = arith.mulf %217, %218 : vector<2x32xf32>
    %220 = arith.addf %216, %219 : vector<2x32xf32>
    %221 = vector.extract_strided_slice %204 {offsets = [0, 96], sizes = [2, 32], strides = [1, 1]} : vector<2x128xf32> to vector<2x32xf32>
    %222 = math.tanh %214 : vector<2x32xf32>
    %223 = arith.mulf %221, %222 : vector<2x32xf32>
    %224 = vector.extract_strided_slice %208 {offsets = [0, 96], sizes = [2, 32], strides = [1, 1]} : vector<2x128xf32> to vector<2x32xf32>
    %225 = math.tanh %220 : vector<2x32xf32>
    %226 = arith.mulf %224, %225 : vector<2x32xf32>
    %227 = tpu.concatenate %223, %226 in 1 : vector<2x32xf32>, vector<2x32xf32> -> vector<2x64xf32>
    %cst_38 = arith.constant dense<0.000000e+00> : vector<2x256xf32>
    %228 = tpu.matmul %227, %20, %cst_38 {dimension_numbers = #tpu.dot_dimension_numbers<[1], [0], [0], [1], [0, 0, 1, 1], [], []>} : vector<2x64xf32>, vector<64x256xf32>, vector<2x256xf32> -> vector<2x256xf32>
    %c12_39 = arith.constant 12 : index
    %c0_40 = arith.constant 0 : index
    %229 = vector.load %arg11[%c12_39, %c0_40] : memref<16x256xf32, #tpu.memory_space<vmem>>, vector<2x128xf32>
    %230 = vector.extract_strided_slice %228 {offsets = [0, 0], sizes = [2, 128], strides = [1, 1]} : vector<2x256xf32> to vector<2x128xf32>
    %231 = arith.addf %229, %230 : vector<2x128xf32>
    %c2_41 = arith.constant 2 : index
    %c128_42 = arith.constant 128 : index
    %232 = vector.load %arg11[%c2_41, %c128_42] : memref<16x256xf32, #tpu.memory_space<vmem>>, vector<2x128xf32>
    %233 = vector.extract_strided_slice %228 {offsets = [0, 128], sizes = [2, 128], strides = [1, 1]} : vector<2x256xf32> to vector<2x128xf32>
    %234 = arith.addf %232, %233 : vector<2x128xf32>
    %235 = arith.mulf %231, %8 : vector<2x128xf32>
    %236 = math.tanh %235 : vector<2x128xf32>
    %237 = arith.mulf %236, %8 : vector<2x128xf32>
    %238 = arith.addf %237, %11 : vector<2x128xf32>
    %239 = arith.mulf %234, %8 : vector<2x128xf32>
    %240 = math.tanh %239 : vector<2x128xf32>
    %241 = arith.mulf %240, %8 : vector<2x128xf32>
    %242 = arith.addf %241, %11 : vector<2x128xf32>
    %243 = vector.extract_strided_slice %238 {offsets = [0, 32], sizes = [2, 32], strides = [1, 1]} : vector<2x128xf32> to vector<2x32xf32>
    %244 = arith.mulf %243, %214 : vector<2x32xf32>
    %245 = vector.extract_strided_slice %238 {offsets = [0, 0], sizes = [2, 32], strides = [1, 1]} : vector<2x128xf32> to vector<2x32xf32>
    %246 = vector.extract_strided_slice %238 {offsets = [0, 64], sizes = [2, 32], strides = [1, 1]} : vector<2x128xf32> to vector<2x32xf32>
    %247 = arith.mulf %245, %246 : vector<2x32xf32>
    %248 = arith.addf %244, %247 : vector<2x32xf32>
    %249 = vector.extract_strided_slice %242 {offsets = [0, 32], sizes = [2, 32], strides = [1, 1]} : vector<2x128xf32> to vector<2x32xf32>
    %250 = arith.mulf %249, %220 : vector<2x32xf32>
    %251 = vector.extract_strided_slice %242 {offsets = [0, 0], sizes = [2, 32], strides = [1, 1]} : vector<2x128xf32> to vector<2x32xf32>
    %252 = vector.extract_strided_slice %242 {offsets = [0, 64], sizes = [2, 32], strides = [1, 1]} : vector<2x128xf32> to vector<2x32xf32>
    %253 = arith.mulf %251, %252 : vector<2x32xf32>
    %254 = arith.addf %250, %253 : vector<2x32xf32>
    %255 = vector.extract_strided_slice %238 {offsets = [0, 96], sizes = [2, 32], strides = [1, 1]} : vector<2x128xf32> to vector<2x32xf32>
    %256 = math.tanh %248 : vector<2x32xf32>
    %257 = arith.mulf %255, %256 : vector<2x32xf32>
    %258 = vector.extract_strided_slice %242 {offsets = [0, 96], sizes = [2, 32], strides = [1, 1]} : vector<2x128xf32> to vector<2x32xf32>
    %259 = math.tanh %254 : vector<2x32xf32>
    %260 = arith.mulf %258, %259 : vector<2x32xf32>
    %261 = tpu.concatenate %257, %260 in 1 : vector<2x32xf32>, vector<2x32xf32> -> vector<2x64xf32>
    %cst_43 = arith.constant dense<0.000000e+00> : vector<2x256xf32>
    %262 = tpu.matmul %261, %20, %cst_43 {dimension_numbers = #tpu.dot_dimension_numbers<[1], [0], [0], [1], [0, 0, 1, 1], [], []>} : vector<2x64xf32>, vector<64x256xf32>, vector<2x256xf32> -> vector<2x256xf32>
    %c14_44 = arith.constant 14 : index
    %c0_45 = arith.constant 0 : index
    %263 = vector.load %arg11[%c14_44, %c0_45] : memref<16x256xf32, #tpu.memory_space<vmem>>, vector<2x128xf32>
    %264 = vector.extract_strided_slice %262 {offsets = [0, 0], sizes = [2, 128], strides = [1, 1]} : vector<2x256xf32> to vector<2x128xf32>
    %265 = arith.addf %263, %264 : vector<2x128xf32>
    %c0_46 = arith.constant 0 : index
    %c128_47 = arith.constant 128 : index
    %266 = vector.load %arg11[%c0_46, %c128_47] : memref<16x256xf32, #tpu.memory_space<vmem>>, vector<2x128xf32>
    %267 = vector.extract_strided_slice %262 {offsets = [0, 128], sizes = [2, 128], strides = [1, 1]} : vector<2x256xf32> to vector<2x128xf32>
    %268 = arith.addf %266, %267 : vector<2x128xf32>
    %269 = arith.mulf %265, %8 : vector<2x128xf32>
    %270 = math.tanh %269 : vector<2x128xf32>
    %271 = arith.mulf %270, %8 : vector<2x128xf32>
    %272 = arith.addf %271, %11 : vector<2x128xf32>
    %273 = arith.mulf %268, %8 : vector<2x128xf32>
    %274 = math.tanh %273 : vector<2x128xf32>
    %275 = arith.mulf %274, %8 : vector<2x128xf32>
    %276 = arith.addf %275, %11 : vector<2x128xf32>
    %277 = vector.extract_strided_slice %272 {offsets = [0, 32], sizes = [2, 32], strides = [1, 1]} : vector<2x128xf32> to vector<2x32xf32>
    %278 = arith.mulf %277, %248 : vector<2x32xf32>
    %279 = vector.extract_strided_slice %272 {offsets = [0, 0], sizes = [2, 32], strides = [1, 1]} : vector<2x128xf32> to vector<2x32xf32>
    %280 = vector.extract_strided_slice %272 {offsets = [0, 64], sizes = [2, 32], strides = [1, 1]} : vector<2x128xf32> to vector<2x32xf32>
    %281 = arith.mulf %279, %280 : vector<2x32xf32>
    %282 = arith.addf %278, %281 : vector<2x32xf32>
    %283 = vector.extract_strided_slice %276 {offsets = [0, 32], sizes = [2, 32], strides = [1, 1]} : vector<2x128xf32> to vector<2x32xf32>
    %284 = arith.mulf %283, %254 : vector<2x32xf32>
    %285 = vector.extract_strided_slice %276 {offsets = [0, 0], sizes = [2, 32], strides = [1, 1]} : vector<2x128xf32> to vector<2x32xf32>
    %286 = vector.extract_strided_slice %276 {offsets = [0, 64], sizes = [2, 32], strides = [1, 1]} : vector<2x128xf32> to vector<2x32xf32>
    %287 = arith.mulf %285, %286 : vector<2x32xf32>
    %288 = arith.addf %284, %287 : vector<2x32xf32>
    %289 = vector.extract_strided_slice %272 {offsets = [0, 96], sizes = [2, 32], strides = [1, 1]} : vector<2x128xf32> to vector<2x32xf32>
    %290 = math.tanh %282 : vector<2x32xf32>
    %291 = arith.mulf %289, %290 : vector<2x32xf32>
    %292 = vector.extract_strided_slice %276 {offsets = [0, 96], sizes = [2, 32], strides = [1, 1]} : vector<2x128xf32> to vector<2x32xf32>
    %293 = math.tanh %288 : vector<2x32xf32>
    %294 = arith.mulf %292, %293 : vector<2x32xf32>
    %295 = tpu.concatenate %53, %87, %121, %155, %189, %223, %257, %291 in 0 : vector<2x32xf32>, vector<2x32xf32>, vector<2x32xf32>, vector<2x32xf32>, vector<2x32xf32>, vector<2x32xf32>, vector<2x32xf32>, vector<2x32xf32> -> vector<16x32xf32>
    %296 = tpu.concatenate %294, %260, %226, %192, %158, %124, %90, %56 in 0 : vector<2x32xf32>, vector<2x32xf32>, vector<2x32xf32>, vector<2x32xf32>, vector<2x32xf32>, vector<2x32xf32>, vector<2x32xf32>, vector<2x32xf32> -> vector<16x32xf32>
    %c0_48 = arith.constant 0 : index
    %c0_49 = arith.constant 0 : index
    %297 = vector.load %arg12[%c0_48, %c0_49] : memref<16x64xf32, #tpu.memory_space<vmem>>, vector<16x32xf32>
    tpu.vector_store %arg12[%c0_48, %c0_49], %295 {strides = array<i32>} : memref<16x64xf32, #tpu.memory_space<vmem>>, vector<16x32xf32>,
    %c0_50 = arith.constant 0 : index
    %c32 = arith.constant 32 : index
    %298 = vector.load %arg12[%c0_50, %c32] : memref<16x64xf32, #tpu.memory_space<vmem>>, vector<16x32xf32>
    tpu.vector_store %arg12[%c0_50, %c32], %296 {strides = array<i32>} : memref<16x64xf32, #tpu.memory_space<vmem>>, vector<16x32xf32>,
    %c0_51 = arith.constant 0 : index
    %c0_52 = arith.constant 0 : index
    %299 = vector.load %arg5[%c0_51, %c0_52] : memref<64x256xbf16, #tpu.memory_space<vmem>>, vector<64x256xbf16>
    %c0_53 = arith.constant 0 : index
    %c0_54 = arith.constant 0 : index
    %300 = vector.load %arg7[%c0_53, %c0_54] : memref<1x256xf32, #tpu.memory_space<vmem>>, vector<1x256xf32>
    %c0_55 = arith.constant 0 : index
    %c0_56 = arith.constant 0 : index
    %301 = vector.load %arg12[%c0_55, %c0_56] : memref<16x64xf32, #tpu.memory_space<vmem>>, vector<16x64xf32>
    %302 = arith.truncf %301 : vector<16x64xf32> to vector<16x64xbf16>
    %cst_57 = arith.constant dense<0.000000e+00> : vector<16x256xf32>
    %303 = tpu.matmul %302, %299, %cst_57 {dimension_numbers = #tpu.dot_dimension_numbers<[1], [0], [0], [1], [0, 0, 1, 1], [], []>} : vector<16x64xbf16>, vector<64x256xbf16>, vector<16x256xf32> -> vector<16x256xf32>
    %304 = vector.broadcast %300 : vector<1x256xf32> to vector<16x256xf32>
    %305 = arith.addf %303, %304 : vector<16x256xf32>
    %c0_58 = arith.constant 0 : index
    %c0_59 = arith.constant 0 : index
    %306 = vector.load %arg11[%c0_58, %c0_59] : memref<16x256xf32, #tpu.memory_space<vmem>>, vector<16x256xf32>
    tpu.vector_store %arg11[%c0_58, %c0_59], %305 {strides = array<i32>} : memref<16x256xf32, #tpu.memory_space<vmem>>, vector<16x256xf32>,
    %c0_60 = arith.constant 0 : index
    %c0_61 = arith.constant 0 : index
    %307 = vector.load %arg6[%c0_60, %c0_61] : memref<64x256xf32, #tpu.memory_space<vmem>>, vector<64x256xf32>
    %cst_62 = arith.constant 0.000000e+00 : f32
    %308 = vector.broadcast %cst_62 : f32 to vector<2x64xf32>
    %cst_63 = arith.constant 0.000000e+00 : f32
    %309 = vector.broadcast %cst_63 : f32 to vector<2x32xf32>
    %cst_64 = arith.constant 0.000000e+00 : f32
    %310 = vector.broadcast %cst_64 : f32 to vector<2x32xf32>
    %cst_65 = arith.constant 0.000000e+00 : f32
    %311 = vector.broadcast %cst_65 : f32 to vector<2x32xf32>
    %cst_66 = arith.constant 0.000000e+00 : f32
    %312 = vector.broadcast %cst_66 : f32 to vector<2x32xf32>
    %cst_67 = arith.constant 0.000000e+00 : f32
    %313 = vector.broadcast %cst_67 : f32 to vector<2x16xf32>
    %cst_68 = arith.constant dense<0.000000e+00> : vector<2x256xf32>
    %314 = tpu.matmul %308, %307, %cst_68 {dimension_numbers = #tpu.dot_dimension_numbers<[1], [0], [0], [1], [0, 0, 1, 1], [], []>} : vector<2x64xf32>, vector<64x256xf32>, vector<2x256xf32> -> vector<2x256xf32>
    %c0_69 = arith.constant 0 : index
    %c0_70 = arith.constant 0 : index
    %315 = vector.load %arg11[%c0_69, %c0_70] : memref<16x256xf32, #tpu.memory_space<vmem>>, vector<2x128xf32>
    %316 = vector.extract_strided_slice %314 {offsets = [0, 0], sizes = [2, 128], strides = [1, 1]} : vector<2x256xf32> to vector<2x128xf32>
    %317 = arith.addf %315, %316 : vector<2x128xf32>
    %c14_71 = arith.constant 14 : index
    %c128_72 = arith.constant 128 : index
    %318 = vector.load %arg11[%c14_71, %c128_72] : memref<16x256xf32, #tpu.memory_space<vmem>>, vector<2x128xf32>
    %319 = vector.extract_strided_slice %314 {offsets = [0, 128], sizes = [2, 128], strides = [1, 1]} : vector<2x256xf32> to vector<2x128xf32>
    %320 = arith.addf %318, %319 : vector<2x128xf32>
    %321 = arith.mulf %317, %8 : vector<2x128xf32>
    %322 = math.tanh %321 : vector<2x128xf32>
    %323 = arith.mulf %322, %8 : vector<2x128xf32>
    %324 = arith.addf %323, %11 : vector<2x128xf32>
    %325 = arith.mulf %320, %8 : vector<2x128xf32>
    %326 = math.tanh %325 : vector<2x128xf32>
    %327 = arith.mulf %326, %8 : vector<2x128xf32>
    %328 = arith.addf %327, %11 : vector<2x128xf32>
    %329 = vector.extract_strided_slice %324 {offsets = [0, 32], sizes = [2, 32], strides = [1, 1]} : vector<2x128xf32> to vector<2x32xf32>
    %330 = arith.mulf %329, %309 : vector<2x32xf32>
    %331 = vector.extract_strided_slice %324 {offsets = [0, 0], sizes = [2, 32], strides = [1, 1]} : vector<2x128xf32> to vector<2x32xf32>
    %332 = vector.extract_strided_slice %324 {offsets = [0, 64], sizes = [2, 32], strides = [1, 1]} : vector<2x128xf32> to vector<2x32xf32>
    %333 = arith.mulf %331, %332 : vector<2x32xf32>
    %334 = arith.addf %330, %333 : vector<2x32xf32>
    %335 = vector.extract_strided_slice %328 {offsets = [0, 32], sizes = [2, 32], strides = [1, 1]} : vector<2x128xf32> to vector<2x32xf32>
    %336 = arith.mulf %335, %310 : vector<2x32xf32>
    %337 = vector.extract_strided_slice %328 {offsets = [0, 0], sizes = [2, 32], strides = [1, 1]} : vector<2x128xf32> to vector<2x32xf32>
    %338 = vector.extract_strided_slice %328 {offsets = [0, 64], sizes = [2, 32], strides = [1, 1]} : vector<2x128xf32> to vector<2x32xf32>
    %339 = arith.mulf %337, %338 : vector<2x32xf32>
    %340 = arith.addf %336, %339 : vector<2x32xf32>
    %341 = vector.extract_strided_slice %324 {offsets = [0, 96], sizes = [2, 32], strides = [1, 1]} : vector<2x128xf32> to vector<2x32xf32>
    %342 = math.tanh %334 : vector<2x32xf32>
    %343 = arith.mulf %341, %342 : vector<2x32xf32>
    %344 = vector.extract_strided_slice %328 {offsets = [0, 96], sizes = [2, 32], strides = [1, 1]} : vector<2x128xf32> to vector<2x32xf32>
    %345 = math.tanh %340 : vector<2x32xf32>
    %346 = arith.mulf %344, %345 : vector<2x32xf32>
    %347 = tpu.concatenate %343, %346 in 1 : vector<2x32xf32>, vector<2x32xf32> -> vector<2x64xf32>
    %348 = arith.maximumf %311, %343 : vector<2x32xf32>
    %349 = arith.maximumf %312, %346 : vector<2x32xf32>
    %c0_73 = arith.constant 0 : index
    %c0_74 = arith.constant 0 : index
    %350 = vector.load %arg1[%c0_73, %c0_74] : memref<16x16xf32, #tpu.memory_space<vmem>>, vector<2x16xf32>
    %351 = arith.maximumf %313, %350 : vector<2x16xf32>
    %cst_75 = arith.constant dense<0.000000e+00> : vector<2x256xf32>
    %352 = tpu.matmul %347, %307, %cst_75 {dimension_numbers = #tpu.dot_dimension_numbers<[1], [0], [0], [1], [0, 0, 1, 1], [], []>} : vector<2x64xf32>, vector<64x256xf32>, vector<2x256xf32> -> vector<2x256xf32>
    %c2_76 = arith.constant 2 : index
    %c0_77 = arith.constant 0 : index
    %353 = vector.load %arg11[%c2_76, %c0_77] : memref<16x256xf32, #tpu.memory_space<vmem>>, vector<2x128xf32>
    %354 = vector.extract_strided_slice %352 {offsets = [0, 0], sizes = [2, 128], strides = [1, 1]} : vector<2x256xf32> to vector<2x128xf32>
    %355 = arith.addf %353, %354 : vector<2x128xf32>
    %c12_78 = arith.constant 12 : index
    %c128_79 = arith.constant 128 : index
    %356 = vector.load %arg11[%c12_78, %c128_79] : memref<16x256xf32, #tpu.memory_space<vmem>>, vector<2x128xf32>
    %357 = vector.extract_strided_slice %352 {offsets = [0, 128], sizes = [2, 128], strides = [1, 1]} : vector<2x256xf32> to vector<2x128xf32>
    %358 = arith.addf %356, %357 : vector<2x128xf32>
    %359 = arith.mulf %355, %8 : vector<2x128xf32>
    %360 = math.tanh %359 : vector<2x128xf32>
    %361 = arith.mulf %360, %8 : vector<2x128xf32>
    %362 = arith.addf %361, %11 : vector<2x128xf32>
    %363 = arith.mulf %358, %8 : vector<2x128xf32>
    %364 = math.tanh %363 : vector<2x128xf32>
    %365 = arith.mulf %364, %8 : vector<2x128xf32>
    %366 = arith.addf %365, %11 : vector<2x128xf32>
    %367 = vector.extract_strided_slice %362 {offsets = [0, 32], sizes = [2, 32], strides = [1, 1]} : vector<2x128xf32> to vector<2x32xf32>
    %368 = arith.mulf %367, %334 : vector<2x32xf32>
    %369 = vector.extract_strided_slice %362 {offsets = [0, 0], sizes = [2, 32], strides = [1, 1]} : vector<2x128xf32> to vector<2x32xf32>
    %370 = vector.extract_strided_slice %362 {offsets = [0, 64], sizes = [2, 32], strides = [1, 1]} : vector<2x128xf32> to vector<2x32xf32>
    %371 = arith.mulf %369, %370 : vector<2x32xf32>
    %372 = arith.addf %368, %371 : vector<2x32xf32>
    %373 = vector.extract_strided_slice %366 {offsets = [0, 32], sizes = [2, 32], strides = [1, 1]} : vector<2x128xf32> to vector<2x32xf32>
    %374 = arith.mulf %373, %340 : vector<2x32xf32>
    %375 = vector.extract_strided_slice %366 {offsets = [0, 0], sizes = [2, 32], strides = [1, 1]} : vector<2x128xf32> to vector<2x32xf32>
    %376 = vector.extract_strided_slice %366 {offsets = [0, 64], sizes = [2, 32], strides = [1, 1]} : vector<2x128xf32> to vector<2x32xf32>
    %377 = arith.mulf %375, %376 : vector<2x32xf32>
    %378 = arith.addf %374, %377 : vector<2x32xf32>
    %379 = vector.extract_strided_slice %362 {offsets = [0, 96], sizes = [2, 32], strides = [1, 1]} : vector<2x128xf32> to vector<2x32xf32>
    %380 = math.tanh %372 : vector<2x32xf32>
    %381 = arith.mulf %379, %380 : vector<2x32xf32>
    %382 = vector.extract_strided_slice %366 {offsets = [0, 96], sizes = [2, 32], strides = [1, 1]} : vector<2x128xf32> to vector<2x32xf32>
    %383 = math.tanh %378 : vector<2x32xf32>
    %384 = arith.mulf %382, %383 : vector<2x32xf32>
    %385 = tpu.concatenate %381, %384 in 1 : vector<2x32xf32>, vector<2x32xf32> -> vector<2x64xf32>
    %386 = arith.maximumf %348, %381 : vector<2x32xf32>
    %387 = arith.maximumf %349, %384 : vector<2x32xf32>
    %c2_80 = arith.constant 2 : index
    %c0_81 = arith.constant 0 : index
    %388 = vector.load %arg1[%c2_80, %c0_81] : memref<16x16xf32, #tpu.memory_space<vmem>>, vector<2x16xf32>
    %389 = arith.maximumf %351, %388 : vector<2x16xf32>
    %cst_82 = arith.constant dense<0.000000e+00> : vector<2x256xf32>
    %390 = tpu.matmul %385, %307, %cst_82 {dimension_numbers = #tpu.dot_dimension_numbers<[1], [0], [0], [1], [0, 0, 1, 1], [], []>} : vector<2x64xf32>, vector<64x256xf32>, vector<2x256xf32> -> vector<2x256xf32>
    %c4_83 = arith.constant 4 : index
    %c0_84 = arith.constant 0 : index
    %391 = vector.load %arg11[%c4_83, %c0_84] : memref<16x256xf32, #tpu.memory_space<vmem>>, vector<2x128xf32>
    %392 = vector.extract_strided_slice %390 {offsets = [0, 0], sizes = [2, 128], strides = [1, 1]} : vector<2x256xf32> to vector<2x128xf32>
    %393 = arith.addf %391, %392 : vector<2x128xf32>
    %c10_85 = arith.constant 10 : index
    %c128_86 = arith.constant 128 : index
    %394 = vector.load %arg11[%c10_85, %c128_86] : memref<16x256xf32, #tpu.memory_space<vmem>>, vector<2x128xf32>
    %395 = vector.extract_strided_slice %390 {offsets = [0, 128], sizes = [2, 128], strides = [1, 1]} : vector<2x256xf32> to vector<2x128xf32>
    %396 = arith.addf %394, %395 : vector<2x128xf32>
    %397 = arith.mulf %393, %8 : vector<2x128xf32>
    %398 = math.tanh %397 : vector<2x128xf32>
    %399 = arith.mulf %398, %8 : vector<2x128xf32>
    %400 = arith.addf %399, %11 : vector<2x128xf32>
    %401 = arith.mulf %396, %8 : vector<2x128xf32>
    %402 = math.tanh %401 : vector<2x128xf32>
    %403 = arith.mulf %402, %8 : vector<2x128xf32>
    %404 = arith.addf %403, %11 : vector<2x128xf32>
    %405 = vector.extract_strided_slice %400 {offsets = [0, 32], sizes = [2, 32], strides = [1, 1]} : vector<2x128xf32> to vector<2x32xf32>
    %406 = arith.mulf %405, %372 : vector<2x32xf32>
    %407 = vector.extract_strided_slice %400 {offsets = [0, 0], sizes = [2, 32], strides = [1, 1]} : vector<2x128xf32> to vector<2x32xf32>
    %408 = vector.extract_strided_slice %400 {offsets = [0, 64], sizes = [2, 32], strides = [1, 1]} : vector<2x128xf32> to vector<2x32xf32>
    %409 = arith.mulf %407, %408 : vector<2x32xf32>
    %410 = arith.addf %406, %409 : vector<2x32xf32>
    %411 = vector.extract_strided_slice %404 {offsets = [0, 32], sizes = [2, 32], strides = [1, 1]} : vector<2x128xf32> to vector<2x32xf32>
    %412 = arith.mulf %411, %378 : vector<2x32xf32>
    %413 = vector.extract_strided_slice %404 {offsets = [0, 0], sizes = [2, 32], strides = [1, 1]} : vector<2x128xf32> to vector<2x32xf32>
    %414 = vector.extract_strided_slice %404 {offsets = [0, 64], sizes = [2, 32], strides = [1, 1]} : vector<2x128xf32> to vector<2x32xf32>
    %415 = arith.mulf %413, %414 : vector<2x32xf32>
    %416 = arith.addf %412, %415 : vector<2x32xf32>
    %417 = vector.extract_strided_slice %400 {offsets = [0, 96], sizes = [2, 32], strides = [1, 1]} : vector<2x128xf32> to vector<2x32xf32>
    %418 = math.tanh %410 : vector<2x32xf32>
    %419 = arith.mulf %417, %418 : vector<2x32xf32>
    %420 = vector.extract_strided_slice %404 {offsets = [0, 96], sizes = [2, 32], strides = [1, 1]} : vector<2x128xf32> to vector<2x32xf32>
    %421 = math.tanh %416 : vector<2x32xf32>
    %422 = arith.mulf %420, %421 : vector<2x32xf32>
    %423 = tpu.concatenate %419, %422 in 1 : vector<2x32xf32>, vector<2x32xf32> -> vector<2x64xf32>
    %424 = arith.maximumf %386, %419 : vector<2x32xf32>
    %425 = arith.maximumf %387, %422 : vector<2x32xf32>
    %c4_87 = arith.constant 4 : index
    %c0_88 = arith.constant 0 : index
    %426 = vector.load %arg1[%c4_87, %c0_88] : memref<16x16xf32, #tpu.memory_space<vmem>>, vector<2x16xf32>
    %427 = arith.maximumf %389, %426 : vector<2x16xf32>
    %cst_89 = arith.constant dense<0.000000e+00> : vector<2x256xf32>
    %428 = tpu.matmul %423, %307, %cst_89 {dimension_numbers = #tpu.dot_dimension_numbers<[1], [0], [0], [1], [0, 0, 1, 1], [], []>} : vector<2x64xf32>, vector<64x256xf32>, vector<2x256xf32> -> vector<2x256xf32>
    %c6_90 = arith.constant 6 : index
    %c0_91 = arith.constant 0 : index
    %429 = vector.load %arg11[%c6_90, %c0_91] : memref<16x256xf32, #tpu.memory_space<vmem>>, vector<2x128xf32>
    %430 = vector.extract_strided_slice %428 {offsets = [0, 0], sizes = [2, 128], strides = [1, 1]} : vector<2x256xf32> to vector<2x128xf32>
    %431 = arith.addf %429, %430 : vector<2x128xf32>
    %c8_92 = arith.constant 8 : index
    %c128_93 = arith.constant 128 : index
    %432 = vector.load %arg11[%c8_92, %c128_93] : memref<16x256xf32, #tpu.memory_space<vmem>>, vector<2x128xf32>
    %433 = vector.extract_strided_slice %428 {offsets = [0, 128], sizes = [2, 128], strides = [1, 1]} : vector<2x256xf32> to vector<2x128xf32>
    %434 = arith.addf %432, %433 : vector<2x128xf32>
    %435 = arith.mulf %431, %8 : vector<2x128xf32>
    %436 = math.tanh %435 : vector<2x128xf32>
    %437 = arith.mulf %436, %8 : vector<2x128xf32>
    %438 = arith.addf %437, %11 : vector<2x128xf32>
    %439 = arith.mulf %434, %8 : vector<2x128xf32>
    %440 = math.tanh %439 : vector<2x128xf32>
    %441 = arith.mulf %440, %8 : vector<2x128xf32>
    %442 = arith.addf %441, %11 : vector<2x128xf32>
    %443 = vector.extract_strided_slice %438 {offsets = [0, 32], sizes = [2, 32], strides = [1, 1]} : vector<2x128xf32> to vector<2x32xf32>
    %444 = arith.mulf %443, %410 : vector<2x32xf32>
    %445 = vector.extract_strided_slice %438 {offsets = [0, 0], sizes = [2, 32], strides = [1, 1]} : vector<2x128xf32> to vector<2x32xf32>
    %446 = vector.extract_strided_slice %438 {offsets = [0, 64], sizes = [2, 32], strides = [1, 1]} : vector<2x128xf32> to vector<2x32xf32>
    %447 = arith.mulf %445, %446 : vector<2x32xf32>
    %448 = arith.addf %444, %447 : vector<2x32xf32>
    %449 = vector.extract_strided_slice %442 {offsets = [0, 32], sizes = [2, 32], strides = [1, 1]} : vector<2x128xf32> to vector<2x32xf32>
    %450 = arith.mulf %449, %416 : vector<2x32xf32>
    %451 = vector.extract_strided_slice %442 {offsets = [0, 0], sizes = [2, 32], strides = [1, 1]} : vector<2x128xf32> to vector<2x32xf32>
    %452 = vector.extract_strided_slice %442 {offsets = [0, 64], sizes = [2, 32], strides = [1, 1]} : vector<2x128xf32> to vector<2x32xf32>
    %453 = arith.mulf %451, %452 : vector<2x32xf32>
    %454 = arith.addf %450, %453 : vector<2x32xf32>
    %455 = vector.extract_strided_slice %438 {offsets = [0, 96], sizes = [2, 32], strides = [1, 1]} : vector<2x128xf32> to vector<2x32xf32>
    %456 = math.tanh %448 : vector<2x32xf32>
    %457 = arith.mulf %455, %456 : vector<2x32xf32>
    %458 = vector.extract_strided_slice %442 {offsets = [0, 96], sizes = [2, 32], strides = [1, 1]} : vector<2x128xf32> to vector<2x32xf32>
    %459 = math.tanh %454 : vector<2x32xf32>
    %460 = arith.mulf %458, %459 : vector<2x32xf32>
    %461 = tpu.concatenate %457, %460 in 1 : vector<2x32xf32>, vector<2x32xf32> -> vector<2x64xf32>
    %462 = arith.maximumf %424, %457 : vector<2x32xf32>
    %463 = arith.maximumf %425, %460 : vector<2x32xf32>
    %c6_94 = arith.constant 6 : index
    %c0_95 = arith.constant 0 : index
    %464 = vector.load %arg1[%c6_94, %c0_95] : memref<16x16xf32, #tpu.memory_space<vmem>>, vector<2x16xf32>
    %465 = arith.maximumf %427, %464 : vector<2x16xf32>
    %cst_96 = arith.constant dense<0.000000e+00> : vector<2x256xf32>
    %466 = tpu.matmul %461, %307, %cst_96 {dimension_numbers = #tpu.dot_dimension_numbers<[1], [0], [0], [1], [0, 0, 1, 1], [], []>} : vector<2x64xf32>, vector<64x256xf32>, vector<2x256xf32> -> vector<2x256xf32>
    %c8_97 = arith.constant 8 : index
    %c0_98 = arith.constant 0 : index
    %467 = vector.load %arg11[%c8_97, %c0_98] : memref<16x256xf32, #tpu.memory_space<vmem>>, vector<2x128xf32>
    %468 = vector.extract_strided_slice %466 {offsets = [0, 0], sizes = [2, 128], strides = [1, 1]} : vector<2x256xf32> to vector<2x128xf32>
    %469 = arith.addf %467, %468 : vector<2x128xf32>
    %c6_99 = arith.constant 6 : index
    %c128_100 = arith.constant 128 : index
    %470 = vector.load %arg11[%c6_99, %c128_100] : memref<16x256xf32, #tpu.memory_space<vmem>>, vector<2x128xf32>
    %471 = vector.extract_strided_slice %466 {offsets = [0, 128], sizes = [2, 128], strides = [1, 1]} : vector<2x256xf32> to vector<2x128xf32>
    %472 = arith.addf %470, %471 : vector<2x128xf32>
    %473 = arith.mulf %469, %8 : vector<2x128xf32>
    %474 = math.tanh %473 : vector<2x128xf32>
    %475 = arith.mulf %474, %8 : vector<2x128xf32>
    %476 = arith.addf %475, %11 : vector<2x128xf32>
    %477 = arith.mulf %472, %8 : vector<2x128xf32>
    %478 = math.tanh %477 : vector<2x128xf32>
    %479 = arith.mulf %478, %8 : vector<2x128xf32>
    %480 = arith.addf %479, %11 : vector<2x128xf32>
    %481 = vector.extract_strided_slice %476 {offsets = [0, 32], sizes = [2, 32], strides = [1, 1]} : vector<2x128xf32> to vector<2x32xf32>
    %482 = arith.mulf %481, %448 : vector<2x32xf32>
    %483 = vector.extract_strided_slice %476 {offsets = [0, 0], sizes = [2, 32], strides = [1, 1]} : vector<2x128xf32> to vector<2x32xf32>
    %484 = vector.extract_strided_slice %476 {offsets = [0, 64], sizes = [2, 32], strides = [1, 1]} : vector<2x128xf32> to vector<2x32xf32>
    %485 = arith.mulf %483, %484 : vector<2x32xf32>
    %486 = arith.addf %482, %485 : vector<2x32xf32>
    %487 = vector.extract_strided_slice %480 {offsets = [0, 32], sizes = [2, 32], strides = [1, 1]} : vector<2x128xf32> to vector<2x32xf32>
    %488 = arith.mulf %487, %454 : vector<2x32xf32>
    %489 = vector.extract_strided_slice %480 {offsets = [0, 0], sizes = [2, 32], strides = [1, 1]} : vector<2x128xf32> to vector<2x32xf32>
    %490 = vector.extract_strided_slice %480 {offsets = [0, 64], sizes = [2, 32], strides = [1, 1]} : vector<2x128xf32> to vector<2x32xf32>
    %491 = arith.mulf %489, %490 : vector<2x32xf32>
    %492 = arith.addf %488, %491 : vector<2x32xf32>
    %493 = vector.extract_strided_slice %476 {offsets = [0, 96], sizes = [2, 32], strides = [1, 1]} : vector<2x128xf32> to vector<2x32xf32>
    %494 = math.tanh %486 : vector<2x32xf32>
    %495 = arith.mulf %493, %494 : vector<2x32xf32>
    %496 = vector.extract_strided_slice %480 {offsets = [0, 96], sizes = [2, 32], strides = [1, 1]} : vector<2x128xf32> to vector<2x32xf32>
    %497 = math.tanh %492 : vector<2x32xf32>
    %498 = arith.mulf %496, %497 : vector<2x32xf32>
    %499 = tpu.concatenate %495, %498 in 1 : vector<2x32xf32>, vector<2x32xf32> -> vector<2x64xf32>
    %500 = arith.maximumf %462, %495 : vector<2x32xf32>
    %501 = arith.maximumf %463, %498 : vector<2x32xf32>
    %c8_101 = arith.constant 8 : index
    %c0_102 = arith.constant 0 : index
    %502 = vector.load %arg1[%c8_101, %c0_102] : memref<16x16xf32, #tpu.memory_space<vmem>>, vector<2x16xf32>
    %503 = arith.maximumf %465, %502 : vector<2x16xf32>
    %cst_103 = arith.constant dense<0.000000e+00> : vector<2x256xf32>
    %504 = tpu.matmul %499, %307, %cst_103 {dimension_numbers = #tpu.dot_dimension_numbers<[1], [0], [0], [1], [0, 0, 1, 1], [], []>} : vector<2x64xf32>, vector<64x256xf32>, vector<2x256xf32> -> vector<2x256xf32>
    %c10_104 = arith.constant 10 : index
    %c0_105 = arith.constant 0 : index
    %505 = vector.load %arg11[%c10_104, %c0_105] : memref<16x256xf32, #tpu.memory_space<vmem>>, vector<2x128xf32>
    %506 = vector.extract_strided_slice %504 {offsets = [0, 0], sizes = [2, 128], strides = [1, 1]} : vector<2x256xf32> to vector<2x128xf32>
    %507 = arith.addf %505, %506 : vector<2x128xf32>
    %c4_106 = arith.constant 4 : index
    %c128_107 = arith.constant 128 : index
    %508 = vector.load %arg11[%c4_106, %c128_107] : memref<16x256xf32, #tpu.memory_space<vmem>>, vector<2x128xf32>
    %509 = vector.extract_strided_slice %504 {offsets = [0, 128], sizes = [2, 128], strides = [1, 1]} : vector<2x256xf32> to vector<2x128xf32>
    %510 = arith.addf %508, %509 : vector<2x128xf32>
    %511 = arith.mulf %507, %8 : vector<2x128xf32>
    %512 = math.tanh %511 : vector<2x128xf32>
    %513 = arith.mulf %512, %8 : vector<2x128xf32>
    %514 = arith.addf %513, %11 : vector<2x128xf32>
    %515 = arith.mulf %510, %8 : vector<2x128xf32>
    %516 = math.tanh %515 : vector<2x128xf32>
    %517 = arith.mulf %516, %8 : vector<2x128xf32>
    %518 = arith.addf %517, %11 : vector<2x128xf32>
    %519 = vector.extract_strided_slice %514 {offsets = [0, 32], sizes = [2, 32], strides = [1, 1]} : vector<2x128xf32> to vector<2x32xf32>
    %520 = arith.mulf %519, %486 : vector<2x32xf32>
    %521 = vector.extract_strided_slice %514 {offsets = [0, 0], sizes = [2, 32], strides = [1, 1]} : vector<2x128xf32> to vector<2x32xf32>
    %522 = vector.extract_strided_slice %514 {offsets = [0, 64], sizes = [2, 32], strides = [1, 1]} : vector<2x128xf32> to vector<2x32xf32>
    %523 = arith.mulf %521, %522 : vector<2x32xf32>
    %524 = arith.addf %520, %523 : vector<2x32xf32>
    %525 = vector.extract_strided_slice %518 {offsets = [0, 32], sizes = [2, 32], strides = [1, 1]} : vector<2x128xf32> to vector<2x32xf32>
    %526 = arith.mulf %525, %492 : vector<2x32xf32>
    %527 = vector.extract_strided_slice %518 {offsets = [0, 0], sizes = [2, 32], strides = [1, 1]} : vector<2x128xf32> to vector<2x32xf32>
    %528 = vector.extract_strided_slice %518 {offsets = [0, 64], sizes = [2, 32], strides = [1, 1]} : vector<2x128xf32> to vector<2x32xf32>
    %529 = arith.mulf %527, %528 : vector<2x32xf32>
    %530 = arith.addf %526, %529 : vector<2x32xf32>
    %531 = vector.extract_strided_slice %514 {offsets = [0, 96], sizes = [2, 32], strides = [1, 1]} : vector<2x128xf32> to vector<2x32xf32>
    %532 = math.tanh %524 : vector<2x32xf32>
    %533 = arith.mulf %531, %532 : vector<2x32xf32>
    %534 = vector.extract_strided_slice %518 {offsets = [0, 96], sizes = [2, 32], strides = [1, 1]} : vector<2x128xf32> to vector<2x32xf32>
    %535 = math.tanh %530 : vector<2x32xf32>
    %536 = arith.mulf %534, %535 : vector<2x32xf32>
    %537 = tpu.concatenate %533, %536 in 1 : vector<2x32xf32>, vector<2x32xf32> -> vector<2x64xf32>
    %538 = arith.maximumf %500, %533 : vector<2x32xf32>
    %539 = arith.maximumf %501, %536 : vector<2x32xf32>
    %c10_108 = arith.constant 10 : index
    %c0_109 = arith.constant 0 : index
    %540 = vector.load %arg1[%c10_108, %c0_109] : memref<16x16xf32, #tpu.memory_space<vmem>>, vector<2x16xf32>
    %541 = arith.maximumf %503, %540 : vector<2x16xf32>
    %cst_110 = arith.constant dense<0.000000e+00> : vector<2x256xf32>
    %542 = tpu.matmul %537, %307, %cst_110 {dimension_numbers = #tpu.dot_dimension_numbers<[1], [0], [0], [1], [0, 0, 1, 1], [], []>} : vector<2x64xf32>, vector<64x256xf32>, vector<2x256xf32> -> vector<2x256xf32>
    %c12_111 = arith.constant 12 : index
    %c0_112 = arith.constant 0 : index
    %543 = vector.load %arg11[%c12_111, %c0_112] : memref<16x256xf32, #tpu.memory_space<vmem>>, vector<2x128xf32>
    %544 = vector.extract_strided_slice %542 {offsets = [0, 0], sizes = [2, 128], strides = [1, 1]} : vector<2x256xf32> to vector<2x128xf32>
    %545 = arith.addf %543, %544 : vector<2x128xf32>
    %c2_113 = arith.constant 2 : index
    %c128_114 = arith.constant 128 : index
    %546 = vector.load %arg11[%c2_113, %c128_114] : memref<16x256xf32, #tpu.memory_space<vmem>>, vector<2x128xf32>
    %547 = vector.extract_strided_slice %542 {offsets = [0, 128], sizes = [2, 128], strides = [1, 1]} : vector<2x256xf32> to vector<2x128xf32>
    %548 = arith.addf %546, %547 : vector<2x128xf32>
    %549 = arith.mulf %545, %8 : vector<2x128xf32>
    %550 = math.tanh %549 : vector<2x128xf32>
    %551 = arith.mulf %550, %8 : vector<2x128xf32>
    %552 = arith.addf %551, %11 : vector<2x128xf32>
    %553 = arith.mulf %548, %8 : vector<2x128xf32>
    %554 = math.tanh %553 : vector<2x128xf32>
    %555 = arith.mulf %554, %8 : vector<2x128xf32>
    %556 = arith.addf %555, %11 : vector<2x128xf32>
    %557 = vector.extract_strided_slice %552 {offsets = [0, 32], sizes = [2, 32], strides = [1, 1]} : vector<2x128xf32> to vector<2x32xf32>
    %558 = arith.mulf %557, %524 : vector<2x32xf32>
    %559 = vector.extract_strided_slice %552 {offsets = [0, 0], sizes = [2, 32], strides = [1, 1]} : vector<2x128xf32> to vector<2x32xf32>
    %560 = vector.extract_strided_slice %552 {offsets = [0, 64], sizes = [2, 32], strides = [1, 1]} : vector<2x128xf32> to vector<2x32xf32>
    %561 = arith.mulf %559, %560 : vector<2x32xf32>
    %562 = arith.addf %558, %561 : vector<2x32xf32>
    %563 = vector.extract_strided_slice %556 {offsets = [0, 32], sizes = [2, 32], strides = [1, 1]} : vector<2x128xf32> to vector<2x32xf32>
    %564 = arith.mulf %563, %530 : vector<2x32xf32>
    %565 = vector.extract_strided_slice %556 {offsets = [0, 0], sizes = [2, 32], strides = [1, 1]} : vector<2x128xf32> to vector<2x32xf32>
    %566 = vector.extract_strided_slice %556 {offsets = [0, 64], sizes = [2, 32], strides = [1, 1]} : vector<2x128xf32> to vector<2x32xf32>
    %567 = arith.mulf %565, %566 : vector<2x32xf32>
    %568 = arith.addf %564, %567 : vector<2x32xf32>
    %569 = vector.extract_strided_slice %552 {offsets = [0, 96], sizes = [2, 32], strides = [1, 1]} : vector<2x128xf32> to vector<2x32xf32>
    %570 = math.tanh %562 : vector<2x32xf32>
    %571 = arith.mulf %569, %570 : vector<2x32xf32>
    %572 = vector.extract_strided_slice %556 {offsets = [0, 96], sizes = [2, 32], strides = [1, 1]} : vector<2x128xf32> to vector<2x32xf32>
    %573 = math.tanh %568 : vector<2x32xf32>
    %574 = arith.mulf %572, %573 : vector<2x32xf32>
    %575 = tpu.concatenate %571, %574 in 1 : vector<2x32xf32>, vector<2x32xf32> -> vector<2x64xf32>
    %576 = arith.maximumf %538, %571 : vector<2x32xf32>
    %577 = arith.maximumf %539, %574 : vector<2x32xf32>
    %c12_115 = arith.constant 12 : index
    %c0_116 = arith.constant 0 : index
    %578 = vector.load %arg1[%c12_115, %c0_116] : memref<16x16xf32, #tpu.memory_space<vmem>>, vector<2x16xf32>
    %579 = arith.maximumf %541, %578 : vector<2x16xf32>
    %cst_117 = arith.constant dense<0.000000e+00> : vector<2x256xf32>
    %580 = tpu.matmul %575, %307, %cst_117 {dimension_numbers = #tpu.dot_dimension_numbers<[1], [0], [0], [1], [0, 0, 1, 1], [], []>} : vector<2x64xf32>, vector<64x256xf32>, vector<2x256xf32> -> vector<2x256xf32>
    %c14_118 = arith.constant 14 : index
    %c0_119 = arith.constant 0 : index
    %581 = vector.load %arg11[%c14_118, %c0_119] : memref<16x256xf32, #tpu.memory_space<vmem>>, vector<2x128xf32>
    %582 = vector.extract_strided_slice %580 {offsets = [0, 0], sizes = [2, 128], strides = [1, 1]} : vector<2x256xf32> to vector<2x128xf32>
    %583 = arith.addf %581, %582 : vector<2x128xf32>
    %c0_120 = arith.constant 0 : index
    %c128_121 = arith.constant 128 : index
    %584 = vector.load %arg11[%c0_120, %c128_121] : memref<16x256xf32, #tpu.memory_space<vmem>>, vector<2x128xf32>
    %585 = vector.extract_strided_slice %580 {offsets = [0, 128], sizes = [2, 128], strides = [1, 1]} : vector<2x256xf32> to vector<2x128xf32>
    %586 = arith.addf %584, %585 : vector<2x128xf32>
    %587 = arith.mulf %583, %8 : vector<2x128xf32>
    %588 = math.tanh %587 : vector<2x128xf32>
    %589 = arith.mulf %588, %8 : vector<2x128xf32>
    %590 = arith.addf %589, %11 : vector<2x128xf32>
    %591 = arith.mulf %586, %8 : vector<2x128xf32>
    %592 = math.tanh %591 : vector<2x128xf32>
    %593 = arith.mulf %592, %8 : vector<2x128xf32>
    %594 = arith.addf %593, %11 : vector<2x128xf32>
    %595 = vector.extract_strided_slice %590 {offsets = [0, 32], sizes = [2, 32], strides = [1, 1]} : vector<2x128xf32> to vector<2x32xf32>
    %596 = arith.mulf %595, %562 : vector<2x32xf32>
    %597 = vector.extract_strided_slice %590 {offsets = [0, 0], sizes = [2, 32], strides = [1, 1]} : vector<2x128xf32> to vector<2x32xf32>
    %598 = vector.extract_strided_slice %590 {offsets = [0, 64], sizes = [2, 32], strides = [1, 1]} : vector<2x128xf32> to vector<2x32xf32>
    %599 = arith.mulf %597, %598 : vector<2x32xf32>
    %600 = arith.addf %596, %599 : vector<2x32xf32>
    %601 = vector.extract_strided_slice %594 {offsets = [0, 32], sizes = [2, 32], strides = [1, 1]} : vector<2x128xf32> to vector<2x32xf32>
    %602 = arith.mulf %601, %568 : vector<2x32xf32>
    %603 = vector.extract_strided_slice %594 {offsets = [0, 0], sizes = [2, 32], strides = [1, 1]} : vector<2x128xf32> to vector<2x32xf32>
    %604 = vector.extract_strided_slice %594 {offsets = [0, 64], sizes = [2, 32], strides = [1, 1]} : vector<2x128xf32> to vector<2x32xf32>
    %605 = arith.mulf %603, %604 : vector<2x32xf32>
    %606 = arith.addf %602, %605 : vector<2x32xf32>
    %607 = vector.extract_strided_slice %590 {offsets = [0, 96], sizes = [2, 32], strides = [1, 1]} : vector<2x128xf32> to vector<2x32xf32>
    %608 = math.tanh %600 : vector<2x32xf32>
    %609 = arith.mulf %607, %608 : vector<2x32xf32>
    %610 = vector.extract_strided_slice %594 {offsets = [0, 96], sizes = [2, 32], strides = [1, 1]} : vector<2x128xf32> to vector<2x32xf32>
    %611 = math.tanh %606 : vector<2x32xf32>
    %612 = arith.mulf %610, %611 : vector<2x32xf32>
    %613 = arith.maximumf %576, %609 : vector<2x32xf32>
    %614 = arith.maximumf %577, %612 : vector<2x32xf32>
    %c14_122 = arith.constant 14 : index
    %c0_123 = arith.constant 0 : index
    %615 = vector.load %arg1[%c14_122, %c0_123] : memref<16x16xf32, #tpu.memory_space<vmem>>, vector<2x16xf32>
    %616 = arith.maximumf %579, %615 : vector<2x16xf32>
    %617 = tpu.concatenate %613, %614, %616 in 1 : vector<2x32xf32>, vector<2x32xf32>, vector<2x16xf32> -> vector<2x80xf32>
    %c0_124 = arith.constant 0 : index
    %c0_125 = arith.constant 0 : index
    %618 = vector.load %arg8[%c0_124, %c0_125] : memref<80x4xf32, #tpu.memory_space<vmem>>, vector<80x4xf32>
    %cst_126 = arith.constant dense<0.000000e+00> : vector<2x4xf32>
    %619 = tpu.matmul %617, %618, %cst_126 {dimension_numbers = #tpu.dot_dimension_numbers<[1], [0], [0], [1], [0, 0, 1, 1], [], []>} : vector<2x80xf32>, vector<80x4xf32>, vector<2x4xf32> -> vector<2x4xf32>
    %c0_127 = arith.constant 0 : index
    %c0_128 = arith.constant 0 : index
    %620 = vector.load %arg9[%c0_127, %c0_128] : memref<1x4xf32, #tpu.memory_space<vmem>>, vector<1x4xf32>
    %621 = vector.broadcast %620 : vector<1x4xf32> to vector<2x4xf32>
    %622 = arith.addf %619, %621 : vector<2x4xf32>
    %c0_129 = arith.constant 0 : index
    %c0_130 = arith.constant 0 : index
    %623 = vector.load %arg10[%c0_129, %c0_130] : memref<2x4xf32, #tpu.memory_space<vmem>>, vector<2x4xf32>
    tpu.vector_store %arg10[%c0_129, %c0_130], %622 {strides = array<i32>} : memref<2x4xf32, #tpu.memory_space<vmem>>, vector<2x4xf32>,
    return
  }
  func.func @transform_0(%arg0: i32) -> (i32, i32) {
    %c0_i32 = arith.constant 0 : i32
    %c0_i32_0 = arith.constant 0 : i32
    %c0_i32_1 = arith.constant 0 : i32
    return %c0_i32, %c0_i32_0 : i32, i32
  }
  func.func @transform_1(%arg0: i32) -> (i32, i32) {
    %c0_i32 = arith.constant 0 : i32
    %c0_i32_0 = arith.constant 0 : i32
    %c0_i32_1 = arith.constant 0 : i32
    return %c0_i32, %c0_i32_0 : i32, i32
  }
  func.func @transform_2(%arg0: i32) -> (i32, i32) {
    %c0_i32 = arith.constant 0 : i32
    %c0_i32_0 = arith.constant 0 : i32
    %c0_i32_1 = arith.constant 0 : i32
    return %c0_i32, %c0_i32_0 : i32, i32
  }
  func.func @transform_3(%arg0: i32) -> (i32, i32) {
    %c0_i32 = arith.constant 0 : i32
    %c0_i32_0 = arith.constant 0 : i32
    %c0_i32_1 = arith.constant 0 : i32
    return %c0_i32, %c0_i32_0 : i32, i32
  }
  func.func @transform_4(%arg0: i32) -> (i32, i32) {
    %c0_i32 = arith.constant 0 : i32
    %c0_i32_0 = arith.constant 0 : i32
    %c0_i32_1 = arith.constant 0 : i32
    return %c0_i32, %c0_i32_0 : i32, i32
  }
  func.func @transform_5(%arg0: i32) -> (i32, i32) {
    %c0_i32 = arith.constant 0 : i32
    %c0_i32_0 = arith.constant 0 : i32
    %c0_i32_1 = arith.constant 0 : i32
    return %c0_i32, %c0_i32_0 : i32, i32
  }
  func.func @transform_6(%arg0: i32) -> (i32, i32) {
    %c0_i32 = arith.constant 0 : i32
    %c0_i32_0 = arith.constant 0 : i32
    %c0_i32_1 = arith.constant 0 : i32
    return %c0_i32, %c0_i32_0 : i32, i32
  }
  func.func @transform_7(%arg0: i32) -> (i32, i32) {
    %c0_i32 = arith.constant 0 : i32
    %c0_i32_0 = arith.constant 0 : i32
    %c0_i32_1 = arith.constant 0 : i32
    return %c0_i32, %c0_i32_0 : i32, i32
  }
  func.func @transform_8(%arg0: i32) -> (i32, i32) {
    %c0_i32 = arith.constant 0 : i32
    %c0_i32_0 = arith.constant 0 : i32
    %c0_i32_1 = arith.constant 0 : i32
    return %c0_i32, %c0_i32_0 : i32, i32
  }
  func.func @transform_9(%arg0: i32) -> (i32, i32) {
    %c0_i32 = arith.constant 0 : i32
    %c0_i32_0 = arith.constant 0 : i32
    return %arg0, %c0_i32 : i32, i32
  }
}

</mosaic_0001>

<bundles_post_ra>
// kernel: _physi_rcnn_forward_jit.1
= control target key start
LH: loop header
LB: loop body
LE: loop exit
PB: predicated region body
PF: predicated region fallthrough
CT: control target
= control target key end

     0   :  { %14 = vsyncpa [#allocation5], 0  ;;  %s4174_s0 = inlined_call_operand.vmem [shape: f32[16,16], index: 0, kind: input, shape index: {}]   ;;  %s4175_s1 = inlined_call_operand.hbm [shape: bf16[16,256], index: 1, kind: input, shape index: {}]   ;;  %s4176_s2 = inlined_call_operand.vmem [shape: f32[64,256], index: 2, kind: input, shape index: {}]   ;;  %s4177_s3 = inlined_call_operand.vmem [shape: f32[1,256], index: 3, kind: input, shape index: {}]   ;;  %s4178_s4 = inlined_call_operand.hbm [shape: bf16[64,256], index: 4, kind: input, shape index: {}]   ;;  %s4179_s5 = inlined_call_operand.hbm [shape: f32[64,256], index: 5, kind: input, shape index: {}]   ;;  %s4180_s6 = inlined_call_operand.vmem [shape: f32[1,256], index: 6, kind: input, shape index: {}]   ;;  %s4181_s7 = inlined_call_operand.vmem [shape: f32[80,4], index: 7, kind: input, shape index: {}]   ;;  %s4182_s8 = inlined_call_operand.vmem [shape: f32[1,4], index: 8, kind: input, shape index: {}]   ;;  %s4183_s9 = inlined_call_operand.hbm [shape: f32[2,4], index: 9, kind: output, shape index: {}]  }
   0x1   :  { %15 = vsyncpa [#allocation8], 0 }
   0x2   :  { %16 = vsyncpa [#allocation6], 0  ;;  %s3332_s30 = smov [#allocation7]   ;;  %s3333_s11 = smov [#allocation4]  }
   0x3   :  { %s40_s10 = sshll.u32 %s3332_s30, 4  ;;  %s24_s12 = sshll.u32 %s3333_s11, 4  ;;  %s41_s10 = int_to_ptr.vmem [resolvable:$true] %s40_s10  ;;  %s3397_s12 = int_to_ptr.vmem [resolvable:$true] %s24_s12 }
   0x4   :  { %s3238_s15 = scalar_lea.hbm %s4178_s4, 1024 }
   0x5   :  { %p3239_p0 = scmp.ne.s32.totalorder %s4178_s4, %s3238_s15  ;;  %p3242_p1 = scmp.lt.u32.totalorder %s3238_s15, %s4178_s4 }
   0x7   :  { %p3244_p2 = pnand %p3242_p1, %p3239_p0 }
   0x9   :  { %3247 = shalt.err (!%p3244_p2)
}
   0xa   :  { %s3248_s20 = scalar_lea.vmem %s41_s10, 1024  ;;  %p3253_p4 = scmp.lt.s32.totalorder %s41_s10, %s41_s10 }
   0xb   :  { %p3249_p3 = scmp.ne.s32.totalorder %s41_s10, %s3248_s20  ;;  %p3254_p5 = scmp.lt.s32.totalorder %s3248_s20, %s3248_s20 }
   0xd   :  { %p3255_p6 = por %p3254_p5, %p3253_p4 }
   0xf   :  { %p3256_p7 = pnand %p3255_p6, %p3249_p3 }
  0x11   :  { %3259 = shalt.err (!%p3256_p7)
}
  0x12   :  { %s3334_s21 = smov 128   ;;  %s3335_s22 = smov 8  }
  0x13   :  { %46 = dma.hbm_to_vmem [thread:$0]  %s4178_s4, 1024, %s41_s10, [#allocation8], %s3334_s21, %s3334_s21, %s3335_s22  }
  0x14   :  { %s3260_s27 = scalar_lea.hbm %s4175_s1, 256 }
  0x15   :  { %p3261_p8 = scmp.ne.s32.totalorder %s4175_s1, %s3260_s27  ;;  %p3264_p9 = scmp.lt.u32.totalorder %s3260_s27, %s4175_s1 }
  0x17   :  { %p3266_p10 = pnand %p3264_p9, %p3261_p8 }
  0x19   :  { %3269 = shalt.err (!%p3266_p10)
}
  0x1a   :  { %s3270_s13 = scalar_lea.vmem %s3397_s12, 256  ;;  %p3275_p12 = scmp.lt.s32.totalorder %s3397_s12, %s3397_s12 }
  0x1b   :  { %p3271_p11 = scmp.ne.s32.totalorder %s3397_s12, %s3270_s13  ;;  %p3276_p13 = scmp.lt.s32.totalorder %s3270_s13, %s3270_s13 }
  0x1d   :  { %p3277_p0 = por %p3276_p13, %p3275_p12 }
  0x1f   :  { %p3278_p1 = pnand %p3277_p0, %p3271_p11 }
  0x21   :  { %3281 = shalt.err (!%p3278_p1)
}
  0x22   :  { %30 = dma.hbm_to_vmem [thread:$0]  %s4175_s1, 256, %s3397_s12, [#allocation5], %s3334_s21, %s3334_s21, %s3335_s22  }
  0x23   :  { %s3336_s14 = smov [#allocation9]   ;;  %s3282_s18 = scalar_lea.hbm %s4179_s5, 2048 }
  0x24   :  { %s52_s15 = sshll.u32 %s3336_s14, 4  ;;  %p3283_p2 = scmp.ne.s32.totalorder %s4179_s5, %s3282_s18  ;;  %s53_s15 = int_to_ptr.vmem [resolvable:$true] %s52_s15 }
  0x25   :  { %p3286_p3 = scmp.lt.u32.totalorder %s3282_s18, %s4179_s5 }
  0x27   :  { %p3288_p4 = pnand %p3286_p3, %p3283_p2 }
  0x29   :  { %3291 = shalt.err (!%p3288_p4)
}
  0x2a   :  { %s3292_s25 = scalar_lea.vmem %s53_s15, 2048  ;;  %p3297_p6 = scmp.lt.s32.totalorder %s53_s15, %s53_s15 }
  0x2b   :  { %p3293_p5 = scmp.ne.s32.totalorder %s53_s15, %s3292_s25  ;;  %p3298_p7 = scmp.lt.s32.totalorder %s3292_s25, %s3292_s25 }
  0x2d   :  { %p3299_p8 = por %p3298_p7, %p3297_p6 }
  0x2f   :  { %p3300_p9 = pnand %p3299_p8, %p3293_p5 }
  0x31   :  { %3303 = shalt.err (!%p3300_p9)
}
  0x32   :  { %s3337_s1 = smov 256   ;;  %s3338_s12 = smov 16  }
  0x33   :  { %58 = dma.hbm_to_vmem [thread:$0]  %s4179_s5, 2048, %s53_s15, [#allocation8], %s3337_s1, %s3337_s1, %s3338_s12  }
  0x34   :  { %3326 = dma.done.wait [#allocation5], 256  }
  0x35   :  { %3327 = vsyncadd [#allocation5], 4294967040 }
  0x36   :  { %3328 = dma.done.wait [#allocation8], 3072  }
  0x37   :  { %3329 = vsyncadd [#allocation8], 4294964224  ;;  %v3339_v0 = vmov 0   ;;  %v3340_v1 = vmov 0.0   ;;  %v3095_v2 = vld [vmem:[#allocation4 + $0x4] ss:$8 sps:$4 sm:$0xff]   ;;  %v75_v31 = vlaneseq }
  0x38   :  { %145 = vmatprep.mubr.bf16.mxu1 %v3339_v0  ;;  %378 = vmatprep.mubr.f32.mxu0 %v3340_v1  ;;  %v3097_v3 = vld [vmem:[#allocation4] ss:$8 sps:$4 sm:$0xff]   ;;  %v85_v4 = vld [vmem:[%s4174_s0] sm:$0xff]  ;;  %v86_v5 = vld [vmem:[%s4174_s0 + $0x8] sm:$0xff]  ;;  %vm109_vm0 = vcmask 130048   ;;  %v3341_v48 = vmov 0.5  }
  0x39   :  { %113 = vmatprep.subr.bf16.mxu1 %v3095_v2  ;;  %v87_v6 = vpack.c.bf16 %v86_v5, %v85_v4  ;;  %v161_v7 = vld [vmem:[%s4176_s2 + $0x8] sm:$0xff]  ;;  %v163_v8 = vld [vmem:[%s4176_s2 + $0x18] sm:$0xff]  ;;  %v160_v9 = vld [vmem:[%s4176_s2] sm:$0xff]  ;;  %v3541_v32 = vshrl.u32 %v75_v31, 7  ;;  %v76_v46 = vand.u32 127, %v75_v31  ;;  %s3343_s17 = smov 32  }
  0x3a   :  { %114 = vmatpush1.bf16.msra.mxu1 %v3097_v3  ;;  %v3457_v10 = vpack.c.bf16 %v163_v8, %v161_v7  ;;  %v162_v11 = vld [vmem:[%s4176_s2 + $0x10] sm:$0xff]  ;;  %v165_v12 = vld [vmem:[%s4176_s2 + $0x28] sm:$0xff]  ;;  %v167_v13 = vld [vmem:[%s4176_s2 + $0x38] sm:$0xff]  ;;  %vm309_vm4 = vcmask 261120   ;;  %vm176_vm5 = vcmask 523264   ;;  %vm1291_vm6 = vcmask 1041408  }
  0x3b   :  { %v3468_v14 = vpack.c.bf16 %v162_v11, %v160_v9  ;;  %v3470_v15 = vpack.c.bf16 %v167_v13, %v165_v12  ;;  %v164_v16 = vld [vmem:[%s4176_s2 + $0x20] sm:$0xff]  ;;  %v166_v17 = vld [vmem:[%s4176_s2 + $0x30] sm:$0xff]  ;;  %v169_v18 = vld [vmem:[%s4176_s2 + $0x48] sm:$0xff]  ;;  %v91_v33 = vsub.s32 0, %v3541_v32  ;;  %v95_v35 = vsub.s32 1, %v3541_v32  ;;  %s3346_s28 = smov [#allocation10]  }
  0x3c   :  { %2810 = vmatprep.subr.bf16.mxu1 %v3457_v10  ;;  %v171_v19 = vld [vmem:[%s4176_s2 + $0x58] sm:$0xff]  ;;  %2826 = vmatprep.subr.bf16.mxu0 %v3457_v10  ;;  %v168_v20 = vld [vmem:[%s4176_s2 + $0x40] sm:$0xff]  ;;  %v170_v21 = vld [vmem:[%s4176_s2 + $0x50] sm:$0xff]  ;;  %v3494_v22 = vpack.c.bf16 %v166_v17, %v164_v16  ;;  %vm77_vm1 = vcmp.ge.s32.totalorder %v76_v46, 64  ;;  %vm78_vm2 = vcmp.lt.s32.totalorder %v76_v46, 96  ;;  %vm1293_vm7 = vcmask 1043456  }
  0x3d   :  { %2749 = vmatmul.mubr.msk.bf16.vlgmr.msra.gmra.mrb[0].mxu1 %vm109_vm0, %v87_v6  ;;  %2828 = vmatpush1.bf16.msra.mxu0 %v3468_v14  ;;  %v173_v23 = vld [vmem:[%s4176_s2 + $0x68] sm:$0xff]  ;;  %v175_v24 = vld [vmem:[%s4176_s2 + $0x78] sm:$0xff]  ;;  %v3504_v25 = vpack.c.bf16 %v171_v19, %v169_v18  ;;  %v3509_v26 = vpack.c.bf16 %v170_v21, %v168_v20  ;;  %v172_v28 = vld [vmem:[%s4176_s2 + $0x60] sm:$0xff]  ;;  %vm1295_vm8 = vcmask 1045504   ;;  %vm1324_vm9 = vcmask 523520  }
  0x3e   :  { %2812 = vmatpush1.bf16.msra.mxu1 %v3468_v14  ;;  %244 = vmatprep.mubr.f32.mxu1 %v3340_v1  ;;  %v3513_v27 = vpack.c.bf16 %v175_v24, %v173_v23  ;;  %v174_v29 = vld [vmem:[%s4176_s2 + $0x70] sm:$0xff]  ;;  %v84_v34 = vld [vmem:[%s4177_s3] sm:$0x3]  ;;  %vm3552_vm3 = vmand %vm77_vm1, %vm78_vm2  ;;  %s3342_s3 = smov 64   ;;  %vm3345_vm10 = vmmov 0   ;;  %vm2655_vm11 = vcmask 654336  }
  0x3f   :  { %2814 = vmatprep.subr.bf16.mxu1 %v3470_v15  ;;  %2830 = vmatprep.subr.bf16.mxu0 %v3470_v15  ;;  %v3523_v30 = vpack.c.bf16 %v174_v29, %v172_v28  ;;  %v92_v36 = vrot.slane %v84_v34, %v91_v33  ;;  %v96_v37 = vrot.slane %v84_v34, %v95_v35  ;;  %v3558_v49 = vsel %vm3552_vm3, 1.0, %v3341_v48 }
  0x40   :  { %v3565_v62 = vsel %vm3552_vm3, 0.0, %v3341_v48  ;;  %vm2729_vm12 = vcmask 25600  }
  0x41   :  { %2832 = vmatpush1.bf16.msra.mxu0 %v3494_v22 }
  0x42   :  { %2816 = vmatpush1.bf16.msra.mxu1 %v3494_v22  ;;  %2834 = vmatprep.subr.bf16.mxu0 %v3504_v25 }
  0x43   :  { %2818 = vmatprep.subr.bf16.mxu1 %v3504_v25 }
  0x45   :  { %2836 = vmatpush1.bf16.msra.mxu0 %v3509_v26 }
  0x46   :  { %2820 = vmatpush1.bf16.msra.mxu1 %v3509_v26  ;;  %2838 = vmatprep.subr.bf16.mxu0 %v3513_v27 }
  0x47   :  { %2822 = vmatprep.subr.bf16.mxu1 %v3513_v27 }
  0x49   :  { %2840 = vmatpush1.bf16.msra.mxu0 %v3523_v30 }
  0x4a   :  { %2824 = vmatpush1.bf16.msra.mxu1 %v3523_v30  ;;  %2858 = vmatprep.subr.bf16.mxu0 %v3457_v10 }
  0x4b   :  { %2842 = vmatprep.subr.bf16.mxu1 %v3457_v10 }
  0x4d   :  { %245 = vmatmul.mubr.f32.vlgmr.msra.gmra.mrb[4].mxu1 %v3340_v1 }
  0x4e   :  { %2844 = vmatpush1.bf16.msra.mxu1 %v3468_v14  ;;  %521 = vmatprep.mubr.f32.mxu1 %v3340_v1 }
  0x4f   :  { %2846 = vmatprep.subr.bf16.mxu1 %v3470_v15 }
  0x52   :  { %2848 = vmatpush1.bf16.msra.mxu1 %v3494_v22 }
  0x53   :  { %2850 = vmatprep.subr.bf16.mxu1 %v3504_v25 }
  0x56   :  { %2852 = vmatpush1.bf16.msra.mxu1 %v3509_v26 }
  0x57   :  { %2854 = vmatprep.subr.bf16.mxu1 %v3513_v27 }
  0x5a   :  { %2856 = vmatpush1.bf16.msra.mxu1 %v3523_v30 }
  0x5b   :  { %2874 = vmatprep.subr.bf16.mxu1 %v3457_v10 }
 0x110   :  { %v147_v38 = vpop.f32.mrb[0].mxu1 }
 0x111   :  { %v148_v39 = vadd.f32 %v147_v38, %v92_v36  ;;  %v149_v40 = vpop.f32.mrb[1].mxu1 }
 0x112   :  { %v150_v41 = vadd.f32 %v149_v40, %v96_v37  ;;  %v151_v42 = vpop.f32.mrb[2].mxu1 }
 0x113   :  { %156 = vst [vmem:[#allocation2] sm:$0xff] %v148_v39  ;;  %v152_v43 = vadd.f32 %v151_v42, %v92_v36  ;;  %v153_v44 = vpop.f32.mrb[3].mxu1 }
 0x114   :  { %157 = vst [vmem:[#allocation2 + $0x8] sm:$0xff] %v150_v41  ;;  %v154_v45 = vadd.f32 %v153_v44, %v96_v37 }
 0x115   :  { %158 = vst [vmem:[#allocation2 + $0x10] sm:$0xff] %v152_v43 }
 0x116   :  { %159 = vst [vmem:[#allocation2 + $0x18] sm:$0xff] %v154_v45 }
 0x11a   :  { %v251_v51 = vld [vmem:[#allocation2] sm:$0x3]  ;;  %v385_v38 = vld [vmem:[#allocation2] sm:$0xc] }
 0x11d   :  { %v253_v56 = vld [vmem:[#allocation2 + $0x18] sm:$0xc0]  ;;  %v390_v41 = vld [vmem:[#allocation2 + $0x18] sm:$0x30] }
 0x120   :  { %v246_v50 = vpop.f32.mrb[4].mxu1 }
 0x121   :  { %v252_v52 = vadd.f32 %v251_v51, %v246_v50  ;;  %v248_v53 = vpop.f32.mrb[5].mxu1 }
 0x122   :  { %v255_v54 = vrot.slane %v248_v53, 2 }
 0x123   :  { %v258_v55 = vmul.f32 %v252_v52, %v3558_v49 }
 0x124   :  { %v257_v57 = vadd.f32 %v255_v54, %v253_v56 }
 0x125   :  { %3110 = vtanh.f32 %v258_v55 }
 0x126   :  { %v262_v58 = vmul.f32 %v257_v57, %v3558_v49 }
 0x128   :  { %3112 = vtanh.f32 %v262_v58 }
 0x12f   :  { %v3111_v59 = vpop.eup %3110 }
 0x130   :  { %v260_v2 = vmul.f32 %v3111_v59, %v3558_v49 }
 0x132   :  { %v3113_v60 = vpop.eup %3112  ;;  %v261_v3 = vadd.f32 %v260_v2, %v3565_v62 }
 0x133   :  { %v264_v61 = vmul.f32 %v3113_v60, %v3558_v49 }
 0x134   :  { %v266_v12 = vmul.f32 0.0, %v261_v3 }
 0x135   :  { %v265_v63 = vadd.f32 %v264_v61, %v3565_v62 }
 0x137   :  { %279 = vrot.lane.b32.xlu0 %v265_v63, %s3342_s3  ;;  %v277_v8 = vmul.f32 0.0, %v265_v63 }
 0x13b   :  { %268 = vrot.lane.b32.xlu0 %v261_v3, %s3342_s3 }
 0x1a9   :  { %v280_v4 = vpop.permute.xlu0 %279 }
 0x1aa   :  { %v282_v5 = vmul.f32 %v280_v4, %v265_v63 }
 0x1ac   :  { %284 = vrot.lane.b32.xlu1 %v282_v5, %s3343_s17 }
 0x1ad   :  { %v269_v6 = vpop.permute.xlu0 %268 }
 0x1ae   :  { %v271_v7 = vmul.f32 %v269_v6, %v261_v3 }
 0x1b0   :  { %273 = vrot.lane.b32.xlu1 %v271_v7, %s3343_s17 }
 0x21e   :  { %v285_v9 = vpop.permute.xlu1 %284 }
 0x21f   :  { %v3574_v11 = vadd.f32 %v285_v9, %v277_v8 }
 0x221   :  { %3114 = vtanh.f32 %v3574_v11  ;;  %v418_v57 = vrot.slane %v3574_v11, 2 }
 0x222   :  { %v274_v13 = vpop.permute.xlu1 %273 }
 0x223   :  { %v276_v16 = vadd.f32 %v274_v13, %v266_v12 }
 0x225   :  { %3116 = vtanh.f32 %v276_v16  ;;  %v404_v56 = vrot.slane %v276_v16, 6 }
 0x22b   :  { %v3115_v17 = vpop.eup %3114 }
 0x22c   :  { %296 = vrot.lane.b32.xlu0 %v3115_v17, %s3342_s3 }
 0x22f   :  { %v3117_v18 = vpop.eup %3116 }
 0x230   :  { %290 = vrot.lane.b32.xlu1 %v3117_v18, %s3342_s3 }
 0x29e   :  { %v297_v19 = vpop.permute.xlu0 %296 }
 0x29f   :  { %v3579_v20 = vmul.f32 %v297_v19, %v265_v63 }
 0x2a1   :  { %v305_v21 = vrot.slane %v3579_v20, 6 }
 0x2a2   :  { %v291_v23 = vpop.permute.xlu1 %290 }
 0x2a3   :  { %v3582_v24 = vmul.f32 %v291_v23, %v261_v3  ;;  %306 = vrot.lane.b32.xlu1 %v305_v21, %s3342_s3  ;;  %v528_v21 = vld [vmem:[#allocation2] sm:$0x30] }
 0x2a5   :  { %301 = vrot.lane.b32.xlu0 %v3582_v24, %s3343_s17 }
 0x315   :  { %v307_v28 = vpop.permute.xlu1 %306 }
 0x317   :  { %v302_v29 = vpop.permute.xlu0 %301 }
 0x318   :  { %v310_v31 = vsel %vm309_vm4, %v302_v29, %v307_v28  ;;  %v533_v29 = vld [vmem:[#allocation2 + $0x18] sm:$0xc] }
 0x319   :  { %2750 = vmatmul.mubr.msk.f32.vlgmr.msra.gmra.mrb[0].mxu0 %vm176_vm5, %v310_v31 }
 0x31a   :  { %2860 = vmatpush1.bf16.msra.mxu0 %v3468_v14  ;;  %664 = vmatprep.mubr.f32.mxu0 %v3340_v1 }
 0x31b   :  { %2862 = vmatprep.subr.bf16.mxu0 %v3470_v15 }
 0x31e   :  { %2864 = vmatpush1.bf16.msra.mxu0 %v3494_v22 }
 0x31f   :  { %2866 = vmatprep.subr.bf16.mxu0 %v3504_v25 }
 0x322   :  { %2868 = vmatpush1.bf16.msra.mxu0 %v3509_v26 }
 0x323   :  { %2870 = vmatprep.subr.bf16.mxu0 %v3513_v27 }
 0x326   :  { %2872 = vmatpush1.bf16.msra.mxu0 %v3523_v30 }
 0x327   :  { %2890 = vmatprep.subr.bf16.mxu0 %v3457_v10 }
 0x3ec   :  { %v380_v34 = vpop.f32.mrb[0].mxu0 }
 0x3ed   :  { %v387_v36 = vrot.slane %v380_v34, 6  ;;  %v382_v37 = vpop.f32.mrb[1].mxu0 }
 0x3ee   :  { %v392_v39 = vrot.slane %v382_v37, 4 }
 0x3ef   :  { %v389_v40 = vadd.f32 %v387_v36, %v385_v38 }
 0x3f0   :  { %v394_v42 = vadd.f32 %v392_v39, %v390_v41 }
 0x3f1   :  { %v395_v43 = vmul.f32 %v389_v40, %v3558_v49 }
 0x3f2   :  { %v399_v44 = vmul.f32 %v394_v42, %v3558_v49 }
 0x3f3   :  { %3118 = vtanh.f32 %v395_v43 }
 0x3f4   :  { %3120 = vtanh.f32 %v399_v44 }
 0x3fd   :  { %v3119_v45 = vpop.eup %3118 }
 0x3fe   :  { %v3121_v46 = vpop.eup %3120  ;;  %v397_v47 = vmul.f32 %v3119_v45, %v3558_v49 }
 0x3ff   :  { %v401_v48 = vmul.f32 %v3121_v46, %v3558_v49 }
 0x400   :  { %v398_v50 = vadd.f32 %v397_v47, %v3565_v62 }
 0x401   :  { %v402_v51 = vadd.f32 %v401_v48, %v3565_v62 }
 0x402   :  { %408 = vrot.lane.b32.xlu1 %v398_v50, %s3342_s3  ;;  %v406_v58 = vmul.f32 %v404_v56, %v398_v50 }
 0x403   :  { %422 = vrot.lane.b32.xlu0 %v402_v51, %s3342_s3  ;;  %v420_v60 = vmul.f32 %v418_v57, %v402_v51 }
 0x474   :  { %v409_v52 = vpop.permute.xlu1 %408 }
 0x475   :  { %v411_v53 = vmul.f32 %v409_v52, %v398_v50  ;;  %v423_v54 = vpop.permute.xlu0 %422 }
 0x476   :  { %v425_v55 = vmul.f32 %v423_v54, %v402_v51 }
 0x477   :  { %413 = vrot.lane.b32.xlu1 %v411_v53, %s3343_s17 }
 0x478   :  { %427 = vrot.lane.b32.xlu0 %v425_v55, %s3343_s17 }
 0x4e9   :  { %v414_v59 = vpop.permute.xlu1 %413 }
 0x4ea   :  { %v416_v61 = vadd.f32 %v414_v59, %v406_v58  ;;  %v428_v63 = vpop.permute.xlu0 %427 }
 0x4eb   :  { %v430_v2 = vadd.f32 %v428_v63, %v420_v60 }
 0x4ec   :  { %3122 = vtanh.f32 %v416_v61  ;;  %v547_v47 = vrot.slane %v416_v61, 6 }
 0x4ed   :  { %3124 = vtanh.f32 %v430_v2  ;;  %v561_v48 = vrot.slane %v430_v2, 2 }
 0x4f6   :  { %v3123_v3 = vpop.eup %3122 }
 0x4f7   :  { %v3125_v4 = vpop.eup %3124  ;;  %433 = vrot.lane.b32.xlu1 %v3123_v3, %s3342_s3 }
 0x4f8   :  { %439 = vrot.lane.b32.xlu0 %v3125_v4, %s3342_s3 }
 0x569   :  { %v434_v5 = vpop.permute.xlu1 %433 }
 0x56a   :  { %v3611_v6 = vmul.f32 %v434_v5, %v398_v50  ;;  %v440_v7 = vpop.permute.xlu0 %439 }
 0x56b   :  { %v3613_v8 = vmul.f32 %v440_v7, %v402_v51 }
 0x56c   :  { %444 = vrot.lane.b32.xlu0 %v3611_v6, %s3343_s17  ;;  %v1292_v63 = vsel %vm1291_vm6, %v3582_v24, %v3611_v6 }
 0x56d   :  { %v448_v9 = vrot.slane %v3613_v8, 2 }
 0x56f   :  { %449 = vrot.lane.b32.xlu1 %v448_v9, %s3342_s3 }
 0x5de   :  { %v445_v11 = vpop.permute.xlu0 %444 }
 0x5e1   :  { %v450_v12 = vpop.permute.xlu1 %449 }
 0x5e2   :  { %v452_v13 = vsel %vm309_vm4, %v445_v11, %v450_v12  ;;  %v676_v12 = vld [vmem:[#allocation2 + $0x18] sm:$0x3] }
 0x5e3   :  { %v454_v16 = vrot.slane %v452_v13, 2  ;;  %v671_v13 = vld [vmem:[#allocation2] sm:$0xc0] }
 0x5e5   :  { %2751 = vmatmul.mubr.msk.f32.vlgmr.msra.gmra.mrb[6].mxu1 %vm176_vm5, %v454_v16 }
 0x5e6   :  { %2876 = vmatpush1.bf16.msra.mxu1 %v3468_v14  ;;  %804 = vmatprep.mubr.f32.mxu1 %v3340_v1 }
 0x5e7   :  { %2878 = vmatprep.subr.bf16.mxu1 %v3470_v15 }
 0x5ea   :  { %2880 = vmatpush1.bf16.msra.mxu1 %v3494_v22 }
 0x5eb   :  { %2882 = vmatprep.subr.bf16.mxu1 %v3504_v25 }
 0x5ee   :  { %2884 = vmatpush1.bf16.msra.mxu1 %v3509_v26 }
 0x5ef   :  { %2886 = vmatprep.subr.bf16.mxu1 %v3513_v27 }
 0x5f2   :  { %2888 = vmatpush1.bf16.msra.mxu1 %v3523_v30 }
 0x5f3   :  { %2906 = vmatprep.subr.bf16.mxu1 %v3457_v10 }
 0x6b8   :  { %v523_v17 = vpop.f32.mrb[6].mxu1 }
 0x6b9   :  { %v530_v18 = vrot.slane %v523_v17, 4  ;;  %v525_v19 = vpop.f32.mrb[7].mxu1 }
 0x6ba   :  { %v535_v23 = vrot.slane %v525_v19, 6 }
 0x6bb   :  { %v532_v28 = vadd.f32 %v530_v18, %v528_v21 }
 0x6bc   :  { %v537_v31 = vadd.f32 %v535_v23, %v533_v29 }
 0x6bd   :  { %v538_v34 = vmul.f32 %v532_v28, %v3558_v49 }
 0x6be   :  { %v542_v36 = vmul.f32 %v537_v31, %v3558_v49 }
 0x6bf   :  { %3126 = vtanh.f32 %v538_v34 }
 0x6c0   :  { %3128 = vtanh.f32 %v542_v36 }
 0x6c9   :  { %v3127_v37 = vpop.eup %3126 }
 0x6ca   :  { %v3129_v38 = vpop.eup %3128  ;;  %v540_v39 = vmul.f32 %v3127_v37, %v3558_v49 }
 0x6cb   :  { %v544_v40 = vmul.f32 %v3129_v38, %v3558_v49 }
 0x6cc   :  { %v541_v41 = vadd.f32 %v540_v39, %v3565_v62 }
 0x6cd   :  { %v545_v42 = vadd.f32 %v544_v40, %v3565_v62 }
 0x6ce   :  { %551 = vrot.lane.b32.xlu1 %v541_v41, %s3342_s3  ;;  %v549_v50 = vmul.f32 %v547_v47, %v541_v41 }
 0x6cf   :  { %565 = vrot.lane.b32.xlu0 %v545_v42, %s3342_s3  ;;  %v563_v52 = vmul.f32 %v561_v48, %v545_v42 }
 0x740   :  { %v552_v43 = vpop.permute.xlu1 %551 }
 0x741   :  { %v554_v44 = vmul.f32 %v552_v43, %v541_v41  ;;  %v566_v45 = vpop.permute.xlu0 %565 }
 0x742   :  { %v568_v46 = vmul.f32 %v566_v45, %v545_v42 }
 0x743   :  { %556 = vrot.lane.b32.xlu1 %v554_v44, %s3343_s17 }
 0x744   :  { %570 = vrot.lane.b32.xlu0 %v568_v46, %s3343_s17 }
 0x7b5   :  { %v557_v51 = vpop.permute.xlu1 %556 }
 0x7b6   :  { %v3640_v53 = vadd.f32 %v557_v51, %v549_v50  ;;  %v571_v54 = vpop.permute.xlu0 %570 }
 0x7b7   :  { %v573_v55 = vadd.f32 %v571_v54, %v563_v52 }
 0x7b8   :  { %3130 = vtanh.f32 %v3640_v53  ;;  %v687_v40 = vrot.slane %v3640_v53, 6 }
 0x7b9   :  { %3132 = vtanh.f32 %v573_v55  ;;  %v701_v39 = vrot.slane %v573_v55, 2 }
 0x7c2   :  { %v3131_v56 = vpop.eup %3130 }
 0x7c3   :  { %v3133_v57 = vpop.eup %3132  ;;  %576 = vrot.lane.b32.xlu1 %v3131_v56, %s3342_s3 }
 0x7c4   :  { %582 = vrot.lane.b32.xlu0 %v3133_v57, %s3342_s3 }
 0x835   :  { %v577_v58 = vpop.permute.xlu1 %576 }
 0x836   :  { %v579_v59 = vmul.f32 %v577_v58, %v541_v41  ;;  %v583_v60 = vpop.permute.xlu0 %582 }
 0x837   :  { %v3645_v61 = vmul.f32 %v583_v60, %v545_v42 }
 0x838   :  { %587 = vrot.lane.b32.xlu0 %v579_v59, %s3343_s17  ;;  %v3652_v2 = vsel %vm1293_vm7, %v1292_v63, %v579_v59  ;;  %v811_v63 = vld [vmem:[#allocation2 + $0x10] sm:$0x3] }
 0x839   :  { %v591_v3 = vrot.slane %v3645_v61, 6 }
 0x83b   :  { %592 = vrot.lane.b32.xlu1 %v591_v3, %s3342_s3 }
 0x8aa   :  { %v588_v4 = vpop.permute.xlu0 %587 }
 0x8ad   :  { %v593_v5 = vpop.permute.xlu1 %592 }
 0x8ae   :  { %v595_v7 = vsel %vm309_vm4, %v588_v4, %v593_v5 }
 0x8af   :  { %v597_v9 = vrot.slane %v595_v7, 4  ;;  %v813_v7 = vld [vmem:[#allocation2 + $0x8] sm:$0xc0] }
 0x8b1   :  { %2752 = vmatmul.mubr.msk.f32.vlgmr.msra.gmra.mrb[2].mxu0 %vm176_vm5, %v597_v9 }
 0x8b2   :  { %2892 = vmatpush1.bf16.msra.mxu0 %v3468_v14  ;;  %943 = vmatprep.mubr.f32.mxu0 %v3340_v1 }
 0x8b3   :  { %2894 = vmatprep.subr.bf16.mxu0 %v3470_v15 }
 0x8b6   :  { %2896 = vmatpush1.bf16.msra.mxu0 %v3494_v22 }
 0x8b7   :  { %2898 = vmatprep.subr.bf16.mxu0 %v3504_v25 }
 0x8ba   :  { %2900 = vmatpush1.bf16.msra.mxu0 %v3509_v26 }
 0x8bb   :  { %2902 = vmatprep.subr.bf16.mxu0 %v3513_v27 }
 0x8be   :  { %2904 = vmatpush1.bf16.msra.mxu0 %v3523_v30 }
 0x8bf   :  { %2922 = vmatprep.subr.bf16.mxu0 %v3457_v10 }
 0x984   :  { %v666_v24 = vpop.f32.mrb[2].mxu0 }
 0x985   :  { %v673_v6 = vrot.slane %v666_v24, 2  ;;  %v668_v11 = vpop.f32.mrb[3].mxu0 }
 0x986   :  { %v677_v16 = vadd.f32 %v676_v12, %v668_v11 }
 0x987   :  { %v675_v17 = vadd.f32 %v673_v6, %v671_v13 }
 0x988   :  { %v682_v18 = vmul.f32 %v677_v16, %v3558_v49 }
 0x989   :  { %v678_v19 = vmul.f32 %v675_v17, %v3558_v49 }
 0x98a   :  { %3134 = vtanh.f32 %v682_v18 }
 0x98b   :  { %3136 = vtanh.f32 %v678_v19 }
 0x994   :  { %v3135_v21 = vpop.eup %3134 }
 0x995   :  { %v3137_v23 = vpop.eup %3136  ;;  %v684_v28 = vmul.f32 %v3135_v21, %v3558_v49 }
 0x996   :  { %v680_v29 = vmul.f32 %v3137_v23, %v3558_v49 }
 0x997   :  { %v685_v10 = vadd.f32 %v684_v28, %v3565_v62 }
 0x998   :  { %v681_v31 = vadd.f32 %v680_v29, %v3565_v62 }
 0x999   :  { %705 = vrot.lane.b32.xlu0 %v685_v10, %s3342_s3  ;;  %v703_v41 = vmul.f32 %v701_v39, %v685_v10 }
 0x99a   :  { %691 = vrot.lane.b32.xlu1 %v681_v31, %s3342_s3  ;;  %v689_v43 = vmul.f32 %v687_v40, %v681_v31 }
 0xa0b   :  { %v706_v34 = vpop.permute.xlu0 %705 }
 0xa0c   :  { %v708_v36 = vmul.f32 %v706_v34, %v685_v10  ;;  %v692_v37 = vpop.permute.xlu1 %691 }
 0xa0d   :  { %v694_v38 = vmul.f32 %v692_v37, %v681_v31 }
 0xa0e   :  { %710 = vrot.lane.b32.xlu0 %v708_v36, %s3343_s17 }
 0xa0f   :  { %696 = vrot.lane.b32.xlu1 %v694_v38, %s3343_s17 }
 0xa80   :  { %v711_v42 = vpop.permute.xlu0 %710 }
 0xa81   :  { %v713_v44 = vadd.f32 %v711_v42, %v703_v41  ;;  %v697_v45 = vpop.permute.xlu1 %696 }
 0xa82   :  { %v699_v46 = vadd.f32 %v697_v45, %v689_v43 }
 0xa83   :  { %3138 = vtanh.f32 %v713_v44 }
 0xa84   :  { %3140 = vtanh.f32 %v699_v46  ;;  %v827_v28 = vrot.slane %v699_v46, 6 }
 0xa8d   :  { %v3139_v47 = vpop.eup %3138 }
 0xa8e   :  { %v3141_v48 = vpop.eup %3140  ;;  %722 = vrot.lane.b32.xlu0 %v3139_v47, %s3342_s3 }
 0xa8f   :  { %716 = vrot.lane.b32.xlu1 %v3141_v48, %s3342_s3 }
 0xb00   :  { %v723_v50 = vpop.permute.xlu0 %722 }
 0xb01   :  { %v3680_v51 = vmul.f32 %v723_v50, %v685_v10  ;;  %v717_v52 = vpop.permute.xlu1 %716  ;;  %v841_v10 = vrot.slane %v713_v44, 2 }
 0xb02   :  { %v719_v53 = vmul.f32 %v717_v52, %v681_v31 }
 0xb03   :  { %v731_v54 = vrot.slane %v3680_v51, 2 }
 0xb04   :  { %727 = vrot.lane.b32.xlu0 %v719_v53, %s3343_s17  ;;  %v3686_v55 = vsel %vm1295_vm8, %v3652_v2, %v719_v53 }
 0xb05   :  { %732 = vrot.lane.b32.xlu1 %v731_v54, %s3342_s3  ;;  %v950_v54 = vld [vmem:[#allocation2 + $0x10] sm:$0xc] }
 0xb76   :  { %v728_v56 = vpop.permute.xlu0 %727 }
 0xb77   :  { %v733_v57 = vpop.permute.xlu1 %732 }
 0xb78   :  { %v735_v58 = vsel %vm309_vm4, %v728_v56, %v733_v57  ;;  %v955_v57 = vld [vmem:[#allocation2 + $0x8] sm:$0x30] }
 0xb79   :  { %v737_v59 = vrot.slane %v735_v58, 6 }
 0xb7b   :  { %2753 = vmatmul.mubr.msk.f32.vlgmr.msra.gmra.mrb[8].mxu1 %vm176_vm5, %v737_v59 }
 0xb7c   :  { %2908 = vmatpush1.bf16.msra.mxu1 %v3468_v14  ;;  %1086 = vmatprep.mubr.f32.mxu1 %v3340_v1 }
 0xb7d   :  { %2910 = vmatprep.subr.bf16.mxu1 %v3470_v15 }
 0xb80   :  { %2912 = vmatpush1.bf16.msra.mxu1 %v3494_v22 }
 0xb81   :  { %2914 = vmatprep.subr.bf16.mxu1 %v3504_v25 }
 0xb84   :  { %2916 = vmatpush1.bf16.msra.mxu1 %v3509_v26 }
 0xb85   :  { %2918 = vmatprep.subr.bf16.mxu1 %v3513_v27 }
 0xb88   :  { %2920 = vmatpush1.bf16.msra.mxu1 %v3523_v30 }
 0xc4e   :  { %v806_v60 = vpop.f32.mrb[8].mxu1 }
 0xc4f   :  { %v812_v2 = vadd.f32 %v811_v63, %v806_v60  ;;  %v808_v3 = vpop.f32.mrb[9].mxu1 }
 0xc50   :  { %v815_v4 = vrot.slane %v808_v3, 2 }
 0xc51   :  { %v818_v5 = vmul.f32 %v812_v2, %v3558_v49 }
 0xc52   :  { %v817_v9 = vadd.f32 %v815_v4, %v813_v7 }
 0xc53   :  { %3142 = vtanh.f32 %v818_v5 }
 0xc54   :  { %v822_v24 = vmul.f32 %v817_v9, %v3558_v49 }
 0xc56   :  { %3144 = vtanh.f32 %v822_v24 }
 0xc5d   :  { %v3143_v6 = vpop.eup %3142 }
 0xc5e   :  { %v820_v11 = vmul.f32 %v3143_v6, %v3558_v49 }
 0xc60   :  { %v3145_v12 = vpop.eup %3144  ;;  %v821_v13 = vadd.f32 %v820_v11, %v3565_v62 }
 0xc61   :  { %v824_v16 = vmul.f32 %v3145_v12, %v3558_v49 }
 0xc62   :  { %831 = vrot.lane.b32.xlu1 %v821_v13, %s3342_s3  ;;  %v829_v29 = vmul.f32 %v827_v28, %v821_v13 }
 0xc63   :  { %v825_v17 = vadd.f32 %v824_v16, %v3565_v62 }
 0xc65   :  { %845 = vrot.lane.b32.xlu0 %v825_v17, %s3342_s3  ;;  %v843_v36 = vmul.f32 %v841_v10, %v825_v17 }
 0xcd4   :  { %v832_v18 = vpop.permute.xlu1 %831 }
 0xcd5   :  { %v834_v19 = vmul.f32 %v832_v18, %v821_v13 }
 0xcd7   :  { %836 = vrot.lane.b32.xlu1 %v834_v19, %s3343_s17  ;;  %v846_v21 = vpop.permute.xlu0 %845 }
 0xcd8   :  { %v848_v23 = vmul.f32 %v846_v21, %v825_v17 }
 0xcda   :  { %850 = vrot.lane.b32.xlu0 %v848_v23, %s3343_s17 }
 0xd49   :  { %v837_v31 = vpop.permute.xlu1 %836 }
 0xd4a   :  { %v839_v34 = vadd.f32 %v837_v31, %v829_v29 }
 0xd4c   :  { %3146 = vtanh.f32 %v839_v34  ;;  %v851_v37 = vpop.permute.xlu0 %850  ;;  %v969_v5 = vrot.slane %v839_v34, 6 }
 0xd4d   :  { %v853_v38 = vadd.f32 %v851_v37, %v843_v36 }
 0xd4f   :  { %3148 = vtanh.f32 %v853_v38  ;;  %v983_v7 = vrot.slane %v853_v38, 2 }
 0xd56   :  { %v3147_v39 = vpop.eup %3146 }
 0xd57   :  { %856 = vrot.lane.b32.xlu1 %v3147_v39, %s3342_s3  ;;  %v1093_v39 = vld [vmem:[#allocation2 + $0x10] sm:$0x30] }
 0xd59   :  { %v3149_v40 = vpop.eup %3148 }
 0xd5a   :  { %862 = vrot.lane.b32.xlu0 %v3149_v40, %s3342_s3 }
 0xdc9   :  { %v857_v41 = vpop.permute.xlu1 %856 }
 0xdca   :  { %v3711_v42 = vmul.f32 %v857_v41, %v821_v13 }
 0xdcc   :  { %867 = vrot.lane.b32.xlu0 %v3711_v42, %s3343_s17  ;;  %v863_v43 = vpop.permute.xlu0 %862 }
 0xdcd   :  { %v3715_v44 = vmul.f32 %v863_v43, %v825_v17  ;;  %v1098_v43 = vld [vmem:[#allocation2 + $0x8] sm:$0xc] }
 0xdcf   :  { %v871_v45 = vrot.slane %v3715_v44, 6 }
 0xdd1   :  { %872 = vrot.lane.b32.xlu1 %v871_v45, %s3342_s3 }
 0xe3e   :  { %v868_v46 = vpop.permute.xlu0 %867 }
 0xe43   :  { %v873_v47 = vpop.permute.xlu1 %872 }
 0xe44   :  { %v875_v48 = vsel %vm309_vm4, %v868_v46, %v873_v47 }
 0xe45   :  { %2754 = vmatmul.mubr.msk.f32.vlgmr.msra.gmra.mrb[4].mxu0 %vm176_vm5, %v875_v48 }
 0xe46   :  { %2924 = vmatpush1.bf16.msra.mxu0 %v3468_v14  ;;  %1229 = vmatprep.mubr.f32.mxu0 %v3340_v1 }
 0xe47   :  { %2926 = vmatprep.subr.bf16.mxu0 %v3470_v15 }
 0xe4a   :  { %2928 = vmatpush1.bf16.msra.mxu0 %v3494_v22 }
 0xe4b   :  { %2930 = vmatprep.subr.bf16.mxu0 %v3504_v25 }
 0xe4e   :  { %2932 = vmatpush1.bf16.msra.mxu0 %v3509_v26 }
 0xe4f   :  { %2934 = vmatprep.subr.bf16.mxu0 %v3513_v27 }
 0xe52   :  { %2936 = vmatpush1.bf16.msra.mxu0 %v3523_v30 }
 0xf18   :  { %v945_v50 = vpop.f32.mrb[4].mxu0 }
 0xf19   :  { %v952_v52 = vrot.slane %v945_v50, 6  ;;  %v947_v53 = vpop.f32.mrb[5].mxu0 }
 0xf1a   :  { %v957_v56 = vrot.slane %v947_v53, 4 }
 0xf1b   :  { %v954_v14 = vadd.f32 %v952_v52, %v950_v54 }
 0xf1c   :  { %v959_v58 = vadd.f32 %v957_v56, %v955_v57 }
 0xf1d   :  { %v960_v15 = vmul.f32 %v954_v14, %v3558_v49 }
 0xf1e   :  { %v964_v22 = vmul.f32 %v959_v58, %v3558_v49 }
 0xf1f   :  { %3150 = vtanh.f32 %v960_v15 }
 0xf20   :  { %3152 = vtanh.f32 %v964_v22 }
 0xf29   :  { %v3151_v25 = vpop.eup %3150 }
 0xf2a   :  { %v3153_v26 = vpop.eup %3152  ;;  %v962_v27 = vmul.f32 %v3151_v25, %v3558_v49 }
 0xf2b   :  { %v966_v30 = vmul.f32 %v3153_v26, %v3558_v49 }
 0xf2c   :  { %v963_v59 = vadd.f32 %v962_v27, %v3565_v62 }
 0xf2d   :  { %v967_v60 = vadd.f32 %v966_v30, %v3565_v62 }
 0xf2e   :  { %973 = vrot.lane.b32.xlu1 %v963_v59, %s3342_s3  ;;  %v971_v9 = vmul.f32 %v969_v5, %v963_v59 }
 0xf2f   :  { %987 = vrot.lane.b32.xlu0 %v967_v60, %s3342_s3  ;;  %v985_v6 = vmul.f32 %v983_v7, %v967_v60 }
 0xfa0   :  { %v974_v63 = vpop.permute.xlu1 %973 }
 0xfa1   :  { %v976_v2 = vmul.f32 %v974_v63, %v963_v59  ;;  %v988_v3 = vpop.permute.xlu0 %987 }
 0xfa2   :  { %v990_v4 = vmul.f32 %v988_v3, %v967_v60 }
 0xfa3   :  { %978 = vrot.lane.b32.xlu1 %v976_v2, %s3343_s17 }
 0xfa4   :  { %992 = vrot.lane.b32.xlu0 %v990_v4, %s3343_s17 }
0x1015   :  { %v979_v24 = vpop.permute.xlu1 %978 }
0x1016   :  { %v981_v11 = vadd.f32 %v979_v24, %v971_v9  ;;  %v993_v12 = vpop.permute.xlu0 %992 }
0x1017   :  { %v995_v13 = vadd.f32 %v993_v12, %v985_v6 }
0x1018   :  { %3154 = vtanh.f32 %v981_v11  ;;  %v1112_v15 = vrot.slane %v981_v11, 6 }
0x1019   :  { %3156 = vtanh.f32 %v995_v13  ;;  %v1126_v22 = vrot.slane %v995_v13, 2 }
0x1022   :  { %v3155_v16 = vpop.eup %3154 }
0x1023   :  { %v3157_v17 = vpop.eup %3156  ;;  %998 = vrot.lane.b32.xlu1 %v3155_v16, %s3342_s3 }
0x1024   :  { %1004 = vrot.lane.b32.xlu0 %v3157_v17, %s3342_s3 }
0x1095   :  { %v999_v18 = vpop.permute.xlu1 %998 }
0x1096   :  { %v1001_v19 = vmul.f32 %v999_v18, %v963_v59  ;;  %v1005_v21 = vpop.permute.xlu0 %1004 }
0x1097   :  { %v3741_v23 = vmul.f32 %v1005_v21, %v967_v60  ;;  %v1236_v21 = vld [vmem:[#allocation2 + $0x10] sm:$0xc0] }
0x1098   :  { %1009 = vrot.lane.b32.xlu0 %v1001_v19, %s3343_s17  ;;  %v1297_v7 = vsel %vm1291_vm6, %v3711_v42, %v1001_v19  ;;  %v1241_v19 = vld [vmem:[#allocation2 + $0x8] sm:$0x3] }
0x1099   :  { %v1013_v28 = vrot.slane %v3741_v23, 2 }
0x109b   :  { %1014 = vrot.lane.b32.xlu1 %v1013_v28, %s3342_s3 }
0x110a   :  { %v1010_v29 = vpop.permute.xlu0 %1009 }
0x110d   :  { %v1015_v10 = vpop.permute.xlu1 %1014 }
0x110e   :  { %v1017_v31 = vsel %vm309_vm4, %v1010_v29, %v1015_v10 }
0x110f   :  { %v1019_v34 = vrot.slane %v1017_v31, 2 }
0x1111   :  { %2755 = vmatmul.mubr.msk.f32.vlgmr.msra.gmra.mrb[10].mxu1 %vm176_vm5, %v1019_v34 }
0x1112   :  { %1425 = vmatprep.mubr.bf16.mxu1 %v3339_v0 }
0x11e4   :  { %v1088_v36 = vpop.f32.mrb[10].mxu1 }
0x11e5   :  { %v1095_v37 = vrot.slane %v1088_v36, 4  ;;  %v1090_v38 = vpop.f32.mrb[11].mxu1 }
0x11e6   :  { %v1100_v40 = vrot.slane %v1090_v38, 6 }
0x11e7   :  { %v1097_v41 = vadd.f32 %v1095_v37, %v1093_v39 }
0x11e8   :  { %v1102_v45 = vadd.f32 %v1100_v40, %v1098_v43 }
0x11e9   :  { %v1103_v46 = vmul.f32 %v1097_v41, %v3558_v49 }
0x11ea   :  { %v1107_v47 = vmul.f32 %v1102_v45, %v3558_v49 }
0x11eb   :  { %3158 = vtanh.f32 %v1103_v46 }
0x11ec   :  { %3160 = vtanh.f32 %v1107_v47 }
0x11f5   :  { %v3159_v48 = vpop.eup %3158 }
0x11f6   :  { %v3161_v50 = vpop.eup %3160  ;;  %v1105_v52 = vmul.f32 %v3159_v48, %v3558_v49 }
0x11f7   :  { %v1109_v0 = vmul.f32 %v3161_v50, %v3558_v49 }
0x11f8   :  { %v1106_v53 = vadd.f32 %v1105_v52, %v3565_v62 }
0x11f9   :  { %v1110_v54 = vadd.f32 %v1109_v0, %v3565_v62 }
0x11fa   :  { %1116 = vrot.lane.b32.xlu1 %v1106_v53, %s3342_s3  ;;  %v1114_v25 = vmul.f32 %v1112_v15, %v1106_v53 }
0x11fb   :  { %1130 = vrot.lane.b32.xlu0 %v1110_v54, %s3342_s3  ;;  %v1128_v27 = vmul.f32 %v1126_v22, %v1110_v54  ;;  %v3101_v22 = vld [vmem:[#allocation7 + $0x10] ss:$8 sps:$4 sm:$0xff]  }
0x126c   :  { %v1117_v56 = vpop.permute.xlu1 %1116 }
0x126d   :  { %v1119_v14 = vmul.f32 %v1117_v56, %v1106_v53  ;;  %v1131_v57 = vpop.permute.xlu0 %1130 }
0x126e   :  { %v1133_v58 = vmul.f32 %v1131_v57, %v1110_v54  ;;  %v3100_v57 = vld [vmem:[#allocation7 + $0x4] ss:$8 sps:$4 sm:$0xff]  }
0x126f   :  { %1121 = vrot.lane.b32.xlu1 %v1119_v14, %s3343_s17  ;;  %v3098_v14 = vld [vmem:[#allocation7] ss:$8 sps:$4 sm:$0xff]   ;;  %1393 = vmatprep.subr.bf16.mxu1 %v3100_v57 }
0x1270   :  { %1135 = vrot.lane.b32.xlu0 %v1133_v58, %s3343_s17  ;;  %1394 = vmatpush1.bf16.msra.mxu1 %v3098_v14 }
0x12e1   :  { %v1122_v26 = vpop.permute.xlu1 %1121 }
0x12e2   :  { %v1124_v30 = vadd.f32 %v1122_v26, %v1114_v25  ;;  %v1136_v59 = vpop.permute.xlu0 %1135  ;;  %v3103_v25 = vld [vmem:[#allocation7 + $0x14] ss:$8 sps:$4 sm:$0xff]   ;;  %v3104_v26 = vld [vmem:[#allocation7 + $0x20] ss:$8 sps:$4 sm:$0xff]  }
0x12e3   :  { %v1138_v60 = vadd.f32 %v1136_v59, %v1128_v27  ;;  %1395 = vmatprep.subr.bf16.mxu1 %v3103_v25  ;;  %v3106_v27 = vld [vmem:[#allocation7 + $0x24] ss:$8 sps:$4 sm:$0xff]   ;;  %v1443_v59 = vld [vmem:[#allocation9 + $0x18] sm:$0xff] }
0x12e4   :  { %3162 = vtanh.f32 %v1124_v30  ;;  %v1252_v48 = vrot.slane %v1124_v30, 6  ;;  %1396 = vmatpush1.bf16.msra.mxu1 %v3101_v22  ;;  %v1441_v30 = vld [vmem:[#allocation9 + $0x8] sm:$0xff] }
0x12e5   :  { %3164 = vtanh.f32 %v1138_v60  ;;  %v1266_v47 = vrot.slane %v1138_v60, 2  ;;  %v1440_v60 = vld [vmem:[#allocation9] sm:$0xff]  ;;  %1397 = vmatprep.subr.bf16.mxu1 %v3106_v27 }
0x12e8   :  { %1398 = vmatpush1.bf16.msra.mxu1 %v3104_v26 }
0x12ee   :  { %v3163_v63 = vpop.eup %3162 }
0x12ef   :  { %v3165_v2 = vpop.eup %3164  ;;  %1141 = vrot.lane.b32.xlu1 %v3163_v63, %s3342_s3  ;;  %v1442_v63 = vld [vmem:[#allocation9 + $0x10] sm:$0xff] }
0x12f0   :  { %1147 = vrot.lane.b32.xlu0 %v3165_v2, %s3342_s3  ;;  %v3788_v2 = vpack.c.bf16 %v1443_v59, %v1441_v30 }
0x12f2   :  { %2938 = vmatprep.subr.bf16.mxu0 %v3788_v2 }
0x1361   :  { %v1142_v3 = vpop.permute.xlu1 %1141 }
0x1362   :  { %v1144_v4 = vmul.f32 %v1142_v3, %v1106_v53  ;;  %v1148_v5 = vpop.permute.xlu0 %1147  ;;  %v3790_v3 = vpack.c.bf16 %v1442_v63, %v1440_v60 }
0x1363   :  { %v3763_v9 = vmul.f32 %v1148_v5, %v1110_v54  ;;  %v1445_v5 = vld [vmem:[#allocation9 + $0x28] sm:$0xff] }
0x1364   :  { %1152 = vrot.lane.b32.xlu0 %v1144_v4, %s3343_s17  ;;  %v3767_v24 = vsel %vm1293_vm7, %v1297_v7, %v1144_v4  ;;  %v3109_v4 = vld [vmem:[#allocation7 + $0x34] ss:$8 sps:$4 sm:$0xff]  }
0x1365   :  { %v1156_v6 = vrot.slane %v3763_v9, 6  ;;  %v1447_v7 = vld [vmem:[#allocation9 + $0x38] sm:$0xff]  ;;  %1399 = vmatprep.subr.bf16.mxu1 %v3109_v4 }
0x1367   :  { %1157 = vrot.lane.b32.xlu1 %v1156_v6, %s3342_s3  ;;  %v1444_v6 = vld [vmem:[#allocation9 + $0x20] sm:$0xff] }
0x13d6   :  { %v1153_v11 = vpop.permute.xlu0 %1152 }
0x13d9   :  { %v1158_v12 = vpop.permute.xlu1 %1157 }
0x13da   :  { %v1160_v13 = vsel %vm309_vm4, %v1153_v11, %v1158_v12  ;;  %v3107_v12 = vld [vmem:[#allocation7 + $0x30] ss:$8 sps:$4 sm:$0xff]  }
0x13db   :  { %v1162_v16 = vrot.slane %v1160_v13, 4  ;;  %v3793_v13 = vpack.c.bf16 %v1447_v7, %v1445_v5  ;;  %1400 = vmatpush1.bf16.msra.mxu1 %v3107_v12 }
0x13dc   :  { %2954 = vmatprep.subr.bf16.mxu1 %v3788_v2 }
0x13dd   :  { %2756 = vmatmul.mubr.msk.f32.vlgmr.msra.gmra.mrb[6].mxu0 %vm176_vm5, %v1162_v16 }
0x13de   :  { %1520 = vmatprep.mubr.f32.mxu0 %v3340_v1  ;;  %2940 = vmatpush1.bf16.msra.mxu0 %v3790_v3 }
0x13df   :  { %2942 = vmatprep.subr.bf16.mxu0 %v3793_v13 }
0x14b0   :  { %v1231_v42 = vpop.f32.mrb[6].mxu0 }
0x14b1   :  { %v1238_v17 = vrot.slane %v1231_v42, 2  ;;  %v1233_v18 = vpop.f32.mrb[7].mxu0 }
0x14b2   :  { %v1242_v28 = vadd.f32 %v1241_v19, %v1233_v18  ;;  %v1303_v19 = vsel %vm1291_vm6, %v3680_v51, %v3645_v61 }
0x14b3   :  { %v1240_v29 = vadd.f32 %v1238_v17, %v1236_v21  ;;  %v1304_v51 = vsel %vm1293_vm7, %v1303_v19, %v3613_v8 }
0x14b4   :  { %v1247_v10 = vmul.f32 %v1242_v28, %v3558_v49 }
0x14b5   :  { %v1243_v31 = vmul.f32 %v1240_v29, %v3558_v49 }
0x14b6   :  { %3166 = vtanh.f32 %v1247_v10 }
0x14b7   :  { %3168 = vtanh.f32 %v1243_v31  ;;  %v1448_v31 = vld [vmem:[#allocation9 + $0x40] sm:$0xff] }
0x14c0   :  { %v3167_v34 = vpop.eup %3166 }
0x14c1   :  { %v3169_v36 = vpop.eup %3168  ;;  %v1249_v37 = vmul.f32 %v3167_v34, %v3558_v49  ;;  %v1450_v34 = vld [vmem:[#allocation9 + $0x50] sm:$0xff] }
0x14c2   :  { %v1245_v38 = vmul.f32 %v3169_v36, %v3558_v49  ;;  %v1453_v36 = vld [vmem:[#allocation9 + $0x68] sm:$0xff] }
0x14c3   :  { %v1250_v39 = vadd.f32 %v1249_v37, %v3565_v62  ;;  %v1455_v37 = vld [vmem:[#allocation9 + $0x78] sm:$0xff] }
0x14c4   :  { %v1246_v40 = vadd.f32 %v1245_v38, %v3565_v62  ;;  %v3821_v38 = vpack.c.bf16 %v1450_v34, %v1448_v31  ;;  %v3823_v8 = vpack.c.bf16 %v1455_v37, %v1453_v36 }
0x14c5   :  { %1270 = vrot.lane.b32.xlu0 %v1250_v39, %s3342_s3  ;;  %v1268_v50 = vmul.f32 %v1266_v47, %v1250_v39 }
0x14c6   :  { %1256 = vrot.lane.b32.xlu1 %v1246_v40, %s3342_s3  ;;  %v1254_v0 = vmul.f32 %v1252_v48, %v1246_v40 }
0x1537   :  { %v1271_v41 = vpop.permute.xlu0 %1270 }
0x1538   :  { %v1273_v43 = vmul.f32 %v1271_v41, %v1250_v39  ;;  %v1257_v45 = vpop.permute.xlu1 %1256 }
0x1539   :  { %v1259_v46 = vmul.f32 %v1257_v45, %v1246_v40 }
0x153a   :  { %1275 = vrot.lane.b32.xlu0 %v1273_v43, %s3343_s17 }
0x153b   :  { %1261 = vrot.lane.b32.xlu1 %v1259_v46, %s3343_s17 }
0x15ac   :  { %v1276_v52 = vpop.permute.xlu0 %1275 }
0x15ad   :  { %v1278_v53 = vadd.f32 %v1276_v52, %v1268_v50  ;;  %v1262_v54 = vpop.permute.xlu1 %1261 }
0x15ae   :  { %v1264_v56 = vadd.f32 %v1262_v54, %v1254_v0  ;;  %v1335_v0 = vld [vmem:[%s4180_s6] sm:$0x3] }
0x15af   :  { %3170 = vtanh.f32 %v1278_v53  ;;  %v1343_v53 = vrot.slane %v1335_v0, %v91_v33  ;;  %v1347_v54 = vrot.slane %v1335_v0, %v95_v35 }
0x15b0   :  { %3172 = vtanh.f32 %v1264_v56 }
0x15b9   :  { %v3171_v58 = vpop.eup %3170 }
0x15ba   :  { %v3173_v15 = vpop.eup %3172  ;;  %1287 = vrot.lane.b32.xlu0 %v3171_v58, %s3342_s3 }
0x15bb   :  { %1281 = vrot.lane.b32.xlu1 %v3173_v15, %s3342_s3 }
0x15be   :  { %1308 = vrot.lane.b32.xlu0 %v3686_v55, %s3343_s17  ;;  %v1446_v55 = vld [vmem:[#allocation9 + $0x30] sm:$0xff] }
0x15bf   :  { %v3796_v17 = vpack.c.bf16 %v1446_v55, %v1444_v6 }
0x15c1   :  { %2944 = vmatpush1.bf16.msra.mxu0 %v3796_v17 }
0x162c   :  { %v1288_v11 = vpop.permute.xlu0 %1287 }
0x162d   :  { %v1290_v16 = vmul.f32 %v1288_v11, %v1250_v39  ;;  %v1282_v42 = vpop.permute.xlu1 %1281  ;;  %v1452_v39 = vld [vmem:[#allocation9 + $0x60] sm:$0xff] }
0x162e   :  { %v1284_v18 = vmul.f32 %v1282_v42, %v1246_v40  ;;  %v1454_v40 = vld [vmem:[#allocation9 + $0x70] sm:$0xff] }
0x162f   :  { %v1300_v21 = vsel %vm1291_vm6, %v1290_v16, %v3763_v9  ;;  %v1449_v9 = vld [vmem:[#allocation9 + $0x48] sm:$0xff]  ;;  %v3828_v41 = vpack.c.bf16 %v1454_v40, %v1452_v39 }
0x1630   :  { %v1309_v28 = vpop.permute.xlu0 %1308  ;;  %v1299_v29 = vsel %vm1295_vm8, %v3767_v24, %v1284_v18  ;;  %v1301_v10 = vsel %vm1293_vm7, %v1300_v21, %v3741_v23  ;;  %v1451_v24 = vld [vmem:[#allocation9 + $0x58] sm:$0xff] }
0x1631   :  { %1314 = vst.msk [vmem:[#allocation3] sm:$0xff] %vm309_vm4, %v1309_v28  ;;  %1310 = vrot.lane.b32.xlu1 %v1299_v29, %s3343_s17  ;;  %v1302_v61 = vsel %vm1295_vm8, %v1301_v10, %v3715_v44  ;;  %v3817_v23 = vpack.c.bf16 %v1451_v24, %v1449_v9  ;;  %v1305_v44 = vsel %vm1295_vm8, %v1304_v51, %v3579_v20 }
0x1632   :  { %1318 = vrot.lane.b32.xlu0 %v1302_v61, %s3342_s3 }
0x1633   :  { %2946 = vmatprep.subr.bf16.mxu0 %v3817_v23 }
0x1634   :  { %2948 = vmatpush1.bf16.msra.mxu0 %v3821_v38 }
0x1635   :  { %1320 = vrot.lane.b32.xlu1 %v1305_v44, %s3342_s3  ;;  %2950 = vmatprep.subr.bf16.mxu0 %v3823_v8 }
0x1638   :  { %2952 = vmatpush1.bf16.msra.mxu0 %v3828_v41 }
0x1639   :  { %2970 = vmatprep.subr.bf16.mxu0 %v3788_v2 }
0x163b   :  { %1521 = vmatmul.mubr.f32.vlgmr.msra.gmra.mrb[8].mxu0 %v3340_v1 }
0x163c   :  { %2972 = vmatpush1.bf16.msra.mxu0 %v3790_v3  ;;  %1808 = vmatprep.mubr.f32.mxu0 %v3340_v1 }
0x163d   :  { %2974 = vmatprep.subr.bf16.mxu0 %v3793_v13 }
0x1640   :  { %2976 = vmatpush1.bf16.msra.mxu0 %v3796_v17 }
0x1641   :  { %2978 = vmatprep.subr.bf16.mxu0 %v3817_v23 }
0x1644   :  { %2980 = vmatpush1.bf16.msra.mxu0 %v3821_v38 }
0x1645   :  { %2982 = vmatprep.subr.bf16.mxu0 %v3823_v8 }
0x1648   :  { %2984 = vmatpush1.bf16.msra.mxu0 %v3828_v41 }
0x1649   :  { %3002 = vmatprep.subr.bf16.mxu0 %v3788_v2 }
0x16a3   :  { %v1311_v20 = vpop.permute.xlu1 %1310 }
0x16a4   :  { %1315 = vst.msk [vmem:[#allocation3 + $0x8] sm:$0xff] %vm309_vm4, %v1311_v20  ;;  %v1319_v43 = vpop.permute.xlu0 %1318 }
0x16a5   :  { %1325 = vst.msk [vmem:[#allocation3] sm:$0xff] %vm1324_vm9, %v1319_v43 }
0x16a7   :  { %v1321_v45 = vpop.permute.xlu1 %1320 }
0x16a8   :  { %1326 = vst.msk [vmem:[#allocation3 + $0x8] sm:$0xff] %vm1324_vm9, %v1321_v45 }
0x16ac   :  { %v1336_v46 = vld [vmem:[#allocation3] sm:$0xff] }
0x16af   :  { %v1337_v47 = vld [vmem:[#allocation3 + $0x8] sm:$0xff] }
0x16b0   :  { %v1338_v48 = vpack.c.bf16 %v1337_v47, %v1336_v46 }
0x16b2   :  { %2765 = vmatmul.mubr.msk.bf16.vlgmr.msra.gmra.mrb[12].mxu1 %vm176_vm5, %v1338_v48 }
0x16b3   :  { %2956 = vmatpush1.bf16.msra.mxu1 %v3790_v3  ;;  %1657 = vmatprep.mubr.f32.mxu1 %v3340_v1 }
0x16b4   :  { %2958 = vmatprep.subr.bf16.mxu1 %v3793_v13 }
0x16b7   :  { %2960 = vmatpush1.bf16.msra.mxu1 %v3796_v17 }
0x16b8   :  { %2962 = vmatprep.subr.bf16.mxu1 %v3817_v23 }
0x16bb   :  { %2964 = vmatpush1.bf16.msra.mxu1 %v3821_v38 }
0x16bc   :  { %2966 = vmatprep.subr.bf16.mxu1 %v3823_v8 }
0x16bf   :  { %2968 = vmatpush1.bf16.msra.mxu1 %v3828_v41 }
0x16c0   :  { %2986 = vmatprep.subr.bf16.mxu1 %v3788_v2 }
0x170e   :  { %v1522_v50 = vpop.f32.mrb[8].mxu0 }
0x170f   :  { %v1524_v52 = vpop.f32.mrb[9].mxu0 }
0x1710   :  { %v1531_v30 = vrot.slane %v1524_v52, 2 }
0x1785   :  { %v1427_v56 = vpop.f32.mrb[12].mxu1 }
0x1786   :  { %v1428_v14 = vadd.f32 %v1427_v56, %v1343_v53  ;;  %v1429_v57 = vpop.f32.mrb[13].mxu1 }
0x1787   :  { %v1430_v58 = vadd.f32 %v1429_v57, %v1347_v54  ;;  %v1431_v15 = vpop.f32.mrb[14].mxu1 }
0x1788   :  { %1436 = vst [vmem:[#allocation2] sm:$0xff] %v1428_v14  ;;  %v1432_v22 = vadd.f32 %v1431_v15, %v1343_v53  ;;  %v1433_v25 = vpop.f32.mrb[15].mxu1 }
0x1789   :  { %1437 = vst [vmem:[#allocation2 + $0x8] sm:$0xff] %v1430_v58  ;;  %v1434_v26 = vadd.f32 %v1433_v25, %v1347_v54 }
0x178a   :  { %1438 = vst [vmem:[#allocation2 + $0x10] sm:$0xff] %v1432_v22 }
0x178b   :  { %1439 = vst [vmem:[#allocation2 + $0x18] sm:$0xff] %v1434_v26 }
0x178f   :  { %v1527_v27 = vld [vmem:[#allocation2] sm:$0x3]  ;;  %v1664_v45 = vld [vmem:[#allocation2] sm:$0xc] }
0x1790   :  { %v1528_v59 = vadd.f32 %v1527_v27, %v1522_v50 }
0x1792   :  { %v1534_v33 = vmul.f32 %v1528_v59, %v3558_v49  ;;  %v1529_v60 = vld [vmem:[#allocation2 + $0x18] sm:$0xc0]  ;;  %v1669_v48 = vld [vmem:[#allocation2 + $0x18] sm:$0x30] }
0x1793   :  { %v1533_v32 = vadd.f32 %v1531_v30, %v1529_v60 }
0x1794   :  { %3174 = vtanh.f32 %v1534_v33 }
0x1795   :  { %v1538_v35 = vmul.f32 %v1533_v32, %v3558_v49 }
0x1797   :  { %3176 = vtanh.f32 %v1538_v35 }
0x179e   :  { %v3175_v63 = vpop.eup %3174 }
0x179f   :  { %v1536_v4 = vmul.f32 %v3175_v63, %v3558_v49 }
0x17a1   :  { %v3177_v5 = vpop.eup %3176  ;;  %v1537_v7 = vadd.f32 %v1536_v4, %v3565_v62 }
0x17a2   :  { %v1540_v6 = vmul.f32 %v3177_v5, %v3558_v49 }
0x17a3   :  { %1544 = vrot.lane.b32.xlu1 %v1537_v7, %s3342_s3  ;;  %v1542_v18 = vmul.f32 0.0, %v1537_v7 }
0x17a4   :  { %v1541_v55 = vadd.f32 %v1540_v6, %v3565_v62 }
0x17a6   :  { %1555 = vrot.lane.b32.xlu0 %v1541_v55, %s3342_s3  ;;  %v1553_v28 = vmul.f32 0.0, %v1541_v55 }
0x1815   :  { %v1545_v11 = vpop.permute.xlu1 %1544 }
0x1816   :  { %v1547_v12 = vmul.f32 %v1545_v11, %v1537_v7 }
0x1818   :  { %v1556_v16 = vpop.permute.xlu0 %1555  ;;  %1549 = vrot.lane.b32.xlu1 %v1547_v12, %s3343_s17 }
0x1819   :  { %v1558_v42 = vmul.f32 %v1556_v16, %v1541_v55 }
0x181b   :  { %1560 = vrot.lane.b32.xlu0 %v1558_v42, %s3343_s17 }
0x188a   :  { %v1550_v19 = vpop.permute.xlu1 %1549 }
0x188b   :  { %v1552_v21 = vadd.f32 %v1550_v19, %v1542_v18 }
0x188d   :  { %3178 = vtanh.f32 %v1552_v21  ;;  %v1561_v29 = vpop.permute.xlu0 %1560  ;;  %v1683_v27 = vrot.slane %v1552_v21, 6 }
0x188e   :  { %v1563_v10 = vadd.f32 %v1561_v29, %v1553_v28 }
0x1890   :  { %3180 = vtanh.f32 %v1563_v10  ;;  %v1697_v30 = vrot.slane %v1563_v10, 2 }
0x1897   :  { %v3179_v61 = vpop.eup %3178 }
0x1898   :  { %1566 = vrot.lane.b32.xlu1 %v3179_v61, %s3342_s3 }
0x189a   :  { %v3181_v51 = vpop.eup %3180 }
0x189b   :  { %1572 = vrot.lane.b32.xlu0 %v3181_v51, %s3342_s3 }
0x190a   :  { %v1567_v9 = vpop.permute.xlu1 %1566 }
0x190b   :  { %v3873_v24 = vmul.f32 %v1567_v9, %v1537_v7 }
0x190d   :  { %v1573_v31 = vpop.permute.xlu0 %1572  ;;  %1577 = vrot.lane.b32.xlu0 %v3873_v24, %s3343_s17  ;;  %v1586_v12 = vmax.f32 %v3873_v24, 0.0 }
0x190e   :  { %v3877_v34 = vmul.f32 %v1573_v31, %v1541_v55 }
0x1910   :  { %v1581_v36 = vrot.slane %v3877_v34, 6  ;;  %v1587_v42 = vmax.f32 %v3877_v34, 0.0  ;;  %v1815_v34 = vld [vmem:[#allocation2] sm:$0x30] }
0x1912   :  { %1582 = vrot.lane.b32.xlu1 %v1581_v36, %s3342_s3 }
0x197f   :  { %v1578_v37 = vpop.permute.xlu0 %1577 }
0x1984   :  { %v1583_v44 = vpop.permute.xlu1 %1582 }
0x1985   :  { %v1585_v39 = vsel %vm309_vm4, %v1578_v37, %v1583_v44  ;;  %v1820_v44 = vld [vmem:[#allocation2 + $0x18] sm:$0xc] }
0x1986   :  { %2766 = vmatmul.mubr.msk.f32.vlgmr.msra.gmra.mrb[16].mxu1 %vm176_vm5, %v1585_v39 }
0x1987   :  { %2988 = vmatpush1.bf16.msra.mxu1 %v3790_v3  ;;  %1959 = vmatprep.mubr.f32.mxu1 %v3340_v1 }
0x1988   :  { %2990 = vmatprep.subr.bf16.mxu1 %v3793_v13 }
0x198b   :  { %2992 = vmatpush1.bf16.msra.mxu1 %v3796_v17 }
0x198c   :  { %2994 = vmatprep.subr.bf16.mxu1 %v3817_v23 }
0x198f   :  { %2996 = vmatpush1.bf16.msra.mxu1 %v3821_v38 }
0x1990   :  { %2998 = vmatprep.subr.bf16.mxu1 %v3823_v8 }
0x1993   :  { %3000 = vmatpush1.bf16.msra.mxu1 %v3828_v41 }
0x1994   :  { %3018 = vmatprep.subr.bf16.mxu1 %v3788_v2 }
0x1a59   :  { %v1659_v40 = vpop.f32.mrb[16].mxu1 }
0x1a5a   :  { %v1666_v20 = vrot.slane %v1659_v40, 6  ;;  %v1661_v43 = vpop.f32.mrb[17].mxu1 }
0x1a5b   :  { %v1671_v46 = vrot.slane %v1661_v43, 4 }
0x1a5c   :  { %v1668_v47 = vadd.f32 %v1666_v20, %v1664_v45 }
0x1a5d   :  { %v1673_v50 = vadd.f32 %v1671_v46, %v1669_v48 }
0x1a5e   :  { %v1674_v52 = vmul.f32 %v1668_v47, %v3558_v49 }
0x1a5f   :  { %v1678_v0 = vmul.f32 %v1673_v50, %v3558_v49 }
0x1a60   :  { %3182 = vtanh.f32 %v1674_v52 }
0x1a61   :  { %3184 = vtanh.f32 %v1678_v0 }
0x1a6a   :  { %v3183_v53 = vpop.eup %3182 }
0x1a6b   :  { %v3185_v54 = vpop.eup %3184  ;;  %v1676_v56 = vmul.f32 %v3183_v53, %v3558_v49 }
0x1a6c   :  { %v1680_v14 = vmul.f32 %v3185_v54, %v3558_v49 }
0x1a6d   :  { %v1677_v57 = vadd.f32 %v1676_v56, %v3565_v62 }
0x1a6e   :  { %v1681_v58 = vadd.f32 %v1680_v14, %v3565_v62 }
0x1a6f   :  { %1687 = vrot.lane.b32.xlu1 %v1677_v57, %s3342_s3  ;;  %v1685_v59 = vmul.f32 %v1683_v27, %v1677_v57 }
0x1a70   :  { %1701 = vrot.lane.b32.xlu0 %v1681_v58, %s3342_s3  ;;  %v1699_v60 = vmul.f32 %v1697_v30, %v1681_v58 }
0x1ae1   :  { %v1688_v15 = vpop.permute.xlu1 %1687 }
0x1ae2   :  { %v1690_v22 = vmul.f32 %v1688_v15, %v1677_v57  ;;  %v1702_v25 = vpop.permute.xlu0 %1701 }
0x1ae3   :  { %v1704_v26 = vmul.f32 %v1702_v25, %v1681_v58 }
0x1ae4   :  { %1692 = vrot.lane.b32.xlu1 %v1690_v22, %s3343_s17 }
0x1ae5   :  { %1706 = vrot.lane.b32.xlu0 %v1704_v26, %s3343_s17 }
0x1b56   :  { %v1693_v33 = vpop.permute.xlu1 %1692 }
0x1b57   :  { %v3902_v32 = vadd.f32 %v1693_v33, %v1685_v59  ;;  %v1707_v35 = vpop.permute.xlu0 %1706 }
0x1b58   :  { %v3904_v63 = vadd.f32 %v1707_v35, %v1699_v60 }
0x1b59   :  { %3186 = vtanh.f32 %v3902_v32  ;;  %v1834_v56 = vrot.slane %v3902_v32, 6 }
0x1b5a   :  { %3188 = vtanh.f32 %v3904_v63  ;;  %v1848_v14 = vrot.slane %v3904_v63, 2 }
0x1b63   :  { %v3187_v4 = vpop.eup %3186 }
0x1b64   :  { %v3189_v5 = vpop.eup %3188  ;;  %1712 = vrot.lane.b32.xlu1 %v3187_v4, %s3342_s3 }
0x1b65   :  { %1718 = vrot.lane.b32.xlu0 %v3189_v5, %s3342_s3 }
0x1bd6   :  { %v1713_v7 = vpop.permute.xlu1 %1712 }
0x1bd7   :  { %v1715_v6 = vmul.f32 %v1713_v7, %v1677_v57  ;;  %v1719_v55 = vpop.permute.xlu0 %1718 }
0x1bd8   :  { %v1721_v11 = vmul.f32 %v1719_v55, %v1681_v58 }
0x1bd9   :  { %v1732_v16 = vrot.slane %v1715_v6, 2  ;;  %1723 = vrot.lane.b32.xlu0 %v1715_v6, %s3343_s17 }
0x1bda   :  { %v1727_v18 = vrot.slane %v1721_v11, 2  ;;  %v1735_v19 = vrot.slane %v1721_v11, 6 }
0x1bdb   :  { %v3913_v21 = vmax.f32 %v1586_v12, %v1732_v16 }
0x1bdc   :  { %v3915_v28 = vmax.f32 %v1587_v42, %v1735_v19  ;;  %1728 = vrot.lane.b32.xlu1 %v1727_v18, %s3342_s3  ;;  %v1971_v19 = vld [vmem:[#allocation2 + $0x18] sm:$0x3] }
0x1c4b   :  { %v1724_v29 = vpop.permute.xlu0 %1723 }
0x1c4e   :  { %v1729_v10 = vpop.permute.xlu1 %1728 }
0x1c4f   :  { %v1731_v61 = vsel %vm309_vm4, %v1724_v29, %v1729_v10 }
0x1c50   :  { %v1741_v51 = vrot.slane %v1731_v61, 2 }
0x1c52   :  { %2767 = vmatmul.mubr.msk.f32.vlgmr.msra.gmra.mrb[10].mxu0 %vm176_vm5, %v1741_v51 }
0x1c53   :  { %3004 = vmatpush1.bf16.msra.mxu0 %v3790_v3  ;;  %2106 = vmatprep.mubr.f32.mxu0 %v3340_v1 }
0x1c54   :  { %3006 = vmatprep.subr.bf16.mxu0 %v3793_v13 }
0x1c57   :  { %3008 = vmatpush1.bf16.msra.mxu0 %v3796_v17 }
0x1c58   :  { %3010 = vmatprep.subr.bf16.mxu0 %v3817_v23 }
0x1c5b   :  { %3012 = vmatpush1.bf16.msra.mxu0 %v3821_v38 }
0x1c5c   :  { %3014 = vmatprep.subr.bf16.mxu0 %v3823_v8 }
0x1c5f   :  { %3016 = vmatpush1.bf16.msra.mxu0 %v3828_v41 }
0x1c60   :  { %3034 = vmatprep.subr.bf16.mxu0 %v3788_v2 }
0x1d25   :  { %v1810_v9 = vpop.f32.mrb[10].mxu0 }
0x1d26   :  { %v1817_v24 = vrot.slane %v1810_v9, 4  ;;  %v1812_v31 = vpop.f32.mrb[11].mxu0 }
0x1d27   :  { %v1822_v36 = vrot.slane %v1812_v31, 6 }
0x1d28   :  { %v1819_v37 = vadd.f32 %v1817_v24, %v1815_v34 }
0x1d29   :  { %v1824_v39 = vadd.f32 %v1822_v36, %v1820_v44 }
0x1d2a   :  { %v1825_v40 = vmul.f32 %v1819_v37, %v3558_v49 }
0x1d2b   :  { %v1829_v20 = vmul.f32 %v1824_v39, %v3558_v49 }
0x1d2c   :  { %3190 = vtanh.f32 %v1825_v40 }
0x1d2d   :  { %3192 = vtanh.f32 %v1829_v20 }
0x1d36   :  { %v3191_v43 = vpop.eup %3190 }
0x1d37   :  { %v3193_v45 = vpop.eup %3192  ;;  %v1827_v46 = vmul.f32 %v3191_v43, %v3558_v49 }
0x1d38   :  { %v1831_v47 = vmul.f32 %v3193_v45, %v3558_v49 }
0x1d39   :  { %v1828_v48 = vadd.f32 %v1827_v46, %v3565_v62 }
0x1d3a   :  { %v1832_v50 = vadd.f32 %v1831_v47, %v3565_v62 }
0x1d3b   :  { %1838 = vrot.lane.b32.xlu1 %v1828_v48, %s3342_s3  ;;  %v1836_v57 = vmul.f32 %v1834_v56, %v1828_v48 }
0x1d3c   :  { %1852 = vrot.lane.b32.xlu0 %v1832_v50, %s3342_s3  ;;  %v1850_v15 = vmul.f32 %v1848_v14, %v1832_v50 }
0x1dad   :  { %v1839_v52 = vpop.permute.xlu1 %1838 }
0x1dae   :  { %v1841_v0 = vmul.f32 %v1839_v52, %v1828_v48  ;;  %v1853_v53 = vpop.permute.xlu0 %1852 }
0x1daf   :  { %v1855_v54 = vmul.f32 %v1853_v53, %v1832_v50 }
0x1db0   :  { %1843 = vrot.lane.b32.xlu1 %v1841_v0, %s3343_s17 }
0x1db1   :  { %1857 = vrot.lane.b32.xlu0 %v1855_v54, %s3343_s17 }
0x1e22   :  { %v1844_v58 = vpop.permute.xlu1 %1843 }
0x1e23   :  { %v3941_v22 = vadd.f32 %v1844_v58, %v1836_v57  ;;  %v1858_v25 = vpop.permute.xlu0 %1857 }
0x1e24   :  { %v1860_v26 = vadd.f32 %v1858_v25, %v1850_v15 }
0x1e25   :  { %3194 = vtanh.f32 %v3941_v22  ;;  %v1982_v20 = vrot.slane %v3941_v22, 6 }
0x1e26   :  { %3196 = vtanh.f32 %v1860_v26  ;;  %v1996_v40 = vrot.slane %v1860_v26, 2 }
0x1e2f   :  { %v3195_v27 = vpop.eup %3194 }
0x1e30   :  { %v3197_v30 = vpop.eup %3196  ;;  %1863 = vrot.lane.b32.xlu1 %v3195_v27, %s3342_s3 }
0x1e31   :  { %1869 = vrot.lane.b32.xlu0 %v3197_v30, %s3342_s3 }
0x1ea2   :  { %v1864_v59 = vpop.permute.xlu1 %1863 }
0x1ea3   :  { %v1866_v33 = vmul.f32 %v1864_v59, %v1828_v48  ;;  %v1870_v60 = vpop.permute.xlu0 %1869 }
0x1ea4   :  { %v1872_v32 = vmul.f32 %v1870_v60, %v1832_v50 }
0x1ea5   :  { %v1883_v35 = vrot.slane %v1866_v33, 4  ;;  %1874 = vrot.lane.b32.xlu0 %v1866_v33, %s3343_s17  ;;  %v2113_v33 = vld [vmem:[#allocation2 + $0x10] sm:$0x3] }
0x1ea6   :  { %v1878_v63 = vrot.slane %v1872_v32, 6  ;;  %v1886_v4 = vrot.slane %v1872_v32, 4 }
0x1ea7   :  { %v3948_v5 = vmax.f32 %v3913_v21, %v1883_v35  ;;  %v1966_v21 = vld [vmem:[#allocation2] sm:$0xc0] }
0x1ea8   :  { %v1888_v7 = vmax.f32 %v3915_v28, %v1886_v4  ;;  %1879 = vrot.lane.b32.xlu1 %v1878_v63, %s3342_s3  ;;  %v2115_v4 = vld [vmem:[#allocation2 + $0x8] sm:$0xc0] }
0x1f17   :  { %v1875_v6 = vpop.permute.xlu0 %1874 }
0x1f1a   :  { %v1880_v55 = vpop.permute.xlu1 %1879 }
0x1f1b   :  { %v1882_v11 = vsel %vm309_vm4, %v1875_v6, %v1880_v55 }
0x1f1c   :  { %v1892_v12 = vrot.slane %v1882_v11, 4 }
0x1f1e   :  { %2768 = vmatmul.mubr.msk.f32.vlgmr.msra.gmra.mrb[18].mxu1 %vm176_vm5, %v1892_v12 }
0x1f1f   :  { %3020 = vmatpush1.bf16.msra.mxu1 %v3790_v3  ;;  %2249 = vmatprep.mubr.f32.mxu1 %v3340_v1 }
0x1f20   :  { %3022 = vmatprep.subr.bf16.mxu1 %v3793_v13 }
0x1f23   :  { %3024 = vmatpush1.bf16.msra.mxu1 %v3796_v17 }
0x1f24   :  { %3026 = vmatprep.subr.bf16.mxu1 %v3817_v23 }
0x1f27   :  { %3028 = vmatpush1.bf16.msra.mxu1 %v3821_v38 }
0x1f28   :  { %3030 = vmatprep.subr.bf16.mxu1 %v3823_v8 }
0x1f2b   :  { %3032 = vmatpush1.bf16.msra.mxu1 %v3828_v41 }
0x1f2c   :  { %3050 = vmatprep.subr.bf16.mxu1 %v3788_v2 }
0x1ff1   :  { %v1961_v16 = vpop.f32.mrb[18].mxu1 }
0x1ff2   :  { %v1968_v42 = vrot.slane %v1961_v16, 2  ;;  %v1963_v18 = vpop.f32.mrb[19].mxu1 }
0x1ff3   :  { %v1972_v28 = vadd.f32 %v1971_v19, %v1963_v18 }
0x1ff4   :  { %v1970_v29 = vadd.f32 %v1968_v42, %v1966_v21 }
0x1ff5   :  { %v1977_v10 = vmul.f32 %v1972_v28, %v3558_v49 }
0x1ff6   :  { %v1973_v61 = vmul.f32 %v1970_v29, %v3558_v49 }
0x1ff7   :  { %3198 = vtanh.f32 %v1977_v10 }
0x1ff8   :  { %3200 = vtanh.f32 %v1973_v61 }
0x2001   :  { %v3199_v51 = vpop.eup %3198 }
0x2002   :  { %v3201_v9 = vpop.eup %3200  ;;  %v1979_v24 = vmul.f32 %v3199_v51, %v3558_v49 }
0x2003   :  { %v1975_v31 = vmul.f32 %v3201_v9, %v3558_v49 }
0x2004   :  { %v1980_v2 = vadd.f32 %v1979_v24, %v3565_v62 }
0x2005   :  { %v1976_v34 = vadd.f32 %v1975_v31, %v3565_v62 }
0x2006   :  { %2000 = vrot.lane.b32.xlu0 %v1980_v2, %s3342_s3  ;;  %v1998_v43 = vmul.f32 %v1996_v40, %v1980_v2 }
0x2007   :  { %1986 = vrot.lane.b32.xlu1 %v1976_v34, %s3342_s3  ;;  %v1984_v46 = vmul.f32 %v1982_v20, %v1976_v34 }
0x2078   :  { %v2001_v36 = vpop.permute.xlu0 %2000 }
0x2079   :  { %v2003_v37 = vmul.f32 %v2001_v36, %v1980_v2  ;;  %v1987_v44 = vpop.permute.xlu1 %1986 }
0x207a   :  { %v1989_v39 = vmul.f32 %v1987_v44, %v1976_v34 }
0x207b   :  { %2005 = vrot.lane.b32.xlu0 %v2003_v37, %s3343_s17 }
0x207c   :  { %1991 = vrot.lane.b32.xlu1 %v1989_v39, %s3343_s17 }
0x20ed   :  { %v2006_v45 = vpop.permute.xlu0 %2005 }
0x20ee   :  { %v3974_v47 = vadd.f32 %v2006_v45, %v1998_v43  ;;  %v1992_v48 = vpop.permute.xlu1 %1991 }
0x20ef   :  { %v1994_v50 = vadd.f32 %v1992_v48, %v1984_v46 }
0x20f0   :  { %3202 = vtanh.f32 %v3974_v47  ;;  %v2143_v61 = vrot.slane %v3974_v47, 2 }
0x20f1   :  { %3204 = vtanh.f32 %v1994_v50  ;;  %v2129_v29 = vrot.slane %v1994_v50, 6 }
0x20fa   :  { %v3203_v52 = vpop.eup %3202 }
0x20fb   :  { %v3205_v0 = vpop.eup %3204  ;;  %2017 = vrot.lane.b32.xlu0 %v3203_v52, %s3342_s3 }
0x20fc   :  { %2011 = vrot.lane.b32.xlu1 %v3205_v0, %s3342_s3 }
0x216d   :  { %v2018_v53 = vpop.permute.xlu0 %2017 }
0x216e   :  { %v2020_v54 = vmul.f32 %v2018_v53, %v1980_v2  ;;  %v2012_v56 = vpop.permute.xlu1 %2011  ;;  %v2256_v53 = vld [vmem:[#allocation2 + $0x10] sm:$0xc] }
0x216f   :  { %v2014_v14 = vmul.f32 %v2012_v56, %v1976_v34  ;;  %v2261_v56 = vld [vmem:[#allocation2 + $0x8] sm:$0x30] }
0x2170   :  { %v2026_v57 = vrot.slane %v2020_v54, 2 }
0x2171   :  { %v2031_v58 = vrot.slane %v2014_v14, 6  ;;  %2022 = vrot.lane.b32.xlu0 %v2014_v14, %s3343_s17 }
0x2172   :  { %v3980_v15 = vmax.f32 %v1888_v7, %v2026_v57  ;;  %2027 = vrot.lane.b32.xlu1 %v2026_v57, %s3342_s3 }
0x2173   :  { %v3984_v22 = vmax.f32 %v3948_v5, %v2031_v58 }
0x21e3   :  { %v2023_v25 = vpop.permute.xlu0 %2022 }
0x21e4   :  { %v2028_v26 = vpop.permute.xlu1 %2027 }
0x21e5   :  { %v2030_v27 = vsel %vm309_vm4, %v2023_v25, %v2028_v26 }
0x21e6   :  { %v2039_v30 = vrot.slane %v2030_v27, 6 }
0x21e8   :  { %2769 = vmatmul.mubr.msk.f32.vlgmr.msra.gmra.mrb[12].mxu0 %vm176_vm5, %v2039_v30 }
0x21e9   :  { %3036 = vmatpush1.bf16.msra.mxu0 %v3790_v3  ;;  %2400 = vmatprep.mubr.f32.mxu0 %v3340_v1 }
0x21ea   :  { %3038 = vmatprep.subr.bf16.mxu0 %v3793_v13 }
0x21ed   :  { %3040 = vmatpush1.bf16.msra.mxu0 %v3796_v17 }
0x21ee   :  { %3042 = vmatprep.subr.bf16.mxu0 %v3817_v23 }
0x21f1   :  { %3044 = vmatpush1.bf16.msra.mxu0 %v3821_v38 }
0x21f2   :  { %3046 = vmatprep.subr.bf16.mxu0 %v3823_v8 }
0x21f5   :  { %3048 = vmatpush1.bf16.msra.mxu0 %v3828_v41 }
0x22bb   :  { %v2108_v59 = vpop.f32.mrb[12].mxu0 }
0x22bc   :  { %v2114_v60 = vadd.f32 %v2113_v33, %v2108_v59  ;;  %v2110_v32 = vpop.f32.mrb[13].mxu0 }
0x22bd   :  { %v2117_v35 = vrot.slane %v2110_v32, 2 }
0x22be   :  { %v2120_v63 = vmul.f32 %v2114_v60, %v3558_v49 }
0x22bf   :  { %v2119_v5 = vadd.f32 %v2117_v35, %v2115_v4 }
0x22c0   :  { %3206 = vtanh.f32 %v2120_v63 }
0x22c1   :  { %v2124_v7 = vmul.f32 %v2119_v5, %v3558_v49 }
0x22c3   :  { %3208 = vtanh.f32 %v2124_v7 }
0x22ca   :  { %v3207_v6 = vpop.eup %3206 }
0x22cb   :  { %v2122_v55 = vmul.f32 %v3207_v6, %v3558_v49 }
0x22cd   :  { %v3209_v11 = vpop.eup %3208  ;;  %v2123_v12 = vadd.f32 %v2122_v55, %v3565_v62 }
0x22ce   :  { %v2126_v16 = vmul.f32 %v3209_v11, %v3558_v49 }
0x22cf   :  { %2133 = vrot.lane.b32.xlu1 %v2123_v12, %s3342_s3  ;;  %v2131_v10 = vmul.f32 %v2129_v29, %v2123_v12 }
0x22d0   :  { %v2127_v42 = vadd.f32 %v2126_v16, %v3565_v62 }
0x22d2   :  { %2147 = vrot.lane.b32.xlu0 %v2127_v42, %s3342_s3  ;;  %v2145_v24 = vmul.f32 %v2143_v61, %v2127_v42 }
0x2341   :  { %v2134_v18 = vpop.permute.xlu1 %2133 }
0x2342   :  { %v2136_v19 = vmul.f32 %v2134_v18, %v2123_v12 }
0x2344   :  { %2138 = vrot.lane.b32.xlu1 %v2136_v19, %s3343_s17  ;;  %v2148_v21 = vpop.permute.xlu0 %2147 }
0x2345   :  { %v2150_v28 = vmul.f32 %v2148_v21, %v2127_v42 }
0x2347   :  { %2152 = vrot.lane.b32.xlu0 %v2150_v28, %s3343_s17 }
0x23b6   :  { %v2139_v51 = vpop.permute.xlu1 %2138 }
0x23b7   :  { %v2141_v9 = vadd.f32 %v2139_v51, %v2131_v10 }
0x23b9   :  { %3210 = vtanh.f32 %v2141_v9  ;;  %v2153_v31 = vpop.permute.xlu0 %2152  ;;  %v2275_v59 = vrot.slane %v2141_v9, 6 }
0x23ba   :  { %v2155_v2 = vadd.f32 %v2153_v31, %v2145_v24 }
0x23bc   :  { %3212 = vtanh.f32 %v2155_v2  ;;  %v2289_v33 = vrot.slane %v2155_v2, 2  ;;  %v2407_v2 = vld [vmem:[#allocation2 + $0x10] sm:$0x30] }
0x23c3   :  { %v3211_v34 = vpop.eup %3210 }
0x23c4   :  { %2158 = vrot.lane.b32.xlu1 %v3211_v34, %s3342_s3 }
0x23c6   :  { %v3213_v36 = vpop.eup %3212 }
0x23c7   :  { %2164 = vrot.lane.b32.xlu0 %v3213_v36, %s3342_s3  ;;  %v2412_v36 = vld [vmem:[#allocation2 + $0x8] sm:$0xc] }
0x2436   :  { %v2159_v37 = vpop.permute.xlu1 %2158 }
0x2437   :  { %v4009_v44 = vmul.f32 %v2159_v37, %v2123_v12 }
0x2439   :  { %v2178_v39 = vmax.f32 %v3984_v22, %v4009_v44  ;;  %2169 = vrot.lane.b32.xlu0 %v4009_v44, %s3343_s17  ;;  %v2165_v40 = vpop.permute.xlu0 %2164 }
0x243a   :  { %v4015_v20 = vmul.f32 %v2165_v40, %v2127_v42 }
0x243c   :  { %v2173_v43 = vrot.slane %v4015_v20, 6  ;;  %v2179_v45 = vmax.f32 %v3980_v15, %v4015_v20 }
0x243e   :  { %2174 = vrot.lane.b32.xlu1 %v2173_v43, %s3342_s3 }
0x24ab   :  { %v2170_v46 = vpop.permute.xlu0 %2169 }
0x24b0   :  { %v2175_v47 = vpop.permute.xlu1 %2174 }
0x24b1   :  { %v2177_v48 = vsel %vm309_vm4, %v2170_v46, %v2175_v47 }
0x24b2   :  { %2770 = vmatmul.mubr.msk.f32.vlgmr.msra.gmra.mrb[20].mxu1 %vm176_vm5, %v2177_v48 }
0x24b3   :  { %3052 = vmatpush1.bf16.msra.mxu1 %v3790_v3  ;;  %2551 = vmatprep.mubr.f32.mxu1 %v3340_v1 }
0x24b4   :  { %3054 = vmatprep.subr.bf16.mxu1 %v3793_v13 }
0x24b7   :  { %3056 = vmatpush1.bf16.msra.mxu1 %v3796_v17 }
0x24b8   :  { %3058 = vmatprep.subr.bf16.mxu1 %v3817_v23 }
0x24bb   :  { %3060 = vmatpush1.bf16.msra.mxu1 %v3821_v38 }
0x24bc   :  { %3062 = vmatprep.subr.bf16.mxu1 %v3823_v8 }
0x24bf   :  { %3064 = vmatpush1.bf16.msra.mxu1 %v3828_v41 }
0x2585   :  { %v2251_v50 = vpop.f32.mrb[20].mxu1 }
0x2586   :  { %v2258_v52 = vrot.slane %v2251_v50, 6  ;;  %v2253_v0 = vpop.f32.mrb[21].mxu1 }
0x2587   :  { %v2263_v54 = vrot.slane %v2253_v0, 4 }
0x2588   :  { %v2260_v3 = vadd.f32 %v2258_v52, %v2256_v53 }
0x2589   :  { %v2265_v14 = vadd.f32 %v2263_v54, %v2261_v56 }
0x258a   :  { %v2266_v13 = vmul.f32 %v2260_v3, %v3558_v49 }
0x258b   :  { %v2270_v17 = vmul.f32 %v2265_v14, %v3558_v49 }
0x258c   :  { %3214 = vtanh.f32 %v2266_v13 }
0x258d   :  { %3216 = vtanh.f32 %v2270_v17 }
0x2596   :  { %v3215_v23 = vpop.eup %3214 }
0x2597   :  { %v3217_v38 = vpop.eup %3216  ;;  %v2268_v8 = vmul.f32 %v3215_v23, %v3558_v49 }
0x2598   :  { %v2272_v41 = vmul.f32 %v3217_v38, %v3558_v49 }
0x2599   :  { %v2269_v57 = vadd.f32 %v2268_v8, %v3565_v62 }
0x259a   :  { %v2273_v58 = vadd.f32 %v2272_v41, %v3565_v62 }
0x259b   :  { %2279 = vrot.lane.b32.xlu1 %v2269_v57, %s3342_s3  ;;  %v2277_v60 = vmul.f32 %v2275_v59, %v2269_v57 }
0x259c   :  { %2293 = vrot.lane.b32.xlu0 %v2273_v58, %s3342_s3  ;;  %v2291_v35 = vmul.f32 %v2289_v33, %v2273_v58 }
0x260d   :  { %v2280_v25 = vpop.permute.xlu1 %2279 }
0x260e   :  { %v2282_v26 = vmul.f32 %v2280_v25, %v2269_v57  ;;  %v2294_v27 = vpop.permute.xlu0 %2293 }
0x260f   :  { %v2296_v30 = vmul.f32 %v2294_v27, %v2273_v58 }
0x2610   :  { %2284 = vrot.lane.b32.xlu1 %v2282_v26, %s3343_s17 }
0x2611   :  { %2298 = vrot.lane.b32.xlu0 %v2296_v30, %s3343_s17 }
0x2682   :  { %v2285_v32 = vpop.permute.xlu1 %2284 }
0x2683   :  { %v2287_v63 = vadd.f32 %v2285_v32, %v2277_v60  ;;  %v2299_v4 = vpop.permute.xlu0 %2298 }
0x2684   :  { %v2301_v5 = vadd.f32 %v2299_v4, %v2291_v35 }
0x2685   :  { %3218 = vtanh.f32 %v2287_v63  ;;  %v2426_v0 = vrot.slane %v2287_v63, 6 }
0x2686   :  { %3220 = vtanh.f32 %v2301_v5  ;;  %v2440_v53 = vrot.slane %v2301_v5, 2 }
0x268f   :  { %v3219_v7 = vpop.eup %3218 }
0x2690   :  { %v3221_v6 = vpop.eup %3220  ;;  %2304 = vrot.lane.b32.xlu1 %v3219_v7, %s3342_s3  ;;  %v2563_v7 = vld [vmem:[#allocation2 + $0x8] sm:$0x3] }
0x2691   :  { %2310 = vrot.lane.b32.xlu0 %v3221_v6, %s3342_s3  ;;  %v2558_v6 = vld [vmem:[#allocation2 + $0x10] sm:$0xc0] }
0x2702   :  { %v2305_v55 = vpop.permute.xlu1 %2304 }
0x2703   :  { %v2307_v11 = vmul.f32 %v2305_v55, %v2269_v57  ;;  %v2311_v12 = vpop.permute.xlu0 %2310 }
0x2704   :  { %v2313_v16 = vmul.f32 %v2311_v12, %v2273_v58 }
0x2705   :  { %v2324_v42 = vrot.slane %v2307_v11, 2  ;;  %2315 = vrot.lane.b32.xlu0 %v2307_v11, %s3343_s17 }
0x2706   :  { %v2319_v18 = vrot.slane %v2313_v16, 2  ;;  %v2327_v19 = vrot.slane %v2313_v16, 6 }
0x2707   :  { %v2326_v21 = vmax.f32 %v2178_v39, %v2324_v42 }
0x2708   :  { %v2329_v28 = vmax.f32 %v2179_v45, %v2327_v19  ;;  %2320 = vrot.lane.b32.xlu1 %v2319_v18, %s3342_s3 }
0x2777   :  { %v2316_v29 = vpop.permute.xlu0 %2315 }
0x277a   :  { %v2321_v10 = vpop.permute.xlu1 %2320 }
0x277b   :  { %v2323_v61 = vsel %vm309_vm4, %v2316_v29, %v2321_v10 }
0x277c   :  { %v2333_v51 = vrot.slane %v2323_v61, 2 }
0x277e   :  { %2771 = vmatmul.mubr.msk.f32.vlgmr.msra.gmra.mrb[14].mxu0 %vm176_vm5, %v2333_v51 }
0x277f   :  { %2806 = vmatprep.mubr.msk.f32.mxu0 %vm3345_vm10, %v3340_v1 }
0x2851   :  { %v2402_v9 = vpop.f32.mrb[14].mxu0 }
0x2852   :  { %v2409_v24 = vrot.slane %v2402_v9, 4  ;;  %v2404_v31 = vpop.f32.mrb[15].mxu0 }
0x2853   :  { %v2414_v34 = vrot.slane %v2404_v31, 6 }
0x2854   :  { %v2411_v22 = vadd.f32 %v2409_v24, %v2407_v2 }
0x2855   :  { %v2416_v37 = vadd.f32 %v2414_v34, %v2412_v36 }
0x2856   :  { %v2417_v15 = vmul.f32 %v2411_v22, %v3558_v49 }
0x2857   :  { %v2421_v44 = vmul.f32 %v2416_v37, %v3558_v49  ;;  %v2638_v37 = vld [vmem:[%s4181_s7] sm:$0xff] }
0x2858   :  { %3222 = vtanh.f32 %v2417_v15  ;;  %v2639_v15 = vld [vmem:[%s4181_s7 + $0x8] sm:$0xff] }
0x2859   :  { %3224 = vtanh.f32 %v2421_v44  ;;  %v2640_v44 = vld [vmem:[%s4181_s7 + $0x10] sm:$0xff] }
0x2862   :  { %v3223_v39 = vpop.eup %3222 }
0x2863   :  { %v3225_v40 = vpop.eup %3224  ;;  %v2419_v20 = vmul.f32 %v3223_v39, %v3558_v49 }
0x2864   :  { %v2423_v43 = vmul.f32 %v3225_v40, %v3558_v49  ;;  %v3344_v40 = vmov 0.0|0.0  }
0x2865   :  { %v2420_v45 = vadd.f32 %v2419_v20, %v3565_v62  ;;  %3065 = vmatprep.subr.bf16.mxu0 %v3344_v40  ;;  %v3066_v20 = vpack.c.bf16 %v2639_v15, %v2638_v37 }
0x2866   :  { %v2424_v46 = vadd.f32 %v2423_v43, %v3565_v62  ;;  %v2641_v43 = vld [vmem:[%s4181_s7 + $0x18] sm:$0xff] }
0x2867   :  { %2430 = vrot.lane.b32.xlu1 %v2420_v45, %s3342_s3  ;;  %v2428_v54 = vmul.f32 %v2426_v0, %v2420_v45  ;;  %3067 = vmatpush3.bf16.msra.mxu0 %v3066_v20  ;;  %v2645_v0 = vld [vmem:[%s4181_s7 + $0x38] sm:$0xff] }
0x2868   :  { %2444 = vrot.lane.b32.xlu0 %v2424_v46, %s3342_s3  ;;  %v2442_v56 = vmul.f32 %v2440_v53, %v2424_v46  ;;  %3068 = vmatprep.subr.bf16.mxu0 %v3344_v40 }
0x28d9   :  { %v2431_v47 = vpop.permute.xlu1 %2430 }
0x28da   :  { %v2433_v48 = vmul.f32 %v2431_v47, %v2420_v45  ;;  %v2445_v50 = vpop.permute.xlu0 %2444  ;;  %v2642_v47 = vld [vmem:[%s4181_s7 + $0x20] sm:$0xff] }
0x28db   :  { %v2447_v52 = vmul.f32 %v2445_v50, %v2424_v46 }
0x28dc   :  { %2435 = vrot.lane.b32.xlu1 %v2433_v48, %s3343_s17  ;;  %v2643_v48 = vld [vmem:[%s4181_s7 + $0x28] sm:$0xff] }
0x28dd   :  { %2449 = vrot.lane.b32.xlu0 %v2447_v52, %s3343_s17  ;;  %v3072_v50 = vpack.c.bf16 %v2643_v48, %v2642_v47  ;;  %v2644_v52 = vld [vmem:[%s4181_s7 + $0x30] sm:$0xff] }
0x28de   :  { %v3075_v53 = vpack.c.bf16 %v2645_v0, %v2644_v52 }
0x294e   :  { %v2436_v3 = vpop.permute.xlu1 %2435 }
0x294f   :  { %v2438_v14 = vadd.f32 %v2436_v3, %v2428_v54  ;;  %v2450_v13 = vpop.permute.xlu0 %2449  ;;  %v1588_v54 = vld [vmem:[%s4174_s0] sm:$0x3] }
0x2950   :  { %v2452_v17 = vadd.f32 %v2450_v13, %v2442_v56  ;;  %v1589_v3 = vmax.f32 %v1588_v54, 0.0  ;;  %v1738_v56 = vld [vmem:[%s4174_s0 + $0x2] sm:$0x3]  ;;  %v1889_v13 = vld [vmem:[%s4174_s0 + $0x4] sm:$0x3] }
0x2951   :  { %3226 = vtanh.f32 %v2438_v14  ;;  %v2574_v24 = vrot.slane %v2438_v14, 6 }
0x2952   :  { %3228 = vtanh.f32 %v2452_v17  ;;  %v1739_v14 = vmax.f32 %v1589_v3, %v1738_v56 }
0x295b   :  { %v3227_v23 = vpop.eup %3226 }
0x295c   :  { %v3229_v38 = vpop.eup %3228  ;;  %2455 = vrot.lane.b32.xlu1 %v3227_v23, %s3342_s3  ;;  %v2036_v23 = vld [vmem:[%s4174_s0 + $0x6] sm:$0x3] }
0x295d   :  { %2461 = vrot.lane.b32.xlu0 %v3229_v38, %s3342_s3 }
0x29ce   :  { %v2456_v8 = vpop.permute.xlu1 %2455 }
0x29cf   :  { %v2458_v41 = vmul.f32 %v2456_v8, %v2420_v45  ;;  %v2462_v57 = vpop.permute.xlu0 %2461  ;;  %v2180_v8 = vld [vmem:[%s4174_s0 + $0x8] sm:$0x3] }
0x29d0   :  { %v2464_v58 = vmul.f32 %v2462_v57, %v2424_v46  ;;  %v3069_v46 = vpack.c.bf16 %v2641_v43, %v2640_v44  ;;  %v2646_v57 = vld [vmem:[%s4181_s7 + $0x40] sm:$0xff] }
0x29d1   :  { %v2475_v25 = vrot.slane %v2458_v41, 4  ;;  %2466 = vrot.lane.b32.xlu0 %v2458_v41, %s3343_s17 }
0x29d2   :  { %v2470_v26 = vrot.slane %v2464_v58, 6  ;;  %v2478_v27 = vrot.slane %v2464_v58, 4  ;;  %3070 = vmatpush3.bf16.msra.mxu0 %v3069_v46  ;;  %v2647_v58 = vld [vmem:[%s4181_s7 + $0x48] sm:$0xff] }
0x29d3   :  { %v4066_v30 = vmax.f32 %v2326_v21, %v2475_v25  ;;  %3071 = vmatprep.subr.bf16.mxu0 %v3344_v40  ;;  %v2330_v25 = vld [vmem:[%s4174_s0 + $0xa] sm:$0x3] }
0x29d4   :  { %v4068_v59 = vmax.f32 %v2329_v28, %v2478_v27  ;;  %2471 = vrot.lane.b32.xlu1 %v2470_v26, %s3342_s3  ;;  %v3078_v26 = vpack.c.bf16 %v2647_v58, %v2646_v57 }
0x29d6   :  { %3073 = vmatpush3.bf16.msra.mxu0 %v3072_v50 }
0x29d7   :  { %3074 = vmatprep.subr.bf16.mxu0 %v3344_v40 }
0x29da   :  { %3076 = vmatpush3.bf16.msra.mxu0 %v3075_v53 }
0x29db   :  { %3077 = vmatprep.subr.bf16.mxu0 %v3344_v40 }
0x29de   :  { %3079 = vmatpush3.bf16.msra.mxu0 %v3078_v26 }
0x2a43   :  { %v2467_v33 = vpop.permute.xlu0 %2466 }
0x2a46   :  { %v2472_v60 = vpop.permute.xlu1 %2471 }
0x2a47   :  { %v2474_v32 = vsel %vm309_vm4, %v2467_v33, %v2472_v60 }
0x2a48   :  { %v2484_v35 = vrot.slane %v2474_v32, 4 }
0x2a4a   :  { %2772 = vmatmul.mubr.msk.f32.vlgmr.msra.gmra.mrb[22].mxu1 %vm176_vm5, %v2484_v35  ;;  %v2481_v35 = vld [vmem:[%s4174_s0 + $0xc] sm:$0x3] }
0x2b1d   :  { %v2553_v63 = vpop.f32.mrb[22].mxu1 }
0x2b1e   :  { %v2560_v4 = vrot.slane %v2553_v63, 2  ;;  %v2555_v5 = vpop.f32.mrb[23].mxu1 }
0x2b1f   :  { %v2564_v55 = vadd.f32 %v2563_v7, %v2555_v5 }
0x2b20   :  { %v2562_v11 = vadd.f32 %v2560_v4, %v2558_v6 }
0x2b21   :  { %v2569_v12 = vmul.f32 %v2564_v55, %v3558_v49  ;;  %v2621_v55 = vld [vmem:[%s4174_s0 + $0xe] sm:$0x3] }
0x2b22   :  { %v2565_v16 = vmul.f32 %v2562_v11, %v3558_v49 }
0x2b23   :  { %3230 = vtanh.f32 %v2569_v12 }
0x2b24   :  { %3232 = vtanh.f32 %v2565_v16 }
0x2b2d   :  { %v3231_v42 = vpop.eup %3230 }
0x2b2e   :  { %v3233_v18 = vpop.eup %3232  ;;  %v2571_v19 = vmul.f32 %v3231_v42, %v3558_v49 }
0x2b2f   :  { %v2567_v21 = vmul.f32 %v3233_v18, %v3558_v49  ;;  %v2588_v49 = vrot.slane %v2452_v17, 2  ;;  %v1890_v17 = vmax.f32 %v1739_v14, %v1889_v13 }
0x2b30   :  { %v4078_v28 = vadd.f32 %v2571_v19, %v3565_v62 }
0x2b31   :  { %v4081_v29 = vadd.f32 %v2567_v21, %v3565_v62  ;;  %v2037_v38 = vmax.f32 %v1890_v17, %v2036_v23 }
0x2b32   :  { %2592 = vrot.lane.b32.xlu0 %v4078_v28, %s3342_s3  ;;  %v2590_v62 = vmul.f32 %v2588_v49, %v4078_v28 }
0x2b33   :  { %2578 = vrot.lane.b32.xlu1 %v4081_v29, %s3342_s3  ;;  %v2576_v2 = vmul.f32 %v2574_v24, %v4081_v29  ;;  %v2181_v41 = vmax.f32 %v2037_v38, %v2180_v8 }
0x2b35   :  { %v2331_v33 = vmax.f32 %v2181_v41, %v2330_v25 }
0x2b37   :  { %v2482_v7 = vmax.f32 %v2331_v33, %v2481_v35 }
0x2b39   :  { %v2622_v12 = vmax.f32 %v2482_v7, %v2621_v55 }
0x2ba4   :  { %v2593_v10 = vpop.permute.xlu0 %2592 }
0x2ba5   :  { %v2595_v61 = vmul.f32 %v2593_v10, %v4078_v28  ;;  %v2579_v51 = vpop.permute.xlu1 %2578 }
0x2ba6   :  { %v2581_v9 = vmul.f32 %v2579_v51, %v4081_v29 }
0x2ba7   :  { %2597 = vrot.lane.b32.xlu0 %v2595_v61, %s3343_s17 }
0x2ba8   :  { %2583 = vrot.lane.b32.xlu1 %v2581_v9, %s3343_s17 }
0x2c19   :  { %v2598_v31 = vpop.permute.xlu0 %2597 }
0x2c1a   :  { %v2600_v34 = vadd.f32 %v2598_v31, %v2590_v62  ;;  %v2584_v22 = vpop.permute.xlu1 %2583 }
0x2c1b   :  { %v2586_v36 = vadd.f32 %v2584_v22, %v2576_v2 }
0x2c1c   :  { %3234 = vtanh.f32 %v2600_v34 }
0x2c1d   :  { %3236 = vtanh.f32 %v2586_v36 }
0x2c26   :  { %v3235_v39 = vpop.eup %3234 }
0x2c27   :  { %v3237_v45 = vpop.eup %3236  ;;  %2609 = vrot.lane.b32.xlu0 %v3235_v39, %s3342_s3 }
0x2c28   :  { %2603 = vrot.lane.b32.xlu1 %v3237_v45, %s3342_s3 }
0x2c99   :  { %v2610_v27 = vpop.permute.xlu0 %2609 }
0x2c9a   :  { %v2612_v60 = vmul.f32 %v2610_v27, %v4078_v28  ;;  %v2604_v32 = vpop.permute.xlu1 %2603 }
0x2c9b   :  { %v2606_v63 = vmul.f32 %v2604_v32, %v4081_v29 }
0x2c9c   :  { %v2618_v4 = vrot.slane %v2612_v60, 2 }
0x2c9d   :  { %v2614_v5 = vrot.slane %v2606_v63, 6 }
0x2c9e   :  { %v2620_v6 = vmax.f32 %v4068_v59, %v2618_v4 }
0x2c9f   :  { %v2616_v1 = vmax.f32 %v4066_v30, %v2614_v5  ;;  %v2773_v30 = vld [vmem:[%s4182_s8] ss:$0 sm:$0xff] }
0x2ca0   :  { %v2628_v11 = vrot.slane %v2620_v6, 6 }
0x2ca1   :  { %2624 = vrot.lane.b32.xlu0 %v2616_v1, %s3343_s17  ;;  %s2737_s17 = sshll.u32 %s3346_s28, 4  ;;  %s2738_s17 = int_to_ptr.vmem [resolvable:$true] %s2737_s17 }
0x2ca2   :  { %2629 = vrot.lane.b32.xlu1 %v2628_v11, %s3342_s3  ;;  %p3309_p11 = scmp.lt.s32.totalorder %s2738_s17, %s2738_s17 }
0x2ca5   :  { %2633 = vrot.lane.b32.xlu0 %v2622_v12, %s3342_s3  ;;  %s3304_s3 = scalar_lea.vmem %s2738_s17, 32 }
0x2ca6   :  { %p3305_p10 = scmp.ne.s32.totalorder %s2738_s17, %s3304_s3  ;;  %p3310_p12 = scmp.lt.s32.totalorder %s3304_s3, %s3304_s3 }
0x2ca8   :  { %p3311_p13 = por %p3310_p12, %p3309_p11 }
0x2caa   :  { %p3312_p0 = pnand %p3311_p13, %p3305_p10 }
0x2d13   :  { %v2625_v16 = vpop.permute.xlu0 %2624 }
0x2d14   :  { %v2630_v42 = vpop.permute.xlu1 %2629 }
0x2d15   :  { %v2636_v18 = vsel %vm309_vm4, %v2625_v16, %v2630_v42 }
0x2d17   :  { %v2634_v59 = vpop.permute.xlu0 %2633 }
0x2d18   :  { %v2637_v19 = vsel %vm176_vm5, %v2636_v18, %v2634_v59 }
0x2d19   :  { %2807 = vmatmul.mubr.msk.f32.vlgmr.msra.gmra.mrb[16].mxu0 %vm2655_vm11, %v2637_v19 }
0x2dec   :  { %v2725_v21 = vpop.f32.mrb[16].mxu0 }
0x2ded   :  { %v2726_v28 = vadd.f32 %v2773_v30, %v2725_v21  ;;  %v2808_v29 = vpop.f32.mrb[17].mxu0 }
0x2def   :  { %2730 = vst.msk [vmem:[#allocation10] sm:$0x3] %vm2729_vm12, %v2726_v28 }
0x2df0   :  { %3315 = shalt.err (!%p3312_p0)
}
0x2df1   :  { %s3316_s30 = scalar_lea.hbm %s4183_s9, 32 }
0x2df2   :  { %p3317_p1 = scmp.ne.s32.totalorder %s4183_s9, %s3316_s30  ;;  %p3320_p2 = scmp.lt.u32.totalorder %s3316_s30, %s4183_s9 }
0x2df4   :  { %p3322_p3 = pnand %p3320_p2, %p3317_p1 }
0x2df6   :  { %3325 = shalt.err (!%p3322_p3)
}
0x2df7   :  { %2740 = dma.vmem_to_hbm [thread:$0]  %s2738_s17, 32, %s4183_s9, [#allocation6]  }
0x2df8   :  { %3330 = dma.done.wait [#allocation6], 32  }
0x2df9   :  { %3331 = vsyncadd [#allocation6], 4294967264 }
0x2dfa   :  { %2744 = vsyncpa [#allocation5], 1 }
0x2dfb   :  { %2745 = vsyncpa [#allocation8], 1 }
0x2dfc   :  { %2746 = vsyncpa [#allocation6], 1 }

</bundles_post_ra>
